<compile_context>
chip_gen: v7x
topology: tpu7x:2x2x1
jax: 0.10.0
libtpu: 0.0.40
codegen_flags: <defaults>
</compile_context>

<pallas_src>
import functools

import jax
import jax.numpy as jnp
from jax.experimental import pallas as pl
from jax.experimental.pallas import tpu as pltpu

F_IN = 255          # fc1 in_features (unpadded; Mosaic pads the K dim itself)
H = 512             # hidden width
F_OUT_PAD = 128     # fc3 output padded from 1 -> 128 lanes (sliced outside)
BN_EPS = 1e-5
TB_DEFAULT = 2048   # batch tile upper bound (capped per call, see ig_classifier)


def _elu_bf16_supported() -> bool:
    """bf16 VPU/EUP exists on v6e/v7x; keep ELU in f32 on v5 generation."""
    try:
        kind = jax.devices()[0].device_kind.lower()
    except Exception:  # pragma: no cover - fall back to the common case
        return True
    return "v5" not in kind


ELU_BF16 = _elu_bf16_supported()


def _round_up(v: int, m: int) -> int:
    return ((v + m - 1) // m) * m


def ig_classifier_kernel(
    x_ref,                 # [TB, 255] f32 (current batch tile)
    w1_ref, b1_ref,        # [255, 512] bf16, [1, 512] f32
    w2_ref, b2_ref,        # [512, 512] bf16 (BN1 folded in), [1, 512] f32
    w3_ref, b3_ref,        # [512, 128] bf16 (BN2 folded in), [1, 128] f32
    o_ref,                 # [TB, 128] bf16 (only column 0 is meaningful)
    *, elu_bf16: bool,
):
    def act(h_f32):
        # nn.ELU(alpha=1.0): x if x > 0 else exp(x) - 1
        if elu_bf16:
            h = h_f32.astype(jnp.bfloat16)           # one cast, feeds next dot
            return jnp.where(h > 0, h, jnp.exp(h) - 1.0)
        h = jnp.where(h_f32 > 0, h_f32, jnp.exp(h_f32) - 1.0)
        return h.astype(jnp.bfloat16)

    x = x_ref[...].astype(jnp.bfloat16)

    # fc1 + ELU  (BN1 + dropout folded / identity)
    h = act(jnp.dot(x, w1_ref[...], preferred_element_type=jnp.float32)
            + b1_ref[...])

    # fc2' (= BN1-folded fc2) + ELU  (BN2 + dropout folded / identity)
    h = act(jnp.dot(h, w2_ref[...], preferred_element_type=jnp.float32)
            + b2_ref[...])

    # fc3' (= BN2-folded fc3)
    out = jnp.dot(h, w3_ref[...], preferred_element_type=jnp.float32) + b3_ref[...]
    o_ref[...] = out.astype(o_ref.dtype)


@functools.partial(jax.jit, static_argnames=("tb",))
def ig_classifier(x, p, tb=TB_DEFAULT):
    """x: [B, 255] float32. p: prepared (BN-folded, bf16) params. -> [B, 1] f32."""
    B = x.shape[0]
    # Cap the tile so the grid has >= 2 steps (keeps both v7x TCs busy), and
    # keep the sublane dim a multiple of 8.
    tb = max(8, min(tb, _round_up(pl.cdiv(B, 2), 8)))
    grid = (pl.cdiv(B, tb),)

    const2d = lambda i: (0, 0)
    in_specs = [
        pl.BlockSpec((tb, F_IN), lambda i: (i, 0)),        # x: batch-tiled
        pl.BlockSpec((F_IN, H), const2d),                  # w1 (VMEM-resident)
        pl.BlockSpec((1, H), const2d),                     # b1
        pl.BlockSpec((H, H), const2d),                     # w2'
        pl.BlockSpec((1, H), const2d),                     # b2'
        pl.BlockSpec((H, F_OUT_PAD), const2d),             # w3'
        pl.BlockSpec((1, F_OUT_PAD), const2d),             # b3'
    ]

    weight_bytes = 2 * (F_IN * H + H * H + H * F_OUT_PAD) + 4 * (H + H + F_OUT_PAD)
    cost = pl.CostEstimate(
        flops=2 * B * (F_IN * H + H * H + H * F_OUT_PAD),
        transcendentals=2 * B * H,
        bytes_accessed=B * (F_IN * 4 + F_OUT_PAD * 2) + weight_bytes,
    )

    out = pl.pallas_call(
        functools.partial(ig_classifier_kernel, elu_bf16=ELU_BF16),
        out_shape=jax.ShapeDtypeStruct((B, F_OUT_PAD), jnp.bfloat16),
        grid=grid,
        in_specs=in_specs,
        out_specs=pl.BlockSpec((tb, F_OUT_PAD), lambda i: (i, 0)),
        compiler_params=pltpu.CompilerParams(
            dimension_semantics=("parallel",),        # shards tiles on v7x's 2 TCs
            vmem_limit_bytes=48 * 1024 * 1024,        # safe on v7x's 64 MiB/TC
        ),
        cost_estimate=cost,
    )(x, p["w1"], p["b1"], p["w2"], p["b2"], p["w3"], p["b3"])

    # Only lane 0 of the padded fc3 output is real (true out_features = 1).
    return out[:, :1].astype(jnp.float32)


# ---------------------------------------------------------------------------
# Parameter construction (PyTorch-semantics raw params) and one-time prep
# ---------------------------------------------------------------------------

def make_params(key):
    """Raw, PyTorch-style params (f32). Weights stored transposed [in, out]."""
    ks = jax.random.split(key, 12)
    scale = 0.05

    def rnd(k, shape):
        return (scale * jax.random.normal(k, shape)).astype(jnp.float32)

    w1 = rnd(ks[0], (F_IN, H))            # fc1.weight.T
    b1 = rnd(ks[1], (1, H))
    g1 = 1.0 + rnd(ks[2], (1, H))         # BN1 gamma/beta/running mean/var
    be1 = rnd(ks[3], (1, H))
    m1 = rnd(ks[4], (1, H))
    v1 = 1.0 + jnp.abs(rnd(ks[5], (1, H)))

    w2 = rnd(ks[6], (H, H))
    b2 = rnd(ks[7], (1, H))
    g2 = 1.0 + rnd(ks[8], (1, H))
    be2 = rnd(ks[9], (1, H))
    m2 = rnd(ks[10], (1, H))
    v2 = 1.0 + jnp.abs(rnd(ks[11], (1, H)))

    # fc3: true shape [512, 1] -> padded to [512, 128] (extra columns zero)
    k3a, k3b = jax.random.split(ks[0])
    w3 = jnp.zeros((H, F_OUT_PAD), jnp.float32).at[:, :1].set(rnd(k3a, (H, 1)))
    b3 = jnp.zeros((1, F_OUT_PAD), jnp.float32).at[:, :1].set(rnd(k3b, (1, 1)))

    return dict(w1=w1, b1=b1, g1=g1, be1=be1, m1=m1, v1=v1,
                w2=w2, b2=b2, g2=g2, be2=be2, m2=m2, v2=v2,
                w3=w3, b3=b3)


def prepare_params(raw):
    """One-time prep: fold eval-mode BN into the following linear, cast to bf16."""
    scale1 = raw["g1"] / jnp.sqrt(raw["v1"] + BN_EPS)          # [1, H]
    shift1 = raw["be1"] - raw["m1"] * scale1
    scale2 = raw["g2"] / jnp.sqrt(raw["v2"] + BN_EPS)
    shift2 = raw["be2"] - raw["m2"] * scale2

    w2f = raw["w2"] * scale1.reshape(H, 1)                     # BN1 -> fc2
    b2f = shift1 @ raw["w2"] + raw["b2"]
    w3f = raw["w3"] * scale2.reshape(H, 1)                     # BN2 -> fc3
    b3f = shift2 @ raw["w3"] + raw["b3"]

    return dict(
        w1=raw["w1"].astype(jnp.bfloat16), b1=raw["b1"],
        w2=w2f.astype(jnp.bfloat16), b2=b2f,
        w3=w3f.astype(jnp.bfloat16), b3=b3f,
    )


# ---------------------------------------------------------------------------
# References
# ---------------------------------------------------------------------------

def reference_exact(x, p):
    """Pure f32 reference mirroring the PyTorch eval-mode forward exactly."""
    h = x @ p["w1"] + p["b1"]
    h = jnp.where(h > 0, h, jnp.exp(h) - 1.0)
    h = (h - p["m1"]) / jnp.sqrt(p["v1"] + BN_EPS) * p["g1"] + p["be1"]
    h = h @ p["w2"] + p["b2"]
    h = jnp.where(h > 0, h, jnp.exp(h) - 1.0)
    h = (h - p["m2"]) / jnp.sqrt(p["v2"] + BN_EPS) * p["g2"] + p["be2"]
    out = h @ p["w3"] + p["b3"]
    return out[:, :1]


def reference_matched(x, p):
    """Same folded / bf16 math as the kernel (modulo bf16 output rounding)."""
    def act(h):
        if ELU_BF16:
            h = h.astype(jnp.bfloat16)
            return jnp.where(h > 0, h, jnp.exp(h) - 1.0)
        return jnp.where(h > 0, h, jnp.exp(h) - 1.0).astype(jnp.bfloat16)

    h = act(jnp.dot(x.astype(jnp.bfloat16), p["w1"],
                    preferred_element_type=jnp.float32) + p["b1"])
    h = act(jnp.dot(h, p["w2"], preferred_element_type=jnp.float32) + p["b2"])
    out = jnp.dot(h, p["w3"], preferred_element_type=jnp.float32) + p["b3"]
    return out[:, :1]


if __name__ == "__main__":
    key = jax.random.PRNGKey(0)
    kx, kp = jax.random.split(key)

    raw = make_params(kp)
    prepared = prepare_params(raw)

    def check(B):
        x = jax.random.normal(jax.random.fold_in(kx, B), (B, F_IN),
                              dtype=jnp.float32)
        y = jax.block_until_ready(ig_classifier(x, prepared))
        assert y.shape == (B, 1), y.shape

        # Tight check vs. a reference using identical folded/bf16 math
        # (tolerance covers the bf16 output rounding of the kernel result).
        y_matched = reference_matched(x, prepared)
        err_m = float(jnp.max(jnp.abs(y - y_matched)))
        assert err_m < 2.5e-2, f"matched-precision mismatch (B={B}): {err_m}"

        # Loose check vs. the exact f32 PyTorch-semantics forward.
        y_exact = reference_exact(x, raw)
        err_e = float(jnp.max(jnp.abs(y - y_exact)))
        assert err_e < 1.5e-1, f"exact-math mismatch too large (B={B}): {err_e}"

    check(512)   # two even batch tiles -> exercises the pipelined grid
    check(300)   # ragged last tile -> exercises masked OOB output store

    print("KERNEL_OK")
</pallas_src>

<mosaic_0001>
module attributes {stable_mosaic.version = 11 : i64} {
  func.func @ig_classifier_kernel(%arg0: i32, %arg1: memref<256x255xf32, #tpu.memory_space<vmem>>, %arg2: memref<255x512xbf16, #tpu.memory_space<vmem>>, %arg3: memref<1x512xf32, #tpu.memory_space<vmem>>, %arg4: memref<512x512xbf16, #tpu.memory_space<vmem>>, %arg5: memref<1x512xf32, #tpu.memory_space<vmem>>, %arg6: memref<512x128xbf16, #tpu.memory_space<vmem>>, %arg7: memref<1x128xf32, #tpu.memory_space<vmem>>, %arg8: memref<256x128xbf16, #tpu.memory_space<vmem>>) attributes {dimension_semantics = [#tpu.dimension_semantics<parallel>], iteration_bounds = array<i64: 2>, scalar_prefetch = 0 : i64, scratch_operands = 0 : i64, tpu.core_type = #tpu.core_type<tc>, window_params = [{transform_indices = @transform_0, window_bounds = array<i64: 256, 255>}, {pipeline_mode = #tpu.pipeline_mode<synchronous>, transform_indices = @transform_1, window_bounds = array<i64: 255, 512>}, {pipeline_mode = #tpu.pipeline_mode<synchronous>, transform_indices = @transform_2, window_bounds = array<i64: 1, 512>}, {pipeline_mode = #tpu.pipeline_mode<synchronous>, transform_indices = @transform_3, window_bounds = array<i64: 512, 512>}, {pipeline_mode = #tpu.pipeline_mode<synchronous>, transform_indices = @transform_4, window_bounds = array<i64: 1, 512>}, {pipeline_mode = #tpu.pipeline_mode<synchronous>, transform_indices = @transform_5, window_bounds = array<i64: 512, 128>}, {pipeline_mode = #tpu.pipeline_mode<synchronous>, transform_indices = @transform_6, window_bounds = array<i64: 1, 128>}, {transform_indices = @transform_7, window_bounds = array<i64: 256, 128>}]} {
    %c0 = arith.constant 0 : index
    %c0_0 = arith.constant 0 : index
    %0 = vector.load %arg1[%c0, %c0_0] : memref<256x255xf32, #tpu.memory_space<vmem>>, vector<256x255xf32>
    %1 = arith.truncf %0 : vector<256x255xf32> to vector<256x255xbf16>
    %c0_1 = arith.constant 0 : index
    %c0_2 = arith.constant 0 : index
    %2 = vector.load %arg2[%c0_1, %c0_2] : memref<255x512xbf16, #tpu.memory_space<vmem>>, vector<255x512xbf16>
    %cst = arith.constant dense<0.000000e+00> : vector<256x512xf32>
    %3 = tpu.matmul %1, %2, %cst {dimension_numbers = #tpu.dot_dimension_numbers<[1], [0], [0], [1], [0, 0, 1, 1], [], []>} : vector<256x255xbf16>, vector<255x512xbf16>, vector<256x512xf32> -> vector<256x512xf32>
    %c0_3 = arith.constant 0 : index
    %c0_4 = arith.constant 0 : index
    %4 = vector.load %arg3[%c0_3, %c0_4] : memref<1x512xf32, #tpu.memory_space<vmem>>, vector<1x512xf32>
    %5 = vector.broadcast %4 : vector<1x512xf32> to vector<256x512xf32>
    %6 = arith.addf %3, %5 : vector<256x512xf32>
    %7 = arith.truncf %6 : vector<256x512xf32> to vector<256x512xbf16>
    %cst_5 = arith.constant 0.000000e+00 : bf16
    %8 = vector.broadcast %cst_5 : bf16 to vector<256x512xbf16>
    %9 = arith.cmpf ogt, %7, %8 : vector<256x512xbf16>
    %10 = math.exp %7 : vector<256x512xbf16>
    %cst_6 = arith.constant 1.000000e+00 : bf16
    %11 = vector.broadcast %cst_6 : bf16 to vector<256x512xbf16>
    %12 = arith.subf %10, %11 : vector<256x512xbf16>
    %13 = arith.select %9, %7, %12 : vector<256x512xi1>, vector<256x512xbf16>
    %c0_7 = arith.constant 0 : index
    %c0_8 = arith.constant 0 : index
    %14 = vector.load %arg4[%c0_7, %c0_8] : memref<512x512xbf16, #tpu.memory_space<vmem>>, vector<512x512xbf16>
    %cst_9 = arith.constant dense<0.000000e+00> : vector<256x512xf32>
    %15 = tpu.matmul %13, %14, %cst_9 {dimension_numbers = #tpu.dot_dimension_numbers<[1], [0], [0], [1], [0, 0, 1, 1], [], []>} : vector<256x512xbf16>, vector<512x512xbf16>, vector<256x512xf32> -> vector<256x512xf32>
    %c0_10 = arith.constant 0 : index
    %c0_11 = arith.constant 0 : index
    %16 = vector.load %arg5[%c0_10, %c0_11] : memref<1x512xf32, #tpu.memory_space<vmem>>, vector<1x512xf32>
    %17 = vector.broadcast %16 : vector<1x512xf32> to vector<256x512xf32>
    %18 = arith.addf %15, %17 : vector<256x512xf32>
    %19 = arith.truncf %18 : vector<256x512xf32> to vector<256x512xbf16>
    %cst_12 = arith.constant 0.000000e+00 : bf16
    %20 = vector.broadcast %cst_12 : bf16 to vector<256x512xbf16>
    %21 = arith.cmpf ogt, %19, %20 : vector<256x512xbf16>
    %22 = math.exp %19 : vector<256x512xbf16>
    %cst_13 = arith.constant 1.000000e+00 : bf16
    %23 = vector.broadcast %cst_13 : bf16 to vector<256x512xbf16>
    %24 = arith.subf %22, %23 : vector<256x512xbf16>
    %25 = arith.select %21, %19, %24 : vector<256x512xi1>, vector<256x512xbf16>
    %c0_14 = arith.constant 0 : index
    %c0_15 = arith.constant 0 : index
    %26 = vector.load %arg6[%c0_14, %c0_15] : memref<512x128xbf16, #tpu.memory_space<vmem>>, vector<512x128xbf16>
    %cst_16 = arith.constant dense<0.000000e+00> : vector<256x128xf32>
    %27 = tpu.matmul %25, %26, %cst_16 {dimension_numbers = #tpu.dot_dimension_numbers<[1], [0], [0], [1], [0, 0, 1, 1], [], []>} : vector<256x512xbf16>, vector<512x128xbf16>, vector<256x128xf32> -> vector<256x128xf32>
    %c0_17 = arith.constant 0 : index
    %c0_18 = arith.constant 0 : index
    %28 = vector.load %arg7[%c0_17, %c0_18] : memref<1x128xf32, #tpu.memory_space<vmem>>, vector<1x128xf32>
    %29 = vector.broadcast %28 : vector<1x128xf32> to vector<256x128xf32>
    %30 = arith.addf %27, %29 : vector<256x128xf32>
    %31 = arith.truncf %30 : vector<256x128xf32> to vector<256x128xbf16>
    %c0_19 = arith.constant 0 : index
    %c0_20 = arith.constant 0 : index
    %32 = vector.load %arg8[%c0_19, %c0_20] : memref<256x128xbf16, #tpu.memory_space<vmem>>, vector<256x128xbf16>
    tpu.vector_store %arg8[%c0_19, %c0_20], %31 {strides = array<i32>} : memref<256x128xbf16, #tpu.memory_space<vmem>>, vector<256x128xbf16>,
    return
  }
  func.func @transform_0(%arg0: i32) -> (i32, i32) {
    %c0_i32 = arith.constant 0 : i32
    %c0_i32_0 = arith.constant 0 : i32
    return %arg0, %c0_i32 : i32, i32
  }
  func.func @transform_1(%arg0: i32) -> (i32, i32) {
    %c0_i32 = arith.constant 0 : i32
    %c0_i32_0 = arith.constant 0 : i32
    %c0_i32_1 = arith.constant 0 : i32
    return %c0_i32, %c0_i32_0 : i32, i32
  }
  func.func @transform_2(%arg0: i32) -> (i32, i32) {
    %c0_i32 = arith.constant 0 : i32
    %c0_i32_0 = arith.constant 0 : i32
    %c0_i32_1 = arith.constant 0 : i32
    return %c0_i32, %c0_i32_0 : i32, i32
  }
  func.func @transform_3(%arg0: i32) -> (i32, i32) {
    %c0_i32 = arith.constant 0 : i32
    %c0_i32_0 = arith.constant 0 : i32
    %c0_i32_1 = arith.constant 0 : i32
    return %c0_i32, %c0_i32_0 : i32, i32
  }
  func.func @transform_4(%arg0: i32) -> (i32, i32) {
    %c0_i32 = arith.constant 0 : i32
    %c0_i32_0 = arith.constant 0 : i32
    %c0_i32_1 = arith.constant 0 : i32
    return %c0_i32, %c0_i32_0 : i32, i32
  }
  func.func @transform_5(%arg0: i32) -> (i32, i32) {
    %c0_i32 = arith.constant 0 : i32
    %c0_i32_0 = arith.constant 0 : i32
    %c0_i32_1 = arith.constant 0 : i32
    return %c0_i32, %c0_i32_0 : i32, i32
  }
  func.func @transform_6(%arg0: i32) -> (i32, i32) {
    %c0_i32 = arith.constant 0 : i32
    %c0_i32_0 = arith.constant 0 : i32
    %c0_i32_1 = arith.constant 0 : i32
    return %c0_i32, %c0_i32_0 : i32, i32
  }
  func.func @transform_7(%arg0: i32) -> (i32, i32) {
    %c0_i32 = arith.constant 0 : i32
    %c0_i32_0 = arith.constant 0 : i32
    return %arg0, %c0_i32 : i32, i32
  }
}

</mosaic_0001>

<bundles_post_ra>
// kernel: ig_classifier.1
= control target key start
LH: loop header
LB: loop body
LE: loop exit
PB: predicated region body
PF: predicated region fallthrough
CT: control target
= control target key end

     0   :  { %12 = vsyncpa [#allocation3], 0  ;;  %s8025_s0 = inlined_call_operand.hbm [shape: f32[512,255], index: 0, kind: input, shape index: {}]   ;;  %s8026_s1 = inlined_call_operand.hbm [shape: bf16[255,512], index: 1, kind: input, shape index: {}]   ;;  %s8027_s2 = inlined_call_operand.hbm [shape: f32[1,512], index: 2, kind: input, shape index: {}]   ;;  %s8028_s3 = inlined_call_operand.hbm [shape: bf16[512,512], index: 3, kind: input, shape index: {}]   ;;  %s8029_s4 = inlined_call_operand.vmem [shape: f32[1,512], index: 4, kind: input, shape index: {}]   ;;  %s8030_s5 = inlined_call_operand.hbm [shape: bf16[512,128], index: 5, kind: input, shape index: {}]   ;;  %s8031_s6 = inlined_call_operand.vmem [shape: f32[1,128], index: 6, kind: input, shape index: {}]   ;;  %s8032_s7 = inlined_call_operand.vmem [shape: bf16[512,128], index: 7, kind: output, shape index: {}]  }
   0x1   :  { %14 = vsyncpa [#allocation3 + $0x1], 0 }
   0x2   :  { %15 = vsyncpa [#allocation5], 0 }
   0x3   :  { %16 = vsyncpa [#allocation8], 0  ;;  %s6436_s24 = smov 0   ;;  %s6438_s25 = smov 0  }
   0x4   :  { %s6440_s26 = smov 0   ;;  %s6442_s27 = smov 0  }
   0x5 LB: > { %s4617_s28 = sadd.s32 4294967295, %s6383_s27   ;;  %p42_p0 = scmp.ne.s32.totalorder %s6375_s25, %s6371_s24  ;;  %s6383_s27 = sphi %s6442_s27, %s8049_s27   ;;  %s6379_s26 = sphi %s6440_s26, %s8048_s26   ;;  %s6375_s25 = sphi %s6438_s25, %s8047_s25   ;;  %s6371_s24 = sphi %s6436_s24, %s8046_s24  }
   0x6   : > { %p6458_p1 = scmp.eq.s32.totalorder %s4617_s28, 0  ;;  %p4619_p2 = scmp.ge.s32.totalorder %s6383_s27, 1 }
   0x7   : > { %p205_p3 = scmp.lt.s32.totalorder %s6383_s27, 3  ;;  %s6385_s9 = smov [#allocation4]  }
   0x8   : > { %s8037_s29 = scalar_select %p6458_p1, 1, 0 }
   0x9   : > { %p6466_p4 = por %p6458_p1, %p42_p0  ;;  %p6470_p5 = pnand %p4619_p2, %p205_p3 }
   0xa   : > { %s217_s10 = sshll.u32 %s6385_s9, 4  ;;  %s6386_s12 = smov [#allocation7]   ;;  %s6474_s10 = int_to_ptr.vmem [resolvable:$true] %s217_s10 }
   0xb   : > { %s8038_s30 = scalar_select %p6466_p4, 1, 0 }
   0xc   : > { %s8039_s8 = scalar_select %p6470_p5, 1, 0 }
   0xd   : > { %p5555_p6 = pneg %p6470_p5  ;;  %s241_s13 = sshll.u32 %s6386_s12, 4  ;;  %s6484_s13 = int_to_ptr.vmem [resolvable:$true] %s241_s13 }
   0xe   : > { %s6387_s14 = smov [#allocation6]   ;;  %s6199_s18 = scalar_lea.hbm %s8026_s1, 8192 }
   0xf   : > { %p6480_p7 = pnand %p5555_p6, %p6458_p1  ;;  %s6486_s15 = sshll.u32 %s6387_s14, 4  ;;  %s232_s15 = int_to_ptr.vmem [resolvable:$true] %s6486_s15 }
  0x10   : > { %p6200_p8 = scmp.ne.s32.totalorder %s8026_s1, %s6199_s18  ;;  %p6206_p12 = scmp.lt.u32.totalorder %s6199_s18, %s8026_s1 }
  0x11   : > { %p6496_p9 = pneg %p6480_p7 }
  0x13   : > { %p6202_p10 = pnand %p6496_p9, %p6200_p8 }
  0x15   : > { %p6203_p11 = pneg %p6202_p10 }
  0x17   : > { %p6208_p13 = pnand %p6206_p12, %p6203_p11 }
  0x19   : > { %6211 = shalt.err (!%p6208_p13)
}
  0x1a   : > { %s6212_s24 = scalar_lea.vmem %s6474_s10, 8192  ;;  %p6220_p6 = scmp.lt.s32.totalorder %s6474_s10, %s6474_s10 }
  0x1b   : > { %p6213_p0 = scmp.ne.s32.totalorder %s6474_s10, %s6212_s24  ;;  %p6221_p1 = scmp.lt.s32.totalorder %s6212_s24, %s6212_s24 }
  0x1d   : > { %p6215_p2 = pnand %p6213_p0, %p6496_p9  ;;  %p6222_p8 = por %p6221_p1, %p6220_p6 }
  0x1f   : > { %p6216_p3 = pneg %p6215_p2 }
  0x21   : > { %p6223_p10 = pnand %p6222_p8, %p6216_p3 }
  0x23   : > { %6226 = shalt.err (!%p6223_p10)
}
  0x24   : > { %s6388_s9 = smov 256   ;;  %s6389_s12 = smov 16  }
  0x25   : > { %5558 = dma.hbm_to_vmem [thread:$0]  (!%p6480_p7), %s8026_s1, 8192, %s6474_s10, [#allocation5], %s6388_s9, %s6388_s9, %s6389_s12  }
  0x26   : > { %s6227_s19 = scalar_lea.hbm %s8028_s3, 16384 }
  0x27   : > { %p6228_p1 = scmp.ne.s32.totalorder %s8028_s3, %s6227_s19  ;;  %p6234_p13 = scmp.lt.u32.totalorder %s6227_s19, %s8028_s3 }
  0x29   : > { %p6230_p11 = pnand %p6228_p1, %p6496_p9 }
  0x2b   : > { %p6231_p12 = pneg %p6230_p11 }
  0x2d   : > { %p6236_p0 = pnand %p6234_p13, %p6231_p12 }
  0x2f   : > { %6239 = shalt.err (!%p6236_p0)
}
  0x30   : > { %s6240_s10 = scalar_lea.vmem %s6484_s13, 16384  ;;  %p6248_p8 = scmp.lt.s32.totalorder %s6484_s13, %s6484_s13 }
  0x31   : > { %p6241_p2 = scmp.ne.s32.totalorder %s6484_s13, %s6240_s10  ;;  %p6249_p10 = scmp.lt.s32.totalorder %s6240_s10, %s6240_s10 }
  0x33   : > { %p6243_p3 = pnand %p6241_p2, %p6496_p9  ;;  %p6250_p1 = por %p6249_p10, %p6248_p8 }
  0x35   : > { %p6244_p6 = pneg %p6243_p3 }
  0x37   : > { %p6251_p11 = pnand %p6250_p1, %p6244_p6 }
  0x39   : > { %6254 = shalt.err (!%p6251_p11)
}
  0x3a   : > { %5564 = dma.hbm_to_vmem [thread:$0]  (!%p6480_p7), %s8028_s3, 16384, %s6484_s13, [#allocation8], %s6388_s9, %s6388_s9, %s6389_s12  }
  0x3b   : > { %s6255_s19 = scalar_lea.hbm %s8027_s2, 64 }
  0x3c   : > { %p6256_p12 = scmp.ne.s32.totalorder %s8027_s2, %s6255_s19  ;;  %p6262_p2 = scmp.lt.u32.totalorder %s6255_s19, %s8027_s2 }
  0x3e   : > { %p6258_p13 = pnand %p6256_p12, %p6496_p9 }
  0x40   : > { %p6259_p0 = pneg %p6258_p13 }
  0x42   : > { %p6264_p3 = pnand %p6262_p2, %p6259_p0 }
  0x44   : > { %6267 = shalt.err (!%p6264_p3)
}
  0x45   : > { %s6268_s10 = scalar_lea.vmem %s232_s15, 64  ;;  %p6276_p1 = scmp.lt.s32.totalorder %s232_s15, %s232_s15 }
  0x46   : > { %p6269_p6 = scmp.ne.s32.totalorder %s232_s15, %s6268_s10  ;;  %p6277_p11 = scmp.lt.s32.totalorder %s6268_s10, %s6268_s10 }
  0x48   : > { %p6271_p8 = pnand %p6269_p6, %p6496_p9  ;;  %p6278_p4 = por %p6277_p11, %p6276_p1 }
  0x4a   : > { %p6272_p10 = pneg %p6271_p8 }
  0x4c   : > { %p6279_p5 = pnand %p6278_p4, %p6272_p10 }
  0x4e   : > { %6282 = shalt.err (!%p6279_p5)
}
  0x4f   : > { %5561 = dma.hbm_to_vmem [thread:$0]  (!%p6480_p7), %s8027_s2, 64, %s232_s15, [#allocation5]  }
  0x50   : > { %s6390_s16 = smov [#allocation9]   ;;  %s6283_s20 = scalar_lea.hbm %s8030_s5, 4096 }
  0x51   : > { %s257_s17 = sshll.u32 %s6390_s16, 4  ;;  %p6284_p12 = scmp.ne.s32.totalorder %s8030_s5, %s6283_s20  ;;  %s258_s17 = int_to_ptr.vmem [resolvable:$true] %s257_s17 }
  0x52   : > { %p6290_p13 = scmp.lt.u32.totalorder %s6283_s20, %s8030_s5 }
  0x53   : > { %p6286_p4 = pnand %p6284_p12, %p6496_p9 }
  0x55   : > { %p6287_p5 = pneg %p6286_p4 }
  0x57   : > { %p6292_p0 = pnand %p6290_p13, %p6287_p5 }
  0x59   : > { %6295 = shalt.err (!%p6292_p0)
}
  0x5a   : > { %s6296_s15 = scalar_lea.vmem %s258_s17, 4096  ;;  %p6304_p8 = scmp.lt.s32.totalorder %s258_s17, %s258_s17 }
  0x5b   : > { %p6297_p2 = scmp.ne.s32.totalorder %s258_s17, %s6296_s15  ;;  %p6305_p10 = scmp.lt.s32.totalorder %s6296_s15, %s6296_s15 }
  0x5d   : > { %p6299_p3 = pnand %p6297_p2, %p6496_p9  ;;  %p6306_p1 = por %p6305_p10, %p6304_p8 }
  0x5f   : > { %p6300_p6 = pneg %p6299_p3 }
  0x61   : > { %p6307_p11 = pnand %p6306_p1, %p6300_p6 }
  0x63   : > { %6310 = shalt.err (!%p6307_p11)
}
  0x64   : > { %s6391_s13 = smov 64   ;;  %s6392_s21 = smov 4  }
  0x65   : > { %5567 = dma.hbm_to_vmem [thread:$0]  (!%p6480_p7), %s8030_s5, 4096, %s258_s17, [#allocation8], %s6391_s13, %s6391_s13, %s6392_s21  }
  0x66   : > { %s6584_s18 = sadd.s32 1, %s6383_s27   ;;  %s29_s20 = sadd.s32 1, %s6379_s26 }
  0x67   : > { %s26_s19 = ssub.s32 %s6383_s27, %s6584_s18  ;;  %p36_p12 = scmp.ne.s32.totalorder %s6379_s26, %s6375_s25 }
  0x68   : > { %p27_p9 = scmp.eq.s32.totalorder %s26_s19, 0  ;;  %p37_p4 = scmp.eq.s32.totalorder %s6383_s27, 0 }
  0x69   : > { %p5576_p13 = scmp.lt.s32.totalorder %s6383_s27, 2  ;;  %s274_s23 = sand.u32 1, %s6379_s26  }
  0x6a   : > { %s6593_s22 = scalar_select %p27_p9, %s6379_s26, %s29_s20  }
  0x6b   : > { %p38_p5 = por %p37_p4, %p36_p12  ;;  %s4929_s24 = sshll.u32 %s6383_s27, 13 }
  0x6c   : > { %s4625_s10 = sshll.u32 %s274_s23, 9  ;;  %s6601_s14 = scalar_lea.hbm %s8025_s0, %s4929_s24 }
  0x6d   : > { %s278_s17 = scalar_lea.vmem [#allocation2], %s4625_s10  ;;  %p6603_p7 = pnand %p5576_p13, %p38_p5 }
  0x6e   : > { %s286_s13 = sshll.u32 %s278_s17, 4  ;;  %s6609_s16 = scalar_lea.sflag [#allocation3], %s274_s23  ;;  %s6607_s13 = int_to_ptr.vmem [resolvable:$true] %s286_s13 }
  0x6f   : > { %s6311_s19 = scalar_lea.hbm %s6601_s14, 8192  ;;  %p6313_p2 = pneg %p6603_p7 }
  0x70   : > { %p6312_p0 = scmp.ne.s32.totalorder %s6601_s14, %s6311_s19  ;;  %s6316_s10 = scalar_lea.hbm %s8025_s0, 16384 }
  0x71   : > { %p6317_p8 = scmp.lt.u32.totalorder %s6601_s14, %s8025_s0  ;;  %p6318_p10 = scmp.lt.u32.totalorder %s6316_s10, %s6311_s19 }
  0x72   : > { %p6314_p3 = pnand %p6313_p2, %p6312_p0  ;;  %p6320_p11 = scmp.lt.u32.totalorder %s6311_s19, %s6601_s14 }
  0x73   : > { %p6319_p1 = por %p6318_p10, %p6317_p8 }
  0x74   : > { %p6315_p6 = pneg %p6314_p3 }
  0x75   : > { %p6321_p9 = por %p6320_p11, %p6319_p1 }
  0x77   : > { %p6322_p12 = pnand %p6321_p9, %p6315_p6 }
  0x79   : > { %6325 = shalt.err (!%p6322_p12)
}
  0x7a   : > { %s6326_s23 = scalar_lea.vmem %s6607_s13, 8192  ;;  %s6393_s17 = smov [#allocation2]  }
  0x7b   : > { %p6327_p4 = scmp.ne.s32.totalorder %s6607_s13, %s6326_s23  ;;  %s6331_s20 = sshll.u32 %s6393_s17, 4  ;;  %s6332_s20 = int_to_ptr.vmem [resolvable:$false] %s6331_s20 }
  0x7c   : > { %s6333_s24 = scalar_lea.vmem %s6332_s20, 16384  ;;  %p6334_p0 = scmp.lt.s32.totalorder %s6607_s13, %s6332_s20 }
  0x7d   : > { %p6329_p5 = pnand %p6327_p4, %p6313_p2  ;;  %p6335_p3 = scmp.lt.s32.totalorder %s6333_s24, %s6326_s23 }
  0x7f   : > { %p6330_p13 = pneg %p6329_p5  ;;  %p6336_p8 = por %p6335_p3, %p6334_p0 }
  0x81   : > { %p6337_p10 = pnand %p6336_p8, %p6330_p13 }
  0x83   : > { %6340 = shalt.err (!%p6337_p10)
}
  0x84   : > { %5571 = dma.hbm_to_vmem [thread:$0]  (!%p6603_p7), %s6601_s14, 8192, %s6607_s13, %s6609_s16, %s6388_s9, %s6388_s9, %s6389_s12  }
  0x85   : > { %p8043_p2 = scmp.ne.s32.totalorder %s8039_s8, 0 }
  0x86   : > { %s300_s19 = sand.u32 (!%p8043_p2), 1, %s6375_s25   ;;  %p8044_p6 = scmp.ne.s32.totalorder (!%p8043_p2), %s8038_s30, 0 }
  0x87   : > { %298 = sbr.rel (%p8043_p2) target bundleno = 1160 (0x488), region = 48  ;;  %s4630_s10 = sshll.u32 (!%p8043_p2), %s300_s19, 9 }
  0x88   : > { %s301_s11 = scalar_lea.sflag (!%p8043_p2), [#allocation3], %s300_s19  ;;  %s6643_s15 = scalar_lea.vmem (!%p8043_p2), [#allocation2], %s4630_s10 }
  0x8e   : > { %6358 = dma.done.wait (%p8044_p6), %s301_s11, 8192  }
  0x8f   : > { %6360 = vsyncadd (%p8044_p6), %s301_s11, 4294959104  ;;  %p8045_p1 = scmp.ne.s32.totalorder %s8037_s29, 0 }
  0x91   : > { %6362 = dma.done.wait (%p8045_p1), [#allocation5], 8256  }
  0x92   : > { %6364 = vsyncadd (%p8045_p1), [#allocation5], 4294959040 }
  0x93   : > { %6366 = dma.done.wait (%p8045_p1), [#allocation8], 20480  }
  0x94   : > { %6368 = vsyncadd (%p8045_p1), [#allocation8], 4294946816  ;;  %v5623_v0 = vld [vmem:[#allocation4 + $0x4] ss:$16 sps:$4 sm:$0xff]   ;;  %v5625_v1 = vld [vmem:[#allocation4] ss:$16 sps:$4 sm:$0xff]  }
  0x95   : > { %923 = vmatprep.subr.bf16.mxu0 %v5623_v0  ;;  %v5626_v2 = vld [vmem:[#allocation4 + $0x24] ss:$16 sps:$4 sm:$0xff]   ;;  %v5628_v3 = vld [vmem:[#allocation4 + $0x20] ss:$16 sps:$4 sm:$0xff]   ;;  %v361_v13 = vld [vmem:[%s6643_s15 + $0x8] sm:$0xff]  ;;  %vm858_vm0 = vcmask 1039360  }
  0x96   : > { %924 = vmatpush1.bf16.msra.mxu0 %v5625_v1  ;;  %v5629_v4 = vld [vmem:[#allocation4 + $0x44] ss:$16 sps:$4 sm:$0xff]   ;;  %v5631_v5 = vld [vmem:[#allocation4 + $0x40] ss:$16 sps:$4 sm:$0xff]   ;;  %v363_v14 = vld [vmem:[%s6643_s15 + $0x18] sm:$0xff]  ;;  %vm907_vm1 = vcmask 1046528  }
  0x97   : > { %925 = vmatprep.subr.bf16.mxu0 %v5626_v2  ;;  %v5632_v6 = vld [vmem:[#allocation4 + $0x64] ss:$16 sps:$4 sm:$0xff]   ;;  %v5634_v7 = vld [vmem:[#allocation4 + $0x60] ss:$16 sps:$4 sm:$0xff]   ;;  %v425_v15 = vpack.c.bf16 %v363_v14, %v361_v13  ;;  %v5671_v19 = vld [vmem:[#allocation4 + $0xc] ss:$16 sps:$4 sm:$0xff]  }
  0x98   : > { %v5635_v8 = vld [vmem:[#allocation4 + $0x84] ss:$16 sps:$4 sm:$0xff]   ;;  %v5637_v9 = vld [vmem:[#allocation4 + $0x80] ss:$16 sps:$4 sm:$0xff]   ;;  %v5673_v20 = vld [vmem:[#allocation4 + $0x8] ss:$16 sps:$4 sm:$0xff]   ;;  %1116 = vmatprep.subr.bf16.mxu1 %v5671_v19 }
  0x99   : > { %v5638_v10 = vld [vmem:[#allocation4 + $0xa4] ss:$16 sps:$4 sm:$0xff]   ;;  %v5640_v11 = vld [vmem:[#allocation4 + $0xa0] ss:$16 sps:$4 sm:$0xff]   ;;  %4701 = vmatprep.mubr.msk.bf16.mxu0 %vm858_vm0, %v425_v15  ;;  %4717 = vmatprep.mubr.msk.bf16.mxu1 %vm858_vm0, %v425_v15  ;;  %v5674_v22 = vld [vmem:[#allocation4 + $0x2c] ss:$16 sps:$4 sm:$0xff]  }
  0x9a   : > { %926 = vmatpush1.bf16.msra.mxu0 %v5628_v3  ;;  %v5641_v12 = vld [vmem:[#allocation4 + $0xc4] ss:$16 sps:$4 sm:$0xff]   ;;  %v5643_v16 = vld [vmem:[#allocation4 + $0xc0] ss:$16 sps:$4 sm:$0xff]   ;;  %1117 = vmatpush1.bf16.msra.mxu1 %v5673_v20  ;;  %v5676_v23 = vld [vmem:[#allocation4 + $0x28] ss:$16 sps:$4 sm:$0xff]  }
  0x9b   : > { %927 = vmatprep.subr.bf16.mxu0 %v5629_v4  ;;  %v5644_v17 = vld [vmem:[#allocation4 + $0xe4] ss:$16 sps:$4 sm:$0xff]   ;;  %v5646_v18 = vld [vmem:[#allocation4 + $0xe0] ss:$16 sps:$4 sm:$0xff]   ;;  %v5677_v25 = vld [vmem:[#allocation4 + $0x4c] ss:$16 sps:$4 sm:$0xff]   ;;  %1118 = vmatprep.subr.bf16.mxu1 %v5674_v22 }
  0x9c   : > { %v5647_v21 = vld [vmem:[#allocation4 + $0x104] ss:$16 sps:$4 sm:$0xff]   ;;  %v5649_v24 = vld [vmem:[#allocation4 + $0x100] ss:$16 sps:$4 sm:$0xff]   ;;  %v5679_v27 = vld [vmem:[#allocation4 + $0x48] ss:$16 sps:$4 sm:$0xff]  }
  0x9d   : > { %v5650_v26 = vld [vmem:[#allocation4 + $0x124] ss:$16 sps:$4 sm:$0xff]   ;;  %v5652_v28 = vld [vmem:[#allocation4 + $0x120] ss:$16 sps:$4 sm:$0xff]   ;;  %v5680_v29 = vld [vmem:[#allocation4 + $0x6c] ss:$16 sps:$4 sm:$0xff]  }
  0x9e   : > { %928 = vmatpush1.bf16.msra.mxu0 %v5631_v5  ;;  %1119 = vmatpush1.bf16.msra.mxu1 %v5676_v23  ;;  %v5653_v30 = vld [vmem:[#allocation4 + $0x144] ss:$16 sps:$4 sm:$0xff]   ;;  %v5682_v31 = vld [vmem:[#allocation4 + $0x68] ss:$16 sps:$4 sm:$0xff]   ;;  %v5655_v32 = vld [vmem:[#allocation4 + $0x140] ss:$16 sps:$4 sm:$0xff]  }
  0x9f   : > { %929 = vmatprep.subr.bf16.mxu0 %v5632_v6  ;;  %1120 = vmatprep.subr.bf16.mxu1 %v5677_v25  ;;  %v5683_v33 = vld [vmem:[#allocation4 + $0x8c] ss:$16 sps:$4 sm:$0xff]   ;;  %v5656_v34 = vld [vmem:[#allocation4 + $0x164] ss:$16 sps:$4 sm:$0xff]   ;;  %v5685_v35 = vld [vmem:[#allocation4 + $0x88] ss:$16 sps:$4 sm:$0xff]  }
  0xa0   : > { %v5658_v36 = vld [vmem:[#allocation4 + $0x160] ss:$16 sps:$4 sm:$0xff]   ;;  %v5686_v37 = vld [vmem:[#allocation4 + $0xac] ss:$16 sps:$4 sm:$0xff]   ;;  %v5659_v38 = vld [vmem:[#allocation4 + $0x184] ss:$16 sps:$4 sm:$0xff]  }
  0xa1   : > { %v5688_v39 = vld [vmem:[#allocation4 + $0xa8] ss:$16 sps:$4 sm:$0xff]   ;;  %v5661_v40 = vld [vmem:[#allocation4 + $0x180] ss:$16 sps:$4 sm:$0xff]   ;;  %v5689_v41 = vld [vmem:[#allocation4 + $0xcc] ss:$16 sps:$4 sm:$0xff]  }
  0xa2   : > { %930 = vmatpush1.bf16.msra.mxu0 %v5634_v7  ;;  %1121 = vmatpush1.bf16.msra.mxu1 %v5679_v27  ;;  %v5662_v42 = vld [vmem:[#allocation4 + $0x1a4] ss:$16 sps:$4 sm:$0xff]   ;;  %vm908_vm2 = vcmask 1047552   ;;  %v6394_v43 = vmov 65535   ;;  %v5691_v45 = vld [vmem:[#allocation4 + $0xc8] ss:$16 sps:$4 sm:$0xff]  }
  0xa3   : > { %931 = vmatprep.subr.bf16.mxu0 %v5635_v8  ;;  %1122 = vmatprep.subr.bf16.mxu1 %v5680_v29  ;;  %v909_v44 = vsel %vm907_vm1, 4294967295, %v6394_v43  ;;  %v5664_v46 = vld [vmem:[#allocation4 + $0x1a0] ss:$16 sps:$4 sm:$0xff]   ;;  %v5692_v47 = vld [vmem:[#allocation4 + $0xec] ss:$16 sps:$4 sm:$0xff]   ;;  %s4635_s8 = sshll.u32 %s4617_s28, 5 }
  0xa4   : > { %v5665_v48 = vld [vmem:[#allocation4 + $0x1c4] ss:$16 sps:$4 sm:$0xff]   ;;  %v6661_v50 = vsel %vm908_vm2, %v909_v44, 0  ;;  %v5667_v51 = vld [vmem:[#allocation4 + $0x1c0] ss:$16 sps:$4 sm:$0xff]   ;;  %v365_v61 = vld [vmem:[%s6643_s15 + $0x28] sm:$0xff] }
  0xa5   : > { %v5668_v49 = vld [vmem:[#allocation4 + $0x1e4] ss:$16 sps:$4 sm:$0xff]   ;;  %v5694_v52 = vld [vmem:[#allocation4 + $0xe8] ss:$16 sps:$4 sm:$0xff]   ;;  %v5670_v53 = vld [vmem:[#allocation4 + $0x1e0] ss:$16 sps:$4 sm:$0xff]  }
  0xa6   : > { %932 = vmatpush1.bf16.msra.mxu0 %v5637_v9  ;;  %1123 = vmatpush1.bf16.msra.mxu1 %v5682_v31  ;;  %v5695_v54 = vld [vmem:[#allocation4 + $0x10c] ss:$16 sps:$4 sm:$0xff]   ;;  %v915_v55 = vand.u32 %v5668_v49, %v6661_v50  ;;  %v5697_v56 = vld [vmem:[#allocation4 + $0x108] ss:$16 sps:$4 sm:$0xff]   ;;  %v912_v57 = vand.u32 %v5670_v53, %v6661_v50  ;;  %v360_v58 = vld [vmem:[%s6643_s15] sm:$0xff]  ;;  %p353_p7 = scmp.lt.s32.totalorder %s4635_s8, 63 }
  0xa7   : > { %933 = vmatprep.subr.bf16.mxu0 %v5638_v10  ;;  %1124 = vmatprep.subr.bf16.mxu1 %v5683_v33  ;;  %v362_v59 = vld [vmem:[%s6643_s15 + $0x10] sm:$0xff]  ;;  %v5698_v60 = vld [vmem:[#allocation4 + $0x12c] ss:$16 sps:$4 sm:$0xff]   ;;  %v5700_v0 = vld [vmem:[#allocation4 + $0x128] ss:$16 sps:$4 sm:$0xff]  }
  0xa8   : > { %v367_v62 = vld [vmem:[%s6643_s15 + $0x38] sm:$0xff]  ;;  %v6669_v63 = vpack.c.bf16 %v362_v59, %v360_v58  ;;  %v5719_v4 = vld [vmem:[#allocation7] ss:$16 sps:$4 sm:$0xff]   ;;  %v369_v10 = vld [vmem:[%s6643_s15 + $0x48] sm:$0xff]  ;;  %s8051_s8 = smov (!%p353_p7, %s4635_s8), 63 }
  0xa9   : > { %v5721_v1 = vld [vmem:[#allocation7 + $0x4] ss:$16 sps:$4 sm:$0xff]   ;;  %v6671_v2 = vpack.c.bf16 %v367_v62, %v365_v61  ;;  %v5701_v3 = vld [vmem:[#allocation4 + $0x14c] ss:$16 sps:$4 sm:$0xff]   ;;  %v364_v5 = vld [vmem:[%s6643_s15 + $0x20] sm:$0xff]  ;;  %s4636_s27 = sshll.u32 %s8051_s8, 2 }
  0xaa   : > { %934 = vmatpush1.bf16.msra.mxu0 %v5640_v11  ;;  %1125 = vmatpush1.bf16.msra.mxu1 %v5685_v35  ;;  %v5703_v6 = vld [vmem:[#allocation4 + $0x148] ss:$16 sps:$4 sm:$0xff]   ;;  %v366_v8 = vld [vmem:[%s6643_s15 + $0x30] sm:$0xff]  ;;  %v5704_v9 = vld [vmem:[#allocation4 + $0x16c] ss:$16 sps:$4 sm:$0xff]   ;;  %s7964_s13 = scalar_lea.vmem %s8032_s7, %s4636_s27 }
  0xab   : > { %935 = vmatprep.subr.bf16.mxu0 %v5641_v12  ;;  %1126 = vmatprep.subr.bf16.mxu1 %v5686_v37  ;;  %v5727_v7 = vld [vmem:[#allocation7 + $0x24] ss:$16 sps:$4 sm:$0xff]   ;;  %v5725_v12 = vld [vmem:[#allocation7 + $0x20] ss:$16 sps:$4 sm:$0xff]   ;;  %v6680_v13 = vpack.c.bf16 %v366_v8, %v364_v5  ;;  %v5710_v25 = vld [vmem:[#allocation4 + $0x1ac] ss:$16 sps:$4 sm:$0xff]  }
  0xac   : > { %v371_v11 = vld [vmem:[%s6643_s15 + $0x58] sm:$0xff]  ;;  %v368_v19 = vld [vmem:[%s6643_s15 + $0x40] sm:$0xff]  ;;  %v370_v20 = vld [vmem:[%s6643_s15 + $0x50] sm:$0xff] }
  0xad   : > { %v5706_v14 = vld [vmem:[#allocation4 + $0x168] ss:$16 sps:$4 sm:$0xff]   ;;  %v5713_v31 = vld [vmem:[#allocation4 + $0x1cc] ss:$16 sps:$4 sm:$0xff]   ;;  %v5743_v33 = vld [vmem:[#allocation7 + $0x80] ss:$16 sps:$4 sm:$0xff]  }
  0xae   : > { %936 = vmatpush1.bf16.msra.mxu0 %v5643_v16  ;;  %1127 = vmatpush1.bf16.msra.mxu1 %v5688_v39  ;;  %v5733_v15 = vld [vmem:[#allocation7 + $0x44] ss:$16 sps:$4 sm:$0xff]   ;;  %v6682_v16 = vpack.c.bf16 %v371_v11, %v369_v10  ;;  %v374_v35 = vld [vmem:[%s6643_s15 + $0x70] sm:$0xff]  ;;  %v376_v49 = vld [vmem:[%s6643_s15 + $0x80] sm:$0xff] }
  0xaf   : > { %937 = vmatprep.subr.bf16.mxu0 %v5644_v17  ;;  %1128 = vmatprep.subr.bf16.mxu1 %v5689_v41  ;;  %v5707_v17 = vld [vmem:[#allocation4 + $0x18c] ss:$16 sps:$4 sm:$0xff]   ;;  %v5709_v23 = vld [vmem:[#allocation4 + $0x188] ss:$16 sps:$4 sm:$0xff]   ;;  %v5736_v61 = vld [vmem:[#allocation7 + $0x4c] ss:$16 sps:$4 sm:$0xff]  }
  0xb0   : > { %v373_v22 = vld [vmem:[%s6643_s15 + $0x68] sm:$0xff]  ;;  %v5767_v62 = vld [vmem:[#allocation7 + $0x100] ss:$16 sps:$4 sm:$0xff]  }
  0xb1   : > { %v5745_v27 = vld [vmem:[#allocation7 + $0x84] ss:$16 sps:$4 sm:$0xff]   ;;  %v5728_v59 = vld [vmem:[#allocation7 + $0x28] ss:$16 sps:$4 sm:$0xff]   ;;  %v5779_v11 = vld [vmem:[#allocation7 + $0x140] ss:$16 sps:$4 sm:$0xff]  }
  0xb2   : > { %938 = vmatpush1.bf16.msra.mxu0 %v5646_v18  ;;  %1129 = vmatpush1.bf16.msra.mxu1 %v5691_v45  ;;  %v5731_v18 = vld [vmem:[#allocation7 + $0x40] ss:$16 sps:$4 sm:$0xff]   ;;  %v5712_v29 = vld [vmem:[#allocation4 + $0x1a8] ss:$16 sps:$4 sm:$0xff]   ;;  %v5734_v5 = vld [vmem:[#allocation7 + $0x48] ss:$16 sps:$4 sm:$0xff]  }
  0xb3   : > { %939 = vmatprep.subr.bf16.mxu0 %v5647_v21  ;;  %1130 = vmatprep.subr.bf16.mxu1 %v5692_v47  ;;  %v5739_v21 = vld [vmem:[#allocation7 + $0x64] ss:$16 sps:$4 sm:$0xff]   ;;  %v5724_v47 = vld [vmem:[#allocation7 + $0xc] ss:$16 sps:$4 sm:$0xff]   ;;  %v5740_v8 = vld [vmem:[#allocation7 + $0x68] ss:$16 sps:$4 sm:$0xff]  }
  0xb4   : > { %v5715_v37 = vld [vmem:[#allocation4 + $0x1c8] ss:$16 sps:$4 sm:$0xff]  }
  0xb5   : > { %v377_v39 = vld [vmem:[%s6643_s15 + $0x88] sm:$0xff] }
  0xb6   : > { %940 = vmatpush1.bf16.msra.mxu0 %v5649_v24  ;;  %1131 = vmatpush1.bf16.msra.mxu1 %v5694_v52  ;;  %v375_v24 = vld [vmem:[%s6643_s15 + $0x78] sm:$0xff]  ;;  %v381_v53 = vld [vmem:[%s6643_s15 + $0xa8] sm:$0xff] }
  0xb7   : > { %941 = vmatprep.subr.bf16.mxu0 %v5650_v26  ;;  %1132 = vmatprep.subr.bf16.mxu1 %v5695_v54  ;;  %v5737_v26 = vld [vmem:[#allocation7 + $0x60] ss:$16 sps:$4 sm:$0xff]   ;;  %v5757_v43 = vld [vmem:[#allocation7 + $0xc4] ss:$16 sps:$4 sm:$0xff]   ;;  %v5722_v54 = vld [vmem:[#allocation7 + $0x8] ss:$16 sps:$4 sm:$0xff]  }
  0xb8   : > { %v5763_v52 = vld [vmem:[#allocation7 + $0xe4] ss:$16 sps:$4 sm:$0xff]  }
  0xba   : > { %942 = vmatpush1.bf16.msra.mxu0 %v5652_v28  ;;  %1133 = vmatpush1.bf16.msra.mxu1 %v5697_v56  ;;  %v6691_v28 = vpack.c.bf16 %v370_v20, %v368_v19  ;;  %v5761_v56 = vld [vmem:[#allocation7 + $0xe0] ss:$16 sps:$4 sm:$0xff]   ;;  %v389_v19 = vld [vmem:[%s6643_s15 + $0xe8] sm:$0xff]  ;;  %v391_v20 = vld [vmem:[%s6643_s15 + $0xf8] sm:$0xff] }
  0xbb   : > { %943 = vmatprep.subr.bf16.mxu0 %v5653_v30  ;;  %1134 = vmatprep.subr.bf16.mxu1 %v5698_v60  ;;  %v6693_v30 = vpack.c.bf16 %v375_v24, %v373_v22  ;;  %v5752_v22 = vld [vmem:[#allocation7 + $0xa8] ss:$16 sps:$4 sm:$0xff]  }
  0xbe   : > { %944 = vmatpush1.bf16.msra.mxu0 %v5655_v32  ;;  %1135 = vmatpush1.bf16.msra.mxu1 %v5700_v0  ;;  %v5716_v32 = vld [vmem:[#allocation4 + $0x1ec] ss:$16 sps:$4 sm:$0xff]   ;;  %v380_v0 = vld [vmem:[%s6643_s15 + $0xa0] sm:$0xff] }
  0xbf   : > { %945 = vmatprep.subr.bf16.mxu0 %v5656_v34  ;;  %1136 = vmatprep.subr.bf16.mxu1 %v5701_v3  ;;  %v372_v34 = vld [vmem:[%s6643_s15 + $0x60] sm:$0xff]  ;;  %v921_v41 = vand.u32 %v5716_v32, %v6661_v50  ;;  %v385_v3 = vld [vmem:[%s6643_s15 + $0xc8] sm:$0xff] }
  0xc0   : > { %v6703_v44 = vpack.c.bf16 %v374_v35, %v372_v34  ;;  %v5766_v32 = vld [vmem:[#allocation7 + $0xec] ss:$16 sps:$4 sm:$0xff]  }
  0xc1   : > { %v5772_v34 = vld [vmem:[#allocation7 + $0x10c] ss:$16 sps:$4 sm:$0xff]  }
  0xc2   : > { %946 = vmatpush1.bf16.msra.mxu0 %v5658_v36  ;;  %1137 = vmatpush1.bf16.msra.mxu1 %v5703_v6  ;;  %v5751_v36 = vld [vmem:[#allocation7 + $0xa4] ss:$16 sps:$4 sm:$0xff]   ;;  %v5742_v6 = vld [vmem:[#allocation7 + $0x6c] ss:$16 sps:$4 sm:$0xff]  }
  0xc3   : > { %947 = vmatprep.subr.bf16.mxu0 %v5659_v38  ;;  %1138 = vmatprep.subr.bf16.mxu1 %v5704_v9  ;;  %v5718_v38 = vld [vmem:[#allocation4 + $0x1e8] ss:$16 sps:$4 sm:$0xff]   ;;  %v5748_v9 = vld [vmem:[#allocation7 + $0x8c] ss:$16 sps:$4 sm:$0xff]  }
  0xc4   : > { %v918_v45 = vand.u32 %v5718_v38, %v6661_v50  ;;  %v5730_v50 = vld [vmem:[#allocation7 + $0x2c] ss:$16 sps:$4 sm:$0xff]  }
  0xc5   : > { %v392_v38 = vld [vmem:[%s6643_s15 + $0x100] sm:$0xff] }
  0xc6   : > { %948 = vmatpush1.bf16.msra.mxu0 %v5661_v40  ;;  %1139 = vmatpush1.bf16.msra.mxu1 %v5706_v14  ;;  %v379_v40 = vld [vmem:[%s6643_s15 + $0x98] sm:$0xff] }
  0xc7   : > { %949 = vmatprep.subr.bf16.mxu0 %v5662_v42  ;;  %1140 = vmatprep.subr.bf16.mxu1 %v5707_v17  ;;  %v5749_v42 = vld [vmem:[#allocation7 + $0xa0] ss:$16 sps:$4 sm:$0xff]   ;;  %v5787_v14 = vld [vmem:[#allocation7 + $0x164] ss:$16 sps:$4 sm:$0xff]  }
  0xc8   : > { %v384_v17 = vld [vmem:[%s6643_s15 + $0xc0] sm:$0xff] }
  0xca   : > { %950 = vmatpush1.bf16.msra.mxu0 %v5664_v46  ;;  %1141 = vmatpush1.bf16.msra.mxu1 %v5709_v23  ;;  %v6706_v46 = vpack.c.bf16 %v379_v40, %v377_v39  ;;  %v5760_v23 = vld [vmem:[#allocation7 + $0xcc] ss:$16 sps:$4 sm:$0xff]  }
  0xcb   : > { %951 = vmatprep.subr.bf16.mxu0 %v5665_v48  ;;  %1142 = vmatprep.subr.bf16.mxu1 %v5710_v25  ;;  %v5755_v48 = vld [vmem:[#allocation7 + $0xc0] ss:$16 sps:$4 sm:$0xff]   ;;  %v5778_v40 = vld [vmem:[#allocation7 + $0x12c] ss:$16 sps:$4 sm:$0xff]  }
  0xcc   : > { %v5791_v25 = vld [vmem:[#allocation7 + $0x180] ss:$16 sps:$4 sm:$0xff]  }
  0xcd   : > { %v394_v39 = vld [vmem:[%s6643_s15 + $0x110] sm:$0xff] }
  0xce   : > { %952 = vmatpush1.bf16.msra.mxu0 %v5667_v51  ;;  %1143 = vmatpush1.bf16.msra.mxu1 %v5712_v29  ;;  %v378_v51 = vld [vmem:[%s6643_s15 + $0x90] sm:$0xff]  ;;  %v388_v29 = vld [vmem:[%s6643_s15 + $0xe0] sm:$0xff] }
  0xcf   : > { %953 = vmatprep.subr.bf16.mxu0 %v915_v55  ;;  %1144 = vmatprep.subr.bf16.mxu1 %v5713_v31  ;;  %v383_v55 = vld [vmem:[%s6643_s15 + $0xb8] sm:$0xff]  ;;  %v6716_v58 = vpack.c.bf16 %v378_v51, %v376_v49  ;;  %v390_v31 = vld [vmem:[%s6643_s15 + $0xf0] sm:$0xff] }
  0xd0   : > { %v6720_v60 = vpack.c.bf16 %v383_v55, %v381_v53  ;;  %v438_v35 = vpack.c.bf16 %v390_v31, %v388_v29  ;;  %v398_v49 = vld [vmem:[%s6643_s15 + $0x130] sm:$0xff]  ;;  %v403_v53 = vld [vmem:[%s6643_s15 + $0x158] sm:$0xff] }
  0xd1   : > { %v5790_v51 = vld [vmem:[#allocation7 + $0x16c] ss:$16 sps:$4 sm:$0xff]   ;;  %v5812_v31 = vld [vmem:[#allocation7 + $0x1e8] ss:$16 sps:$4 sm:$0xff]  }
  0xd2   : > { %954 = vmatpush1.bf16.msra.mxu0 %v912_v57  ;;  %1145 = vmatpush1.bf16.msra.mxu1 %v5715_v37  ;;  %v5769_v57 = vld [vmem:[#allocation7 + $0x104] ss:$16 sps:$4 sm:$0xff]   ;;  %v5770_v37 = vld [vmem:[#allocation7 + $0x108] ss:$16 sps:$4 sm:$0xff]   ;;  %v5796_v55 = vld [vmem:[#allocation7 + $0x18c] ss:$16 sps:$4 sm:$0xff]  }
  0xd3   : > { %2547 = vmatprep.subr.bf16.mxu0 %v5721_v1  ;;  %1146 = vmatprep.subr.bf16.mxu1 %v921_v41  ;;  %v382_v1 = vld [vmem:[%s6643_s15 + $0xb0] sm:$0xff]  ;;  %v397_v41 = vld [vmem:[%s6643_s15 + $0x128] sm:$0xff] }
  0xd4   : > { %v6730_v10 = vpack.c.bf16 %v382_v1, %v380_v0  ;;  %v404_v1 = vld [vmem:[%s6643_s15 + $0x160] sm:$0xff] }
  0xd5   : > { %956 = vmatmul.mubr.bf16.vlgmr.msra.gmra.mrb[0].mxu0 %v6669_v63  ;;  %v5814_v29 = vld [vmem:[#allocation7 + $0x1ec] ss:$16 sps:$4 sm:$0xff]  }
  0xd6   : > { %4702 = vmatprep.mubr.msk.bf16.mxu0 %vm858_vm0, %v6671_v2  ;;  %2548 = vmatpush1.bf16.msra.mxu0 %v5719_v4  ;;  %v387_v4 = vld [vmem:[%s6643_s15 + $0xd8] sm:$0xff] }
  0xd7   : > { %2549 = vmatprep.subr.bf16.mxu0 %v5727_v7  ;;  %1147 = vmatpush1.bf16.msra.mxu1 %v918_v45  ;;  %v5781_v7 = vld [vmem:[#allocation7 + $0x144] ss:$16 sps:$4 sm:$0xff]   ;;  %v440_v45 = vpack.c.bf16 %v394_v39, %v392_v38  ;;  %v422_v38 = vld [vmem:[%s6643_s15 + $0x1f0] sm:$0xff] }
  0xd8   : > { %2933 = vmatprep.subr.bf16.mxu1 %v5724_v47  ;;  %v5782_v47 = vld [vmem:[#allocation7 + $0x148] ss:$16 sps:$4 sm:$0xff]  }
  0xda   : > { %2550 = vmatpush1.bf16.msra.mxu0 %v5725_v12  ;;  %1149 = vmatmul.mubr.bf16.vlgmr.msra.gmra.mrb[0].mxu1 %v6669_v63  ;;  %v5775_v63 = vld [vmem:[#allocation7 + $0x124] ss:$16 sps:$4 sm:$0xff]   ;;  %v6734_v12 = vpack.c.bf16 %v387_v4, %v385_v3 }
  0xdb   : > { %2551 = vmatprep.subr.bf16.mxu0 %v5733_v15  ;;  %4718 = vmatprep.mubr.msk.bf16.mxu1 %vm858_vm0, %v6671_v2  ;;  %v5773_v2 = vld [vmem:[#allocation7 + $0x120] ss:$16 sps:$4 sm:$0xff]   ;;  %v5746_v15 = vld [vmem:[#allocation7 + $0x88] ss:$16 sps:$4 sm:$0xff]  }
  0xdc   : > { %2934 = vmatpush1.bf16.msra.mxu1 %v5722_v54  ;;  %v5788_v54 = vld [vmem:[#allocation7 + $0x168] ss:$16 sps:$4 sm:$0xff]  }
  0xdd   : > { %966 = vmatmul.mubr.bf16.gmra.mrb[4].mxu0 %v6680_v13  ;;  %2935 = vmatprep.subr.bf16.mxu1 %v5730_v50  ;;  %v409_v3 = vld [vmem:[%s6643_s15 + $0x188] sm:$0xff]  ;;  %v411_v4 = vld [vmem:[%s6643_s15 + $0x198] sm:$0xff] }
  0xde   : > { %4703 = vmatprep.mubr.msk.bf16.mxu0 %vm858_vm0, %v6682_v16  ;;  %2552 = vmatpush1.bf16.msra.mxu0 %v5731_v18  ;;  %v386_v18 = vld [vmem:[%s6643_s15 + $0xd0] sm:$0xff] }
  0xdf   : > { %2553 = vmatprep.subr.bf16.mxu0 %v5739_v21  ;;  %v5785_v21 = vld [vmem:[#allocation7 + $0x160] ss:$16 sps:$4 sm:$0xff]   ;;  %v6744_v24 = vpack.c.bf16 %v386_v18, %v384_v17  ;;  %v5802_v17 = vld [vmem:[#allocation7 + $0x1ac] ss:$16 sps:$4 sm:$0xff]  }
  0xe0   : > { %2936 = vmatpush1.bf16.msra.mxu1 %v5728_v59  ;;  %v402_v59 = vld [vmem:[%s6643_s15 + $0x150] sm:$0xff] }
  0xe1   : > { %2937 = vmatprep.subr.bf16.mxu1 %v5736_v61  ;;  %v407_v61 = vld [vmem:[%s6643_s15 + $0x178] sm:$0xff]  ;;  %v5803_v18 = vld [vmem:[#allocation7 + $0x1c0] ss:$16 sps:$4 sm:$0xff]  }
  0xe2   : > { %2554 = vmatpush1.bf16.msra.mxu0 %v5737_v26  ;;  %1159 = vmatmul.mubr.bf16.gmra.mrb[4].mxu1 %v6680_v13  ;;  %v5754_v13 = vld [vmem:[#allocation7 + $0xac] ss:$16 sps:$4 sm:$0xff]   ;;  %v6748_v26 = vpack.c.bf16 %v391_v20, %v389_v19 }
  0xe3   : > { %2555 = vmatprep.subr.bf16.mxu0 %v5745_v27  ;;  %4719 = vmatprep.mubr.msk.bf16.mxu1 %vm858_vm0, %v6682_v16  ;;  %v5793_v16 = vld [vmem:[#allocation7 + $0x184] ss:$16 sps:$4 sm:$0xff]   ;;  %v5758_v27 = vld [vmem:[#allocation7 + $0xc8] ss:$16 sps:$4 sm:$0xff]   ;;  %v412_v19 = vld [vmem:[%s6643_s15 + $0x1a0] sm:$0xff] }
  0xe4   : > { %2938 = vmatpush1.bf16.msra.mxu1 %v5734_v5  ;;  %v414_v20 = vld [vmem:[%s6643_s15 + $0x1b0] sm:$0xff] }
  0xe5   : > { %976 = vmatmul.mubr.bf16.gmra.mrb[8].mxu0 %v6691_v28  ;;  %2939 = vmatprep.subr.bf16.mxu1 %v5742_v6  ;;  %v6790_v6 = vpack.c.bf16 %v411_v4, %v409_v3 }
  0xe6   : > { %4704 = vmatprep.mubr.msk.bf16.mxu0 %vm858_vm0, %v6693_v30  ;;  %2556 = vmatpush1.bf16.msra.mxu0 %v5743_v33  ;;  %v395_v33 = vld [vmem:[%s6643_s15 + $0x118] sm:$0xff] }
  0xe7   : > { %2557 = vmatprep.subr.bf16.mxu0 %v5751_v36 }
  0xe8   : > { %2940 = vmatpush1.bf16.msra.mxu1 %v5740_v8  ;;  %v408_v8 = vld [vmem:[%s6643_s15 + $0x180] sm:$0xff] }
  0xe9   : > { %2941 = vmatprep.subr.bf16.mxu1 %v5748_v9  ;;  %v410_v9 = vld [vmem:[%s6643_s15 + $0x190] sm:$0xff] }
  0xea   : > { %2558 = vmatpush1.bf16.msra.mxu0 %v5749_v42  ;;  %1169 = vmatmul.mubr.bf16.gmra.mrb[8].mxu1 %v6691_v28  ;;  %v393_v28 = vld [vmem:[%s6643_s15 + $0x108] sm:$0xff]  ;;  %v399_v42 = vld [vmem:[%s6643_s15 + $0x138] sm:$0xff] }
  0xeb   : > { %2559 = vmatprep.subr.bf16.mxu0 %v5757_v43  ;;  %4720 = vmatprep.mubr.msk.bf16.mxu1 %vm858_vm0, %v6693_v30  ;;  %v5764_v30 = vld [vmem:[#allocation7 + $0xe8] ss:$16 sps:$4 sm:$0xff]   ;;  %v441_v36 = vpack.c.bf16 %v395_v33, %v393_v28  ;;  %v418_v28 = vld [vmem:[%s6643_s15 + $0x1d0] sm:$0xff] }
  0xec   : > { %2942 = vmatpush1.bf16.msra.mxu1 %v5746_v15  ;;  %v5776_v43 = vld [vmem:[#allocation7 + $0x128] ss:$16 sps:$4 sm:$0xff]  }
  0xed   : > { %986 = vmatmul.mubr.bf16.gmra.mrb[12].mxu0 %v6703_v44  ;;  %2943 = vmatprep.subr.bf16.mxu1 %v5754_v13  ;;  %v5800_v15 = vld [vmem:[#allocation7 + $0x1a8] ss:$16 sps:$4 sm:$0xff]   ;;  %v5805_v13 = vld [vmem:[#allocation7 + $0x1c4] ss:$16 sps:$4 sm:$0xff]  }
  0xee   : > { %4705 = vmatprep.mubr.msk.bf16.mxu0 %vm858_vm0, %v6706_v46  ;;  %2560 = vmatpush1.bf16.msra.mxu0 %v5755_v48  ;;  %v396_v48 = vld [vmem:[%s6643_s15 + $0x120] sm:$0xff]  ;;  %v421_v33 = vld [vmem:[%s6643_s15 + $0x1e8] sm:$0xff] }
  0xef   : > { %2561 = vmatprep.subr.bf16.mxu0 %v5763_v52  ;;  %v401_v52 = vld [vmem:[%s6643_s15 + $0x148] sm:$0xff]  ;;  %v442_v50 = vpack.c.bf16 %v398_v49, %v396_v48 }
  0xf0   : > { %2944 = vmatpush1.bf16.msra.mxu1 %v5752_v22  ;;  %v5808_v22 = vld [vmem:[#allocation7 + $0x1cc] ss:$16 sps:$4 sm:$0xff]  }
  0xf1   : > { %2945 = vmatprep.subr.bf16.mxu1 %v5760_v23  ;;  %v450_v23 = vpack.c.bf16 %v414_v20, %v412_v19 }
  0xf2   : > { %2562 = vmatpush1.bf16.msra.mxu0 %v5761_v56  ;;  %1179 = vmatmul.mubr.bf16.gmra.mrb[12].mxu1 %v6703_v44  ;;  %v5784_v44 = vld [vmem:[#allocation7 + $0x14c] ss:$16 sps:$4 sm:$0xff]   ;;  %v445_v56 = vpack.c.bf16 %v403_v53, %v401_v52 }
  0xf3   : > { %2563 = vmatprep.subr.bf16.mxu0 %v5769_v57  ;;  %4721 = vmatprep.mubr.msk.bf16.mxu1 %vm858_vm0, %v6706_v46  ;;  %v443_v46 = vpack.c.bf16 %v399_v42, %v397_v41  ;;  %v5794_v57 = vld [vmem:[#allocation7 + $0x188] ss:$16 sps:$4 sm:$0xff]   ;;  %v522_v41 = vlaneseq }
  0xf4   : > { %2946 = vmatpush1.bf16.msra.mxu1 %v5758_v27  ;;  %v5811_v27 = vld [vmem:[#allocation7 + $0x1e4] ss:$16 sps:$4 sm:$0xff]  }
  0xf5   : > { %996 = vmatmul.mubr.bf16.gmra.mrb[16].mxu0 %v6716_v58  ;;  %2947 = vmatprep.subr.bf16.mxu1 %v5766_v32  ;;  %v416_v32 = vld [vmem:[%s6643_s15 + $0x1c0] sm:$0xff]  ;;  %v6819_v42 = vshrl.u32 %v522_v41, 7 }
  0xf6   : > { %4706 = vmatprep.mubr.msk.bf16.mxu0 %vm858_vm0, %v6720_v60  ;;  %2564 = vmatpush1.bf16.msra.mxu0 %v5767_v62  ;;  %v5821_v41 = vld [vmem:[#allocation7 + $0x220] ss:$16 sps:$4 sm:$0xff]  }
  0xf7   : > { %2565 = vmatprep.subr.bf16.mxu0 %v5775_v63  ;;  %v406_v63 = vld [vmem:[%s6643_s15 + $0x170] sm:$0xff] }
  0xf8   : > { %2948 = vmatpush1.bf16.msra.mxu1 %v5764_v30  ;;  %v446_v5 = vpack.c.bf16 %v406_v63, %v404_v1  ;;  %v423_v30 = vld [vmem:[%s6643_s15 + $0x1f8] sm:$0xff] }
  0xf9   : > { %2949 = vmatprep.subr.bf16.mxu1 %v5772_v34  ;;  %v452_v34 = vpack.c.bf16 %v418_v28, %v416_v32 }
  0xfa   : > { %2566 = vmatpush1.bf16.msra.mxu0 %v5773_v2  ;;  %1189 = vmatmul.mubr.bf16.gmra.mrb[16].mxu1 %v6716_v58  ;;  %v400_v58 = vld [vmem:[%s6643_s15 + $0x140] sm:$0xff] }
  0xfb   : > { %2567 = vmatprep.subr.bf16.mxu0 %v5781_v7  ;;  %4722 = vmatprep.mubr.msk.bf16.mxu1 %vm858_vm0, %v6720_v60  ;;  %v405_v60 = vld [vmem:[%s6643_s15 + $0x168] sm:$0xff]  ;;  %v444_v62 = vpack.c.bf16 %v402_v59, %v400_v58  ;;  %v5797_v2 = vld [vmem:[#allocation7 + $0x1a0] ss:$16 sps:$4 sm:$0xff]  }
  0xfc   : > { %2950 = vmatpush1.bf16.msra.mxu1 %v5770_v37  ;;  %v447_v0 = vpack.c.bf16 %v407_v61, %v405_v60  ;;  %v5799_v7 = vld [vmem:[#allocation7 + $0x1a4] ss:$16 sps:$4 sm:$0xff]   ;;  %v420_v37 = vld [vmem:[%s6643_s15 + $0x1e0] sm:$0xff] }
  0xfd   : > { %1006 = vmatmul.mubr.bf16.gmra.mrb[20].mxu0 %v6730_v10  ;;  %2951 = vmatprep.subr.bf16.mxu1 %v5778_v40  ;;  %v454_v39 = vpack.c.bf16 %v422_v38, %v420_v37  ;;  %v5820_v40 = vld [vmem:[#allocation7 + $0x20c] ss:$16 sps:$4 sm:$0xff]  }
  0xfe   : > { %4707 = vmatprep.mubr.msk.bf16.mxu0 %vm858_vm0, %v6734_v12  ;;  %2568 = vmatpush1.bf16.msra.mxu0 %v5779_v11  ;;  %v415_v11 = vld [vmem:[%s6643_s15 + $0x1b8] sm:$0xff] }
  0xff   : > { %2569 = vmatprep.subr.bf16.mxu0 %v5787_v14 }
 0x100   : > { %2952 = vmatpush1.bf16.msra.mxu1 %v5776_v43  ;;  %v524_v43 = vsub.s32 0, %v6819_v42 }
 0x101   : > { %2953 = vmatprep.subr.bf16.mxu1 %v5784_v44  ;;  %v6822_v44 = vld [vmem:[#allocation6] sm:$0xf] }
 0x102   : > { %2570 = vmatpush1.bf16.msra.mxu0 %v5785_v21  ;;  %1199 = vmatmul.mubr.bf16.gmra.mrb[20].mxu1 %v6730_v10  ;;  %v413_v10 = vld [vmem:[%s6643_s15 + $0x1a8] sm:$0xff] }
 0x103   : > { %2571 = vmatprep.subr.bf16.mxu0 %v5793_v16  ;;  %4723 = vmatprep.mubr.msk.bf16.mxu1 %vm858_vm0, %v6734_v12  ;;  %v448_v12 = vpack.c.bf16 %v410_v9, %v408_v8  ;;  %v451_v14 = vpack.c.bf16 %v415_v11, %v413_v10  ;;  %v417_v21 = vld [vmem:[%s6643_s15 + $0x1c8] sm:$0xff]  ;;  %v419_v16 = vld [vmem:[%s6643_s15 + $0x1d8] sm:$0xff] }
 0x104   : > { %2954 = vmatpush1.bf16.msra.mxu1 %v5782_v47 }
 0x105   : > { %1016 = vmatmul.mubr.bf16.gmra.mrb[24].mxu0 %v6744_v24  ;;  %2955 = vmatprep.subr.bf16.mxu1 %v5790_v51 }
 0x106   : > { %4708 = vmatprep.mubr.msk.bf16.mxu0 %vm858_vm0, %v6748_v26  ;;  %2572 = vmatpush1.bf16.msra.mxu0 %v5791_v25  ;;  %v453_v25 = vpack.c.bf16 %v419_v16, %v417_v21  ;;  %v6395_v21 = vmov 1065369472  }
 0x107   : > { %2573 = vmatprep.subr.bf16.mxu0 %v5799_v7 }
 0x108   : > { %2956 = vmatpush1.bf16.msra.mxu1 %v5788_v54 }
 0x109   : > { %2957 = vmatprep.subr.bf16.mxu1 %v5796_v55 }
 0x10a   : > { %1209 = vmatmul.mubr.bf16.gmra.mrb[24].mxu1 %v6744_v24  ;;  %2574 = vmatpush1.bf16.msra.mxu0 %v5797_v2  ;;  %v5806_v24 = vld [vmem:[#allocation7 + $0x1c8] ss:$16 sps:$4 sm:$0xff]  }
 0x10b   : > { %4724 = vmatprep.mubr.msk.bf16.mxu1 %vm858_vm0, %v6748_v26  ;;  %2575 = vmatprep.subr.bf16.mxu0 %v5805_v13  ;;  %v5809_v26 = vld [vmem:[#allocation7 + $0x1e0] ss:$16 sps:$4 sm:$0xff]   ;;  %v532_v13 = vsub.s32 2, %v6819_v42 }
 0x10c   : > { %2958 = vmatpush1.bf16.msra.mxu1 %v5794_v57 }
 0x10d   : > { %1026 = vmatmul.mubr.bf16.gmra.mrb[28].mxu0 %v438_v35  ;;  %2959 = vmatprep.subr.bf16.mxu1 %v5802_v17 }
 0x10e   : > { %4709 = vmatprep.mubr.msk.bf16.mxu0 %vm858_vm0, %v441_v36  ;;  %2576 = vmatpush1.bf16.msra.mxu0 %v5803_v18 }
 0x10f   : > { %2577 = vmatprep.subr.bf16.mxu0 %v5811_v27 }
 0x110   : > { %2960 = vmatpush1.bf16.msra.mxu1 %v5800_v15 }
 0x111   : > { %2961 = vmatprep.subr.bf16.mxu1 %v5808_v22  ;;  %v536_v22 = vsub.s32 3, %v6819_v42 }
 0x112   : > { %1219 = vmatmul.mubr.bf16.gmra.mrb[28].mxu1 %v438_v35  ;;  %2578 = vmatpush1.bf16.msra.mxu0 %v5809_v26  ;;  %v455_v35 = vpack.c.bf16 %v423_v30, %v421_v33  ;;  %v5818_v26 = vld [vmem:[#allocation7 + $0x208] ss:$16 sps:$4 sm:$0xff]   ;;  %v5826_v33 = vld [vmem:[#allocation7 + $0x22c] ss:$16 sps:$4 sm:$0xff]   ;;  %v6866_v30 = vrot.slane %v6822_v44, %v532_v13 }
 0x113   : > { %4725 = vmatprep.mubr.msk.bf16.mxu1 %vm858_vm0, %v441_v36  ;;  %v5817_v36 = vld [vmem:[#allocation7 + $0x204] ss:$16 sps:$4 sm:$0xff]  }
 0x114   : > { %2962 = vmatpush1.bf16.msra.mxu1 %v5806_v24  ;;  %2740 = vmatprep.subr.bf16.mxu0 %v5817_v36  ;;  %v6871_v36 = vrot.slane %v6822_v44, %v536_v22 }
 0x115   : > { %1036 = vmatmul.mubr.bf16.gmra.mrb[32].mxu0 %v440_v45  ;;  %2963 = vmatprep.subr.bf16.mxu1 %v5814_v29  ;;  %v5823_v29 = vld [vmem:[#allocation7 + $0x224] ss:$16 sps:$4 sm:$0xff]  }
 0x116   : > { %4710 = vmatprep.mubr.msk.bf16.mxu0 %vm858_vm0, %v443_v46 }
 0x118   : > { %2964 = vmatpush1.bf16.msra.mxu1 %v5812_v31 }
 0x119   : > { %3126 = vmatprep.subr.bf16.mxu1 %v5820_v40 }
 0x11a   : > { %1229 = vmatmul.mubr.bf16.gmra.mrb[32].mxu1 %v440_v45  ;;  %v528_v45 = vsub.s32 1, %v6819_v42 }
 0x11b   : > { %4726 = vmatprep.mubr.msk.bf16.mxu1 %vm858_vm0, %v443_v46  ;;  %v6828_v46 = vrot.slane %v6822_v44, %v524_v43 }
 0x11c   : > { %v6833_v48 = vrot.slane %v6822_v44, %v528_v45 }
 0x11d   : > { %1046 = vmatmul.mubr.bf16.gmra.mrb[36].mxu0 %v442_v50 }
 0x11e   : > { %4711 = vmatprep.mubr.msk.bf16.mxu0 %vm858_vm0, %v445_v56 }
 0x122   : > { %1239 = vmatmul.mubr.bf16.gmra.mrb[36].mxu1 %v442_v50 }
 0x123   : > { %4727 = vmatprep.mubr.msk.bf16.mxu1 %vm858_vm0, %v445_v56 }
 0x125   : > { %1056 = vmatmul.mubr.bf16.gmra.mrb[40].mxu0 %v444_v62 }
 0x126   : > { %4712 = vmatprep.mubr.msk.bf16.mxu0 %vm858_vm0, %v447_v0 }
 0x12a   : > { %1249 = vmatmul.mubr.bf16.gmra.mrb[40].mxu1 %v444_v62 }
 0x12b   : > { %4728 = vmatprep.mubr.msk.bf16.mxu1 %vm858_vm0, %v447_v0 }
 0x12d   : > { %1066 = vmatmul.mubr.bf16.gmra.mrb[44].mxu0 %v446_v5 }
 0x12e   : > { %4713 = vmatprep.mubr.msk.bf16.mxu0 %vm858_vm0, %v6790_v6 }
 0x132   : > { %1259 = vmatmul.mubr.bf16.gmra.mrb[44].mxu1 %v446_v5 }
 0x133   : > { %4729 = vmatprep.mubr.msk.bf16.mxu1 %vm858_vm0, %v6790_v6 }
 0x135   : > { %1076 = vmatmul.mubr.bf16.gmra.mrb[48].mxu0 %v448_v12 }
 0x136   : > { %4714 = vmatprep.mubr.msk.bf16.mxu0 %vm858_vm0, %v451_v14 }
 0x13a   : > { %1269 = vmatmul.mubr.bf16.gmra.mrb[48].mxu1 %v448_v12 }
 0x13b   : > { %4730 = vmatprep.mubr.msk.bf16.mxu1 %vm858_vm0, %v451_v14 }
 0x13d   : > { %1086 = vmatmul.mubr.bf16.gmra.mrb[52].mxu0 %v450_v23 }
 0x13e   : > { %4715 = vmatprep.mubr.msk.bf16.mxu0 %vm858_vm0, %v453_v25 }
 0x142   : > { %1279 = vmatmul.mubr.bf16.gmra.mrb[52].mxu1 %v450_v23 }
 0x143   : > { %4731 = vmatprep.mubr.msk.bf16.mxu1 %vm858_vm0, %v453_v25  ;;  %v5815_v25 = vld [vmem:[#allocation7 + $0x200] ss:$16 sps:$4 sm:$0xff]  }
 0x145   : > { %1096 = vmatmul.mubr.bf16.gmra.mrb[56].mxu0 %v452_v34 }
 0x146   : > { %4716 = vmatprep.mubr.msk.bf16.mxu0 %vm858_vm0, %v455_v35 }
 0x14a   : > { %1289 = vmatmul.mubr.bf16.gmra.mrb[56].mxu1 %v452_v34 }
 0x14b   : > { %4732 = vmatprep.mubr.msk.bf16.mxu1 %vm858_vm0, %v455_v35 }
 0x14d   : > { %1106 = vmatmul.mubr.bf16.gmra.mrb[60].mxu0 %v454_v39 }
 0x152   : > { %1299 = vmatmul.mubr.bf16.gmra.mrb[60].mxu1 %v454_v39 }
 0x1a8   : > { %v957_v47 = vpop.f32.mrb[0].mxu0 }
 0x1a9   : > { %v959_v49 = vpop.f32.mrb[1].mxu0  ;;  %v958_v52 = vadd.f32 %v957_v47, %v6828_v46  ;;  %v5824_v47 = vld [vmem:[#allocation7 + $0x228] ss:$16 sps:$4 sm:$0xff]  }
 0x1aa   : > { %v961_v51 = vpop.f32.mrb[2].mxu0  ;;  %v960_v55 = vadd.f32 %v959_v49, %v6833_v48 }
 0x1ab   : > { %v962_v53 = vadd.f32 %v961_v51, %v6828_v46  ;;  %v963_v54 = vpop.f32.mrb[3].mxu0 }
 0x1ac   : > { %v964_v50 = vadd.f32 %v963_v54, %v6833_v48  ;;  %v5832_v54 = vld [vmem:[#allocation7 + $0x24c] ss:$16 sps:$4 sm:$0xff]  }
 0x1ad   : > { %v1309_v56 = vpack.c.bf16 %v962_v53, %v958_v52  ;;  %v1150_v49 = vpop.f32.mrb[0].mxu1  ;;  %v5829_v53 = vld [vmem:[#allocation7 + $0x244] ss:$16 sps:$4 sm:$0xff]  }
 0x1ae   : > { %v1310_v57 = vpack.c.bf16 %v964_v50, %v960_v55  ;;  %v1151_v55 = vadd.f32 %v1150_v49, %v6866_v30  ;;  %v1152_v50 = vpop.f32.mrb[1].mxu1  ;;  %v5842_v49 = vld [vmem:[#allocation7 + $0x288] ss:$16 sps:$4 sm:$0xff]  }
 0x1af   : > { %v1438_v58 = vmul.bf16 1069105081, %v1309_v56  ;;  %vm1373_vm4 = vcmp.gt.bf16.partialorder %v1309_v56, 0 }
 0x1b0   : > { %v1441_v59 = vmul.bf16 1069105081, %v1310_v57  ;;  %v967_v60 = vpop.f32.mrb[4].mxu0  ;;  %vm1374_vm3 = vcmp.gt.bf16.partialorder %v1310_v57, 0 }
 0x1b1   : > { %5943 = vpow.bf16 %v1438_v58  ;;  %v969_v61 = vpop.f32.mrb[5].mxu0  ;;  %v968_v0 = vadd.f32 %v967_v60, %v6828_v46  ;;  %v1154_v60 = vpop.f32.mrb[2].mxu1 }
 0x1b2   : > { %5945 = vpow.bf16 %v1441_v59  ;;  %v971_v62 = vpop.f32.mrb[6].mxu0  ;;  %v970_v3 = vadd.f32 %v969_v61, %v6833_v48  ;;  %v1153_v59 = vadd.f32 %v1152_v50, %v6871_v36 }
 0x1b3   : > { %v972_v1 = vadd.f32 %v971_v62, %v6828_v46  ;;  %v973_v63 = vpop.f32.mrb[7].mxu0 }
 0x1b4   : > { %v974_v4 = vadd.f32 %v973_v63, %v6833_v48  ;;  %v1155_v63 = vadd.f32 %v1154_v60, %v6866_v30 }
 0x1b5   : > { %v6843_v5 = vpack.c.bf16 %v972_v1, %v968_v0  ;;  %v5827_v0 = vld [vmem:[#allocation7 + $0x240] ss:$16 sps:$4 sm:$0xff]   ;;  %v5830_v1 = vld [vmem:[#allocation7 + $0x248] ss:$16 sps:$4 sm:$0xff]  }
 0x1b6   : > { %v6845_v6 = vpack.c.bf16 %v974_v4, %v970_v3  ;;  %v1156_v3 = vpop.f32.mrb[3].mxu1 }
 0x1b7   : > { %v1450_v2 = vmul.bf16 1069105081, %v6843_v5  ;;  %vm1377_vm6 = vcmp.gt.bf16.partialorder %v6843_v5, 0 }
 0x1b8   : > { %v1453_v7 = vmul.bf16 1069105081, %v6845_v6  ;;  %v977_v8 = vpop.f32.mrb[8].mxu0  ;;  %vm1378_vm5 = vcmp.gt.bf16.partialorder %v6845_v6, 0 }
 0x1b9   : > { %5947 = vpow.bf16 %v1450_v2  ;;  %v979_v9 = vpop.f32.mrb[9].mxu0  ;;  %v978_v11 = vadd.f32 %v977_v8, %v6828_v46  ;;  %v5835_v2 = vld [vmem:[#allocation7 + $0x264] ss:$16 sps:$4 sm:$0xff]  }
 0x1ba   : > { %5949 = vpow.bf16 %v1453_v7  ;;  %v981_v10 = vpop.f32.mrb[10].mxu0  ;;  %v980_v17 = vadd.f32 %v979_v9, %v6833_v48  ;;  %v1157_v7 = vadd.f32 %v1156_v3, %v6871_v36 }
 0x1bb   : > { %v982_v12 = vadd.f32 %v981_v10, %v6828_v46  ;;  %v983_v14 = vpop.f32.mrb[11].mxu0 }
 0x1bc   : > { %v5944_v15 = vpop.eup %5943  ;;  %v984_v18 = vadd.f32 %v983_v14, %v6833_v48 }
 0x1bd   : > { %v5946_v19 = vpop.eup %5945  ;;  %v6854_v20 = vpack.c.bf16 %v982_v12, %v978_v11  ;;  %v1629_v16 = vsub.bf16 %v5944_v15, %v6395_v21  ;;  %v5838_v11 = vld [vmem:[#allocation7 + $0x26c] ss:$16 sps:$4 sm:$0xff]   ;;  %v6892_v12 = vpack.c.bf16 %v1155_v63, %v1151_v55 }
 0x1be   : > { %v6858_v23 = vpack.c.bf16 %v984_v18, %v980_v17  ;;  %v1630_v24 = vsub.bf16 %v5946_v19, %v6395_v21  ;;  %v6895_v17 = vpack.c.bf16 %v1157_v7, %v1153_v59 }
 0x1bf   : > { %v1462_v27 = vmul.bf16 1069105081, %v6854_v20  ;;  %v1693_v35 = vsel %vm1373_vm4, %v1309_v56, %v1629_v16  ;;  %vm1381_vm8 = vcmp.gt.bf16.partialorder %v6854_v20, 0 }
 0x1c0   : > { %v1465_v31 = vmul.bf16 1069105081, %v6858_v23  ;;  %v987_v32 = vpop.f32.mrb[12].mxu0  ;;  %v1694_v28 = vsel %vm1374_vm3, %v1310_v57, %v1630_v24  ;;  %v5833_v24 = vld [vmem:[#allocation7 + $0x260] ss:$16 sps:$4 sm:$0xff]   ;;  %vm1382_vm7 = vcmp.gt.bf16.partialorder %v6858_v23, 0 }
 0x1c1   : > { %5951 = vpow.bf16 %v1462_v27  ;;  %v989_v34 = vpop.f32.mrb[13].mxu0  ;;  %2579 = vmatprep.mubr.bf16.mxu0 %v1694_v28  ;;  %2965 = vmatprep.mubr.bf16.mxu1 %v1694_v28  ;;  %v988_v38 = vadd.f32 %v987_v32, %v6828_v46  ;;  %v5844_v32 = vld [vmem:[#allocation7 + $0x28c] ss:$16 sps:$4 sm:$0xff]  }
 0x1c2   : > { %5953 = vpow.bf16 %v1465_v31  ;;  %v991_v37 = vpop.f32.mrb[14].mxu0  ;;  %2580 = vmatmul.mubr.bf16.vlgmr.msra.gmra.mrb[64].mxu0 %v1693_v35  ;;  %2966 = vmatmul.mubr.bf16.vlgmr.msra.gmra.mrb[64].mxu1 %v1693_v35  ;;  %v990_v52 = vadd.f32 %v989_v34, %v6833_v48  ;;  %v5841_v31 = vld [vmem:[#allocation7 + $0x284] ss:$16 sps:$4 sm:$0xff]  }
 0x1c3   : > { %v992_v39 = vadd.f32 %v991_v37, %v6828_v46  ;;  %2741 = vmatpush1.bf16.msra.mxu0 %v5815_v25  ;;  %v993_v40 = vpop.f32.mrb[15].mxu0  ;;  %3127 = vmatpush1.bf16.msra.mxu1 %v5818_v26  ;;  %v5836_v25 = vld [vmem:[#allocation7 + $0x268] ss:$16 sps:$4 sm:$0xff]   ;;  %v1160_v26 = vpop.f32.mrb[4].mxu1 }
 0x1c4   : > { %v5948_v51 = vpop.eup %5947  ;;  %v994_v44 = vadd.f32 %v993_v40, %v6833_v48  ;;  %2742 = vmatprep.subr.bf16.mxu0 %v5823_v29  ;;  %3128 = vmatprep.subr.bf16.mxu1 %v5826_v33  ;;  %v1161_v28 = vadd.f32 %v1160_v26, %v6866_v30  ;;  %v1162_v33 = vpop.f32.mrb[5].mxu1 }
 0x1c5   : > { %v5950_v56 = vpop.eup %5949  ;;  %v6878_v57 = vpack.c.bf16 %v992_v39, %v988_v38  ;;  %v1633_v58 = vsub.bf16 %v5948_v51, %v6395_v21  ;;  %v1163_v38 = vadd.f32 %v1162_v33, %v6871_v36  ;;  %v1164_v39 = vpop.f32.mrb[6].mxu1 }
 0x1c6   : > { %v6882_v61 = vpack.c.bf16 %v994_v44, %v990_v52  ;;  %v1634_v62 = vsub.bf16 %v5950_v56, %v6395_v21  ;;  %v1165_v51 = vadd.f32 %v1164_v39, %v6866_v30  ;;  %v1166_v52 = vpop.f32.mrb[7].mxu1  ;;  %v5862_v39 = vld [vmem:[#allocation7 + $0x2ec] ss:$16 sps:$4 sm:$0xff]  }
 0x1c7   : > { %v1474_v4 = vmul.bf16 1069105081, %v6878_v57  ;;  %2743 = vmatpush1.bf16.msra.mxu0 %v5821_v41  ;;  %3129 = vmatpush1.bf16.msra.mxu1 %v5824_v47  ;;  %v1697_v15 = vsel %vm1377_vm6, %v6843_v5, %v1633_v58  ;;  %v5839_v47 = vld [vmem:[#allocation7 + $0x280] ss:$16 sps:$4 sm:$0xff]   ;;  %v5850_v58 = vld [vmem:[#allocation7 + $0x2ac] ss:$16 sps:$4 sm:$0xff]  }
 0x1c8   : > { %v1477_v8 = vmul.bf16 1069105081, %v6882_v61  ;;  %v997_v9 = vpop.f32.mrb[16].mxu0  ;;  %v1698_v10 = vsel %vm1378_vm5, %v6845_v6, %v1634_v62  ;;  %2744 = vmatprep.subr.bf16.mxu0 %v5829_v53  ;;  %3130 = vmatprep.subr.bf16.mxu1 %v5832_v54  ;;  %v5847_v53 = vld [vmem:[#allocation7 + $0x2a4] ss:$16 sps:$4 sm:$0xff]   ;;  %v1167_v54 = vadd.f32 %v1166_v52, %v6871_v36  ;;  %v6916_v59 = vpack.c.bf16 %v1165_v51, %v1161_v28  ;;  %v1170_v7 = vpop.f32.mrb[8].mxu1 }
 0x1c9   : > { %5955 = vpow.bf16 %v1474_v4  ;;  %v999_v14 = vpop.f32.mrb[17].mxu0  ;;  %2589 = vmatprep.mubr.bf16.mxu0 %v1698_v10  ;;  %2975 = vmatprep.mubr.bf16.mxu1 %v1698_v10  ;;  %v998_v6 = vadd.f32 %v997_v9, %v6828_v46  ;;  %v5845_v4 = vld [vmem:[#allocation7 + $0x2a0] ss:$16 sps:$4 sm:$0xff]   ;;  %v5853_v10 = vld [vmem:[#allocation7 + $0x2c4] ss:$16 sps:$4 sm:$0xff]   ;;  %vm1386_vm9 = vcmp.gt.bf16.partialorder %v6882_v61, 0 }
 0x1ca   : > { %5957 = vpow.bf16 %v1477_v8  ;;  %v1001_v18 = vpop.f32.mrb[18].mxu0  ;;  %2590 = vmatmul.mubr.bf16.gmra.mrb[68].mxu0 %v1697_v15  ;;  %2976 = vmatmul.mubr.bf16.gmra.mrb[68].mxu1 %v1697_v15  ;;  %v1000_v29 = vadd.f32 %v999_v14, %v6833_v48  ;;  %v1171_v14 = vadd.f32 %v1170_v7, %v6866_v30  ;;  %v1172_v15 = vpop.f32.mrb[9].mxu1  ;;  %v5859_v28 = vld [vmem:[#allocation7 + $0x2e4] ss:$16 sps:$4 sm:$0xff]   ;;  %vm1385_vm10 = vcmp.gt.bf16.partialorder %v6878_v57, 0 }
 0x1cb   : > { %v1002_v19 = vadd.f32 %v1001_v18, %v6828_v46  ;;  %v1003_v16 = vpop.f32.mrb[19].mxu0  ;;  %2745 = vmatpush1.bf16.msra.mxu0 %v5827_v0  ;;  %3131 = vmatpush1.bf16.msra.mxu1 %v5830_v1  ;;  %v6919_v0 = vpack.c.bf16 %v1167_v54, %v1163_v38  ;;  %v5857_v54 = vld [vmem:[#allocation7 + $0x2e0] ss:$16 sps:$4 sm:$0xff]  }
 0x1cc   : > { %v5952_v27 = vpop.eup %5951  ;;  %v1004_v5 = vadd.f32 %v1003_v16, %v6833_v48  ;;  %2746 = vmatprep.subr.bf16.mxu0 %v5835_v2  ;;  %3132 = vmatprep.subr.bf16.mxu1 %v5838_v11  ;;  %v5848_v2 = vld [vmem:[#allocation7 + $0x2a8] ss:$16 sps:$4 sm:$0xff]   ;;  %v5856_v11 = vld [vmem:[#allocation7 + $0x2cc] ss:$16 sps:$4 sm:$0xff]   ;;  %v1173_v16 = vadd.f32 %v1172_v15, %v6871_v36 }
 0x1cd   : > { %v5954_v34 = vpop.eup %5953  ;;  %v6902_v35 = vpack.c.bf16 %v1002_v19, %v998_v6  ;;  %v1637_v37 = vsub.bf16 %v5952_v27, %v6395_v21  ;;  %v5851_v27 = vld [vmem:[#allocation7 + $0x2c0] ss:$16 sps:$4 sm:$0xff]  }
 0x1ce   : > { %v6906_v40 = vpack.c.bf16 %v1004_v5, %v1000_v29  ;;  %v1638_v41 = vsub.bf16 %v5954_v34, %v6395_v21  ;;  %v5854_v29 = vld [vmem:[#allocation7 + $0x2c8] ss:$16 sps:$4 sm:$0xff]  }
 0x1cf   : > { %v1486_v44 = vmul.bf16 1069105081, %v6902_v35  ;;  %2747 = vmatpush1.bf16.msra.mxu0 %v5833_v24  ;;  %3133 = vmatpush1.bf16.msra.mxu1 %v5836_v25  ;;  %v1701_v62 = vsel %vm1381_vm8, %v6854_v20, %v1637_v37  ;;  %v1174_v24 = vpop.f32.mrb[10].mxu1  ;;  %vm1389_vm12 = vcmp.gt.bf16.partialorder %v6902_v35, 0 }
 0x1d0   : > { %v1489_v55 = vmul.bf16 1069105081, %v6906_v40  ;;  %v1007_v50 = vpop.f32.mrb[20].mxu0  ;;  %v1702_v56 = vsel %vm1382_vm7, %v6858_v23, %v1638_v41  ;;  %2748 = vmatprep.subr.bf16.mxu0 %v5841_v31  ;;  %3134 = vmatprep.subr.bf16.mxu1 %v5844_v32  ;;  %v1175_v5 = vadd.f32 %v1174_v24, %v6866_v30  ;;  %v1176_v31 = vpop.f32.mrb[11].mxu1  ;;  %vm1390_vm11 = vcmp.gt.bf16.partialorder %v6906_v40, 0 }
 0x1d1   : > { %5959 = vpow.bf16 %v1486_v44  ;;  %v1009_v60 = vpop.f32.mrb[21].mxu0  ;;  %2599 = vmatprep.mubr.bf16.mxu0 %v1702_v56  ;;  %2985 = vmatprep.mubr.bf16.mxu1 %v1702_v56  ;;  %v1008_v23 = vadd.f32 %v1007_v50, %v6828_v46  ;;  %v1177_v33 = vadd.f32 %v1176_v31, %v6871_v36  ;;  %v1180_v50 = vpop.f32.mrb[12].mxu1 }
 0x1d2   : > { %5961 = vpow.bf16 %v1489_v55  ;;  %v1011_v1 = vpop.f32.mrb[22].mxu0  ;;  %2600 = vmatmul.mubr.bf16.gmra.mrb[72].mxu0 %v1701_v62  ;;  %2986 = vmatmul.mubr.bf16.gmra.mrb[72].mxu1 %v1701_v62  ;;  %v1010_v9 = vadd.f32 %v1009_v60, %v6833_v48  ;;  %v6940_v41 = vpack.c.bf16 %v1175_v5, %v1171_v14  ;;  %v5860_v55 = vld [vmem:[#allocation7 + $0x2e8] ss:$16 sps:$4 sm:$0xff]   ;;  %v5865_v60 = vld [vmem:[#allocation7 + $0x304] ss:$16 sps:$4 sm:$0xff]  }
 0x1d3   : > { %v1012_v63 = vadd.f32 %v1011_v1, %v6828_v46  ;;  %v1013_v3 = vpop.f32.mrb[23].mxu0  ;;  %2749 = vmatpush1.bf16.msra.mxu0 %v5839_v47  ;;  %3135 = vmatpush1.bf16.msra.mxu1 %v5842_v49  ;;  %v6943_v51 = vpack.c.bf16 %v1177_v33, %v1173_v16  ;;  %v5868_v62 = vld [vmem:[#allocation7 + $0x30c] ss:$16 sps:$4 sm:$0xff]   ;;  %v1181_v1 = vadd.f32 %v1180_v50, %v6866_v30 }
 0x1d4   : > { %v5956_v8 = vpop.eup %5955  ;;  %v1014_v20 = vadd.f32 %v1013_v3, %v6833_v48  ;;  %2750 = vmatprep.subr.bf16.mxu0 %v5847_v53  ;;  %3136 = vmatprep.subr.bf16.mxu1 %v5850_v58 }
 0x1d5   : > { %v5958_v18 = vpop.eup %5957  ;;  %v6926_v6 = vpack.c.bf16 %v1012_v63, %v1008_v23  ;;  %v1641_v19 = vsub.bf16 %v5956_v8, %v6395_v21  ;;  %v1182_v23 = vpop.f32.mrb[13].mxu1 }
 0x1d6   : > { %v6930_v25 = vpack.c.bf16 %v1014_v20, %v1010_v9  ;;  %v1642_v26 = vsub.bf16 %v5958_v18, %v6395_v21  ;;  %v1184_v7 = vpop.f32.mrb[14].mxu1  ;;  %v5863_v20 = vld [vmem:[#allocation7 + $0x300] ss:$16 sps:$4 sm:$0xff]   ;;  %v5871_v18 = vld [vmem:[#allocation7 + $0x324] ss:$16 sps:$4 sm:$0xff]  }
 0x1d7   : > { %v1498_v32 = vmul.bf16 1069105081, %v6926_v6  ;;  %2751 = vmatpush1.bf16.msra.mxu0 %v5845_v4  ;;  %3137 = vmatpush1.bf16.msra.mxu1 %v5848_v2  ;;  %v1705_v49 = vsel %vm1385_vm10, %v6878_v57, %v1641_v19  ;;  %v1183_v2 = vadd.f32 %v1182_v23, %v6871_v36  ;;  %v1186_v14 = vpop.f32.mrb[15].mxu1  ;;  %vm1393_vm14 = vcmp.gt.bf16.partialorder %v6926_v6, 0 }
 0x1d8   : > { %v1501_v34 = vmul.bf16 1069105081, %v6930_v25  ;;  %v1017_v37 = vpop.f32.mrb[24].mxu0  ;;  %v1706_v38 = vsel %vm1386_vm9, %v6882_v61, %v1642_v26  ;;  %2752 = vmatprep.subr.bf16.mxu0 %v5853_v10  ;;  %3138 = vmatprep.subr.bf16.mxu1 %v5856_v11  ;;  %v5866_v10 = vld [vmem:[#allocation7 + $0x308] ss:$16 sps:$4 sm:$0xff]   ;;  %v1185_v11 = vadd.f32 %v1184_v7, %v6866_v30  ;;  %v1187_v19 = vadd.f32 %v1186_v14, %v6871_v36 }
 0x1d9   : > { %5963 = vpow.bf16 %v1498_v32  ;;  %v1019_v47 = vpop.f32.mrb[25].mxu0  ;;  %2609 = vmatprep.mubr.bf16.mxu0 %v1706_v38  ;;  %2995 = vmatprep.mubr.bf16.mxu1 %v1706_v38  ;;  %v1018_v61 = vadd.f32 %v1017_v37, %v6828_v46  ;;  %v5869_v37 = vld [vmem:[#allocation7 + $0x320] ss:$16 sps:$4 sm:$0xff]   ;;  %v5872_v38 = vld [vmem:[#allocation7 + $0x328] ss:$16 sps:$4 sm:$0xff]   ;;  %vm1394_vm13 = vcmp.gt.bf16.partialorder %v6930_v25, 0 }
 0x1da   : > { %5965 = vpow.bf16 %v1501_v34  ;;  %v1021_v52 = vpop.f32.mrb[26].mxu0  ;;  %2610 = vmatmul.mubr.bf16.gmra.mrb[76].mxu0 %v1705_v49  ;;  %2996 = vmatmul.mubr.bf16.gmra.mrb[76].mxu1 %v1705_v49  ;;  %v1020_v58 = vadd.f32 %v1019_v47, %v6833_v48  ;;  %v6967_v32 = vpack.c.bf16 %v1187_v19, %v1183_v2  ;;  %v5883_v2 = vld [vmem:[#allocation7 + $0x364] ss:$16 sps:$4 sm:$0xff]  }
 0x1db   : > { %v1022_v44 = vadd.f32 %v1021_v52, %v6828_v46  ;;  %v1023_v53 = vpop.f32.mrb[27].mxu0  ;;  %2753 = vmatpush1.bf16.msra.mxu0 %v5851_v27  ;;  %3139 = vmatpush1.bf16.msra.mxu1 %v5854_v29  ;;  %v5874_v27 = vld [vmem:[#allocation7 + $0x32c] ss:$16 sps:$4 sm:$0xff]   ;;  %v6964_v29 = vpack.c.bf16 %v1185_v11, %v1181_v1  ;;  %v5877_v52 = vld [vmem:[#allocation7 + $0x344] ss:$16 sps:$4 sm:$0xff]  }
 0x1dc   : > { %v5960_v56 = vpop.eup %5959  ;;  %v1024_v57 = vadd.f32 %v1023_v53, %v6833_v48  ;;  %2754 = vmatprep.subr.bf16.mxu0 %v5859_v28  ;;  %3140 = vmatprep.subr.bf16.mxu1 %v5862_v39  ;;  %v1190_v39 = vpop.f32.mrb[16].mxu1  ;;  %v5878_v1 = vld [vmem:[#allocation7 + $0x348] ss:$16 sps:$4 sm:$0xff]   ;;  %v5886_v11 = vld [vmem:[#allocation7 + $0x36c] ss:$16 sps:$4 sm:$0xff]  }
 0x1dd   : > { %v5962_v63 = vpop.eup %5961  ;;  %v6950_v3 = vpack.c.bf16 %v1022_v44, %v1018_v61  ;;  %v1645_v4 = vsub.bf16 %v5960_v56, %v6395_v21  ;;  %v5880_v61 = vld [vmem:[#allocation7 + $0x34c] ss:$16 sps:$4 sm:$0xff]   ;;  %v1191_v44 = vadd.f32 %v1190_v39, %v6866_v30  ;;  %v1192_v53 = vpop.f32.mrb[17].mxu1 }
 0x1de   : > { %v6954_v8 = vpack.c.bf16 %v1024_v57, %v1020_v58  ;;  %v1646_v9 = vsub.bf16 %v5962_v63, %v6395_v21  ;;  %v1193_v56 = vadd.f32 %v1192_v53, %v6871_v36  ;;  %v1194_v58 = vpop.f32.mrb[18].mxu1  ;;  %v5887_v53 = vld [vmem:[#allocation7 + $0x380] ss:$16 sps:$4 sm:$0xff]  }
 0x1df   : > { %v1510_v15 = vmul.bf16 1069105081, %v6950_v3  ;;  %2755 = vmatpush1.bf16.msra.mxu0 %v5857_v54  ;;  %3141 = vmatpush1.bf16.msra.mxu1 %v5860_v55  ;;  %v1709_v31 = vsel %vm1389_vm12, %v6902_v35, %v1645_v4  ;;  %v1195_v23 = vadd.f32 %v1194_v58, %v6866_v30  ;;  %v1196_v63 = vpop.f32.mrb[19].mxu1  ;;  %vm1397_vm0 = vcmp.gt.bf16.partialorder %v6950_v3, 0 }
 0x1e0   : > { %v1513_v16 = vmul.bf16 1069105081, %v6954_v8  ;;  %v1027_v24 = vpop.f32.mrb[28].mxu0  ;;  %v1710_v26 = vsel %vm1390_vm11, %v6906_v40, %v1646_v9  ;;  %2756 = vmatprep.subr.bf16.mxu0 %v5865_v60  ;;  %3142 = vmatprep.subr.bf16.mxu1 %v5868_v62  ;;  %v5875_v62 = vld [vmem:[#allocation7 + $0x340] ss:$16 sps:$4 sm:$0xff]   ;;  %v1197_v7 = vadd.f32 %v1196_v63, %v6871_v36  ;;  %vm1398_vm15 = vcmp.gt.bf16.partialorder %v6954_v8, 0 }
 0x1e1   : > { %5967 = vpow.bf16 %v1510_v15  ;;  %v1029_v5 = vpop.f32.mrb[29].mxu0  ;;  %2619 = vmatprep.mubr.bf16.mxu0 %v1710_v26  ;;  %3005 = vmatprep.mubr.bf16.mxu1 %v1710_v26  ;;  %v1028_v40 = vadd.f32 %v1027_v24, %v6828_v46  ;;  %v6988_v14 = vpack.c.bf16 %v1195_v23, %v1191_v44 }
 0x1e2   : > { %5969 = vpow.bf16 %v1513_v16  ;;  %v1031_v28 = vpop.f32.mrb[30].mxu0  ;;  %2620 = vmatmul.mubr.bf16.gmra.mrb[80].mxu0 %v1709_v31  ;;  %3006 = vmatmul.mubr.bf16.gmra.mrb[80].mxu1 %v1709_v31  ;;  %v1030_v49 = vadd.f32 %v1029_v5, %v6833_v48  ;;  %v6991_v19 = vpack.c.bf16 %v1197_v7, %v1193_v56  ;;  %v5884_v5 = vld [vmem:[#allocation7 + $0x368] ss:$16 sps:$4 sm:$0xff]   ;;  %v1200_v31 = vpop.f32.mrb[20].mxu1 }
 0x1e3   : > { %v1032_v33 = vadd.f32 %v1031_v28, %v6828_v46  ;;  %v1033_v34 = vpop.f32.mrb[31].mxu0  ;;  %2757 = vmatpush1.bf16.msra.mxu0 %v5863_v20  ;;  %3143 = vmatpush1.bf16.msra.mxu1 %v5866_v10 }
 0x1e4   : > { %v5964_v47 = vpop.eup %5963  ;;  %v1034_v35 = vadd.f32 %v1033_v34, %v6833_v48  ;;  %2758 = vmatprep.subr.bf16.mxu0 %v5871_v18  ;;  %3144 = vmatprep.subr.bf16.mxu1 %v5874_v27  ;;  %v5881_v27 = vld [vmem:[#allocation7 + $0x360] ss:$16 sps:$4 sm:$0xff]   ;;  %v5892_v34 = vld [vmem:[#allocation7 + $0x38c] ss:$16 sps:$4 sm:$0xff]  }
 0x1e5   : > { %v5966_v54 = vpop.eup %5965  ;;  %v6974_v55 = vpack.c.bf16 %v1032_v33, %v1028_v40  ;;  %v1649_v50 = vsub.bf16 %v5964_v47, %v6395_v21  ;;  %v5889_v33 = vld [vmem:[#allocation7 + $0x384] ss:$16 sps:$4 sm:$0xff]  }
 0x1e6   : > { %v6978_v57 = vpack.c.bf16 %v1034_v35, %v1030_v49  ;;  %v1650_v60 = vsub.bf16 %v5966_v54, %v6395_v21  ;;  %v5890_v54 = vld [vmem:[#allocation7 + $0x388] ss:$16 sps:$4 sm:$0xff]  }
 0x1e7   : > { %v1522_v4 = vmul.bf16 1069105081, %v6974_v55  ;;  %2759 = vmatpush1.bf16.msra.mxu0 %v5869_v37  ;;  %3145 = vmatpush1.bf16.msra.mxu1 %v5872_v38  ;;  %v1713_v18 = vsel %vm1393_vm14, %v6926_v6, %v1649_v50  ;;  %v1201_v37 = vadd.f32 %v1200_v31, %v6866_v30  ;;  %v1202_v38 = vpop.f32.mrb[21].mxu1  ;;  %vm1401_vm2 = vcmp.gt.bf16.partialorder %v6974_v55, 0 }
 0x1e8   : > { %v1525_v9 = vmul.bf16 1069105081, %v6978_v57  ;;  %v1037_v20 = vpop.f32.mrb[32].mxu0  ;;  %v1714_v10 = vsel %vm1394_vm13, %v6930_v25, %v1650_v60  ;;  %2760 = vmatprep.subr.bf16.mxu0 %v5877_v52  ;;  %3146 = vmatprep.subr.bf16.mxu1 %v5880_v61  ;;  %v1203_v35 = vadd.f32 %v1202_v38, %v6871_v36  ;;  %v1204_v52 = vpop.f32.mrb[22].mxu1  ;;  %v5895_v60 = vld [vmem:[#allocation7 + $0x3a4] ss:$16 sps:$4 sm:$0xff]  }
 0x1e9   : > { %5971 = vpow.bf16 %v1522_v4  ;;  %v1039_v15 = vpop.f32.mrb[33].mxu0  ;;  %2629 = vmatprep.mubr.bf16.mxu0 %v1714_v10  ;;  %3015 = vmatprep.mubr.bf16.mxu1 %v1714_v10  ;;  %v1038_v25 = vadd.f32 %v1037_v20, %v6828_v46  ;;  %v1205_v50 = vadd.f32 %v1204_v52, %v6866_v30  ;;  %v1206_v56 = vpop.f32.mrb[23].mxu1  ;;  %v5898_v4 = vld [vmem:[#allocation7 + $0x3ac] ss:$16 sps:$4 sm:$0xff]   ;;  %vm1402_vm1 = vcmp.gt.bf16.partialorder %v6978_v57, 0 }
 0x1ea   : > { %5973 = vpow.bf16 %v1525_v9  ;;  %v1041_v16 = vpop.f32.mrb[34].mxu0  ;;  %2630 = vmatmul.mubr.bf16.gmra.mrb[84].mxu0 %v1713_v18  ;;  %3016 = vmatmul.mubr.bf16.gmra.mrb[84].mxu1 %v1713_v18  ;;  %v1040_v40 = vadd.f32 %v1039_v15, %v6833_v48  ;;  %v5893_v18 = vld [vmem:[#allocation7 + $0x3a0] ss:$16 sps:$4 sm:$0xff]  }
 0x1eb   : > { %v1042_v24 = vadd.f32 %v1041_v16, %v6828_v46  ;;  %v1043_v26 = vpop.f32.mrb[35].mxu0  ;;  %2761 = vmatpush1.bf16.msra.mxu0 %v5875_v62  ;;  %3147 = vmatpush1.bf16.msra.mxu1 %v5878_v1  ;;  %v1207_v62 = vadd.f32 %v1206_v56, %v6871_v36  ;;  %v5896_v16 = vld [vmem:[#allocation7 + $0x3a8] ss:$16 sps:$4 sm:$0xff]  }
 0x1ec   : > { %v5968_v28 = vpop.eup %5967  ;;  %v1044_v6 = vadd.f32 %v1043_v26, %v6833_v48  ;;  %2762 = vmatprep.subr.bf16.mxu0 %v5883_v2  ;;  %3148 = vmatprep.subr.bf16.mxu1 %v5886_v11  ;;  %v7012_v2 = vpack.c.bf16 %v1205_v50, %v1201_v37  ;;  %v5907_v50 = vld [vmem:[#allocation7 + $0x3e4] ss:$16 sps:$4 sm:$0xff]  }
 0x1ed   : > { %v5970_v39 = vpop.eup %5969  ;;  %v6998_v47 = vpack.c.bf16 %v1042_v24, %v1038_v25  ;;  %v1653_v49 = vsub.bf16 %v5968_v28, %v6395_v21  ;;  %v7015_v20 = vpack.c.bf16 %v1207_v62, %v1203_v35  ;;  %v1210_v25 = vpop.f32.mrb[24].mxu1  ;;  %v5902_v35 = vld [vmem:[#allocation7 + $0x3c8] ss:$16 sps:$4 sm:$0xff]  }
 0x1ee   : > { %v7002_v61 = vpack.c.bf16 %v1044_v6, %v1040_v40  ;;  %v1654_v44 = vsub.bf16 %v5970_v39, %v6395_v21  ;;  %v1211_v31 = vadd.f32 %v1210_v25, %v6866_v30  ;;  %v1212_v28 = vpop.f32.mrb[25].mxu1 }
 0x1ef   : > { %v1534_v58 = vmul.bf16 1069105081, %v6998_v47  ;;  %2763 = vmatpush1.bf16.msra.mxu0 %v5881_v27  ;;  %3149 = vmatpush1.bf16.msra.mxu1 %v5884_v5  ;;  %v1717_v9 = vsel %vm1397_vm0, %v6950_v3, %v1653_v49  ;;  %v5901_v27 = vld [vmem:[#allocation7 + $0x3c4] ss:$16 sps:$4 sm:$0xff]   ;;  %v5904_v5 = vld [vmem:[#allocation7 + $0x3cc] ss:$16 sps:$4 sm:$0xff]  }
 0x1f0   : > { %v1537_v1 = vmul.bf16 1069105081, %v7002_v61  ;;  %v1047_v23 = vpop.f32.mrb[36].mxu0  ;;  %v1718_v63 = vsel %vm1398_vm15, %v6954_v8, %v1654_v44  ;;  %2764 = vmatprep.subr.bf16.mxu0 %v5889_v33  ;;  %3150 = vmatprep.subr.bf16.mxu1 %v5892_v34  ;;  %v1213_v34 = vadd.f32 %v1212_v28, %v6871_v36  ;;  %v1214_v37 = vpop.f32.mrb[26].mxu1  ;;  %v5899_v49 = vld [vmem:[#allocation7 + $0x3c0] ss:$16 sps:$4 sm:$0xff]  }
 0x1f1   : > { %5975 = vpow.bf16 %v1534_v58  ;;  %v1049_v7 = vpop.f32.mrb[37].mxu0  ;;  %2639 = vmatprep.mubr.bf16.mxu0 %v1718_v63  ;;  %3025 = vmatprep.mubr.bf16.mxu1 %v1718_v63  ;;  %v1048_v8 = vadd.f32 %v1047_v23, %v6828_v46  ;;  %v1215_v52 = vadd.f32 %v1214_v37, %v6866_v30  ;;  %v1216_v44 = vpop.f32.mrb[27].mxu1  ;;  %vm1406_vm3 = vcmp.gt.bf16.partialorder %v7002_v61, 0 }
 0x1f2   : > { %5977 = vpow.bf16 %v1537_v1  ;;  %v1051_v10 = vpop.f32.mrb[38].mxu0  ;;  %2640 = vmatmul.mubr.bf16.gmra.mrb[88].mxu0 %v1717_v9  ;;  %3026 = vmatmul.mubr.bf16.gmra.mrb[88].mxu1 %v1717_v9  ;;  %v1050_v26 = vadd.f32 %v1049_v7, %v6833_v48  ;;  %v5910_v1 = vld [vmem:[#allocation7 + $0x3ec] ss:$16 sps:$4 sm:$0xff]   ;;  %vm1405_vm4 = vcmp.gt.bf16.partialorder %v6998_v47, 0 }
 0x1f3   : > { %v1052_v11 = vadd.f32 %v1051_v10, %v6828_v46  ;;  %v1053_v15 = vpop.f32.mrb[39].mxu0  ;;  %2765 = vmatpush1.bf16.msra.mxu0 %v5887_v53  ;;  %3151 = vmatpush1.bf16.msra.mxu1 %v5890_v54  ;;  %v1217_v54 = vadd.f32 %v1216_v44, %v6871_v36  ;;  %v7036_v62 = vpack.c.bf16 %v1215_v52, %v1211_v31 }
 0x1f4   : > { %v5972_v24 = vpop.eup %5971  ;;  %v1054_v3 = vadd.f32 %v1053_v15, %v6833_v48  ;;  %2766 = vmatprep.subr.bf16.mxu0 %v5895_v60  ;;  %3152 = vmatprep.subr.bf16.mxu1 %v5898_v4  ;;  %v1220_v15 = vpop.f32.mrb[28].mxu1 }
 0x1f5   : > { %v5974_v40 = vpop.eup %5973  ;;  %v7022_v6 = vpack.c.bf16 %v1052_v11, %v1048_v8  ;;  %v1657_v33 = vsub.bf16 %v5972_v24, %v6395_v21  ;;  %v7039_v4 = vpack.c.bf16 %v1217_v54, %v1213_v34  ;;  %v5905_v8 = vld [vmem:[#allocation7 + $0x3e0] ss:$16 sps:$4 sm:$0xff]   ;;  %v5908_v11 = vld [vmem:[#allocation7 + $0x3e8] ss:$16 sps:$4 sm:$0xff]   ;;  %v1221_v25 = vadd.f32 %v1220_v15, %v6866_v30  ;;  %v1222_v24 = vpop.f32.mrb[29].mxu1 }
 0x1f6   : > { %v7026_v38 = vpack.c.bf16 %v1054_v3, %v1050_v26  ;;  %v1658_v39 = vsub.bf16 %v5974_v40, %v6395_v21  ;;  %v1224_v31 = vpop.f32.mrb[30].mxu1 }
 0x1f7   : > { %v1546_v53 = vmul.bf16 1069105081, %v7022_v6  ;;  %2767 = vmatpush1.bf16.msra.mxu0 %v5893_v18  ;;  %3153 = vmatpush1.bf16.msra.mxu1 %v5896_v16  ;;  %v1721_v63 = vsel %vm1401_vm2, %v6974_v55, %v1657_v33  ;;  %v1225_v33 = vadd.f32 %v1224_v31, %v6866_v30  ;;  %v1226_v34 = vpop.f32.mrb[31].mxu1  ;;  %vm1409_vm6 = vcmp.gt.bf16.partialorder %v7022_v6, 0 }
 0x1f8   : > { %v1549_v56 = vmul.bf16 1069105081, %v7026_v38  ;;  %v1057_v58 = vpop.f32.mrb[40].mxu0  ;;  %v1722_v60 = vsel %vm1402_vm1, %v6978_v57, %v1658_v39  ;;  %2768 = vmatprep.subr.bf16.mxu0 %v5901_v27  ;;  %3154 = vmatprep.subr.bf16.mxu1 %v5904_v5  ;;  %v1223_v5 = vadd.f32 %v1222_v24, %v6871_v36  ;;  %v1227_v39 = vadd.f32 %v1226_v34, %v6871_v36 }
 0x1f9   : > { %5979 = vpow.bf16 %v1546_v53  ;;  %v1059_v23 = vpop.f32.mrb[41].mxu0  ;;  %2649 = vmatprep.mubr.bf16.mxu0 %v1722_v60  ;;  %3035 = vmatprep.mubr.bf16.mxu1 %v1722_v60  ;;  %v1058_v57 = vadd.f32 %v1057_v58, %v6828_v46  ;;  %v7060_v44 = vpack.c.bf16 %v1225_v33, %v1221_v25  ;;  %vm1410_vm5 = vcmp.gt.bf16.partialorder %v7026_v38, 0 }
 0x1fa   : > { %5981 = vpow.bf16 %v1549_v56  ;;  %v1061_v7 = vpop.f32.mrb[42].mxu0  ;;  %2650 = vmatmul.mubr.bf16.gmra.mrb[92].mxu0 %v1721_v63  ;;  %3036 = vmatmul.mubr.bf16.gmra.mrb[92].mxu1 %v1721_v63  ;;  %v1060_v16 = vadd.f32 %v1059_v23, %v6833_v48  ;;  %vm1376_vm2 = vcmp.gt.bf16.partialorder %v6895_v17, 0 }
 0x1fb   : > { %v1062_v9 = vadd.f32 %v1061_v7, %v6828_v46  ;;  %v1063_v10 = vpop.f32.mrb[43].mxu0  ;;  %2769 = vmatpush1.bf16.msra.mxu0 %v5899_v49  ;;  %3155 = vmatpush1.bf16.msra.mxu1 %v5902_v35 }
 0x1fc   : > { %v5976_v18 = vpop.eup %5975  ;;  %v1064_v55 = vadd.f32 %v1063_v10, %v6833_v48  ;;  %2770 = vmatprep.subr.bf16.mxu0 %v5907_v50  ;;  %3156 = vmatprep.subr.bf16.mxu1 %v5910_v1  ;;  %v7063_v50 = vpack.c.bf16 %v1227_v39, %v1223_v5  ;;  %v1230_v1 = vpop.f32.mrb[32].mxu1 }
 0x1fd   : > { %v5978_v26 = vpop.eup %5977  ;;  %v7046_v3 = vpack.c.bf16 %v1062_v9, %v1058_v57  ;;  %v1661_v27 = vsub.bf16 %v5976_v18, %v6395_v21  ;;  %v1231_v57 = vadd.f32 %v1230_v1, %v6866_v30 }
 0x1fe   : > { %v7050_v28 = vpack.c.bf16 %v1064_v55, %v1060_v16  ;;  %v1662_v40 = vsub.bf16 %v5978_v26, %v6395_v21 }
 0x1ff   : > { %v1558_v37 = vmul.bf16 1069105081, %v7046_v3  ;;  %2771 = vmatpush1.bf16.msra.mxu0 %v5905_v8  ;;  %3157 = vmatpush1.bf16.msra.mxu1 %v5908_v11  ;;  %v1725_v54 = vsel %vm1405_vm4, %v6998_v47, %v1661_v27  ;;  %v1232_v47 = vpop.f32.mrb[33].mxu1  ;;  %vm1413_vm8 = vcmp.gt.bf16.partialorder %v7046_v3, 0  ;;  %vm1375_vm4 = vcmp.gt.bf16.partialorder %v6892_v12, 0 }
 0x200   : > { %v1561_v49 = vmul.bf16 1069105081, %v7050_v28  ;;  %v1067_v35 = vpop.f32.mrb[44].mxu0  ;;  %v1726_v52 = vsel %vm1406_vm3, %v7002_v61, %v1662_v40  ;;  %v1233_v11 = vadd.f32 %v1232_v47, %v6871_v36  ;;  %v1234_v15 = vpop.f32.mrb[34].mxu1  ;;  %vm1414_vm7 = vcmp.gt.bf16.partialorder %v7050_v28, 0 }
 0x201   : > { %5983 = vpow.bf16 %v1558_v37  ;;  %v1069_v53 = vpop.f32.mrb[45].mxu0  ;;  %2659 = vmatprep.mubr.bf16.mxu0 %v1726_v52  ;;  %3045 = vmatprep.mubr.bf16.mxu1 %v1726_v52  ;;  %v1068_v58 = vadd.f32 %v1067_v35, %v6828_v46  ;;  %v1235_v55 = vadd.f32 %v1234_v15, %v6866_v30  ;;  %v1236_v25 = vpop.f32.mrb[35].mxu1 }
 0x202   : > { %5985 = vpow.bf16 %v1561_v49  ;;  %v1071_v56 = vpop.f32.mrb[46].mxu0  ;;  %2660 = vmatmul.mubr.bf16.gmra.mrb[96].mxu0 %v1725_v54  ;;  %3046 = vmatmul.mubr.bf16.gmra.mrb[96].mxu1 %v1725_v54  ;;  %v1070_v63 = vadd.f32 %v1069_v53, %v6833_v48  ;;  %v1237_v26 = vadd.f32 %v1236_v25, %v6871_v36  ;;  %v1240_v52 = vpop.f32.mrb[36].mxu1 }
 0x203   : > { %v1072_v61 = vadd.f32 %v1071_v56, %v6828_v46  ;;  %v1073_v60 = vpop.f32.mrb[47].mxu0  ;;  %v7084_v40 = vpack.c.bf16 %v1235_v55, %v1231_v57 }
 0x204   : > { %v5980_v23 = vpop.eup %5979  ;;  %v1074_v7 = vadd.f32 %v1073_v60, %v6833_v48  ;;  %v7087_v37 = vpack.c.bf16 %v1237_v26, %v1233_v11 }
 0x205   : > { %v5982_v9 = vpop.eup %5981  ;;  %v7070_v10 = vpack.c.bf16 %v1072_v61, %v1068_v58  ;;  %v1665_v8 = vsub.bf16 %v5980_v23, %v6395_v21  ;;  %v1241_v58 = vadd.f32 %v1240_v52, %v6866_v30 }
 0x206   : > { %v7074_v18 = vpack.c.bf16 %v1074_v7, %v1070_v63  ;;  %v1666_v16 = vsub.bf16 %v5982_v9, %v6395_v21 }
 0x207   : > { %v1570_v24 = vmul.bf16 1069105081, %v7070_v10  ;;  %v1729_v34 = vsel %vm1409_vm6, %v7022_v6, %v1665_v8  ;;  %v1242_v6 = vpop.f32.mrb[37].mxu1  ;;  %vm1417_vm10 = vcmp.gt.bf16.partialorder %v7070_v10, 0  ;;  %vm1379_vm6 = vcmp.gt.bf16.partialorder %v6916_v59, 0 }
 0x208   : > { %v1573_v27 = vmul.bf16 1069105081, %v7074_v18  ;;  %v1077_v5 = vpop.f32.mrb[48].mxu0  ;;  %v1730_v31 = vsel %vm1410_vm5, %v7026_v38, %v1666_v16  ;;  %v1243_v23 = vadd.f32 %v1242_v6, %v6871_v36  ;;  %v1244_v63 = vpop.f32.mrb[38].mxu1  ;;  %vm1418_vm9 = vcmp.gt.bf16.partialorder %v7074_v18, 0 }
 0x209   : > { %5987 = vpow.bf16 %v1570_v24  ;;  %v1079_v33 = vpop.f32.mrb[49].mxu0  ;;  %2669 = vmatprep.mubr.bf16.mxu0 %v1730_v31  ;;  %3055 = vmatprep.mubr.bf16.mxu1 %v1730_v31  ;;  %v1078_v49 = vadd.f32 %v1077_v5, %v6828_v46  ;;  %v1245_v47 = vadd.f32 %v1244_v63, %v6866_v30  ;;  %v1246_v9 = vpop.f32.mrb[39].mxu1  ;;  %vm1380_vm5 = vcmp.gt.bf16.partialorder %v6919_v0, 0 }
 0x20a   : > { %5989 = vpow.bf16 %v1573_v27  ;;  %v1081_v39 = vpop.f32.mrb[50].mxu0  ;;  %2670 = vmatmul.mubr.bf16.gmra.mrb[100].mxu0 %v1729_v34  ;;  %3056 = vmatmul.mubr.bf16.gmra.mrb[100].mxu1 %v1729_v34  ;;  %v1080_v54 = vadd.f32 %v1079_v33, %v6833_v48  ;;  %v1247_v11 = vadd.f32 %v1246_v9, %v6871_v36  ;;  %v1250_v34 = vpop.f32.mrb[40].mxu1 }
 0x20b   : > { %v1082_v38 = vadd.f32 %v1081_v39, %v6828_v46  ;;  %v1083_v35 = vpop.f32.mrb[51].mxu0  ;;  %v7108_v25 = vpack.c.bf16 %v1245_v47, %v1241_v58 }
 0x20c   : > { %v5984_v53 = vpop.eup %5983  ;;  %v1084_v56 = vadd.f32 %v1083_v35, %v6833_v48  ;;  %v7111_v27 = vpack.c.bf16 %v1247_v11, %v1243_v23  ;;  %v1251_v35 = vadd.f32 %v1250_v34, %v6866_v30 }
 0x20d   : > { %v5986_v61 = vpop.eup %5985  ;;  %v7094_v60 = vpack.c.bf16 %v1082_v38, %v1078_v49  ;;  %v1669_v1 = vsub.bf16 %v5984_v53, %v6395_v21 }
 0x20e   : > { %v7098_v7 = vpack.c.bf16 %v1084_v56, %v1080_v54  ;;  %v1670_v57 = vsub.bf16 %v5986_v61, %v6395_v21 }
 0x20f   : > { %v1582_v8 = vmul.bf16 1069105081, %v7094_v60  ;;  %v1733_v26 = vsel %vm1413_vm8, %v7046_v3, %v1669_v1  ;;  %v1252_v3 = vpop.f32.mrb[41].mxu1  ;;  %vm1421_vm12 = vcmp.gt.bf16.partialorder %v7094_v60, 0  ;;  %vm1383_vm8 = vcmp.gt.bf16.partialorder %v6940_v41, 0 }
 0x210   : > { %v1585_v15 = vmul.bf16 1069105081, %v7098_v7  ;;  %v1087_v16 = vpop.f32.mrb[52].mxu0  ;;  %v1734_v55 = vsel %vm1414_vm7, %v7050_v28, %v1670_v57  ;;  %v1253_v56 = vadd.f32 %v1252_v3, %v6871_v36  ;;  %v1254_v58 = vpop.f32.mrb[42].mxu1  ;;  %vm1422_vm11 = vcmp.gt.bf16.partialorder %v7098_v7, 0 }
 0x211   : > { %5991 = vpow.bf16 %v1582_v8  ;;  %v1089_v24 = vpop.f32.mrb[53].mxu0  ;;  %2679 = vmatprep.mubr.bf16.mxu0 %v1734_v55  ;;  %3065 = vmatprep.mubr.bf16.mxu1 %v1734_v55  ;;  %v1088_v31 = vadd.f32 %v1087_v16, %v6828_v46  ;;  %v1255_v1 = vadd.f32 %v1254_v58, %v6866_v30  ;;  %v1256_v23 = vpop.f32.mrb[43].mxu1  ;;  %vm1384_vm7 = vcmp.gt.bf16.partialorder %v6943_v51, 0 }
 0x212   : > { %5993 = vpow.bf16 %v1585_v15  ;;  %v1091_v5 = vpop.f32.mrb[54].mxu0  ;;  %2680 = vmatmul.mubr.bf16.gmra.mrb[104].mxu0 %v1733_v26  ;;  %3066 = vmatmul.mubr.bf16.gmra.mrb[104].mxu1 %v1733_v26  ;;  %v1090_v49 = vadd.f32 %v1089_v24, %v6833_v48  ;;  %v1257_v57 = vadd.f32 %v1256_v23, %v6871_v36 }
 0x213   : > { %v1092_v28 = vadd.f32 %v1091_v5, %v6828_v46  ;;  %v1093_v33 = vpop.f32.mrb[55].mxu0  ;;  %v7132_v11 = vpack.c.bf16 %v1255_v1, %v1251_v35 }
 0x214   : > { %v5988_v39 = vpop.eup %5987  ;;  %v1094_v38 = vadd.f32 %v1093_v33, %v6833_v48  ;;  %v7135_v55 = vpack.c.bf16 %v1257_v57, %v1253_v56 }
 0x215   : > { %v5990_v52 = vpop.eup %5989  ;;  %v7118_v53 = vpack.c.bf16 %v1092_v28, %v1088_v31  ;;  %v1673_v54 = vsub.bf16 %v5988_v39, %v6395_v21  ;;  %v1260_v31 = vpop.f32.mrb[44].mxu1 }
 0x216   : > { %v7122_v6 = vpack.c.bf16 %v1094_v38, %v1090_v49  ;;  %v1674_v61 = vsub.bf16 %v5990_v52, %v6395_v21  ;;  %v1261_v39 = vadd.f32 %v1260_v31, %v6866_v30 }
 0x217   : > { %v1594_v63 = vmul.bf16 1069105081, %v7118_v53  ;;  %v1737_v16 = vsel %vm1417_vm10, %v7070_v10, %v1673_v54  ;;  %v1262_v10 = vpop.f32.mrb[45].mxu1  ;;  %vm1425_vm14 = vcmp.gt.bf16.partialorder %v7118_v53, 0  ;;  %vm1387_vm10 = vcmp.gt.bf16.partialorder %v6964_v29, 0 }
 0x218   : > { %v1597_v47 = vmul.bf16 1069105081, %v7122_v6  ;;  %v1097_v9 = vpop.f32.mrb[56].mxu0  ;;  %v1738_v8 = vsel %vm1418_vm9, %v7074_v18, %v1674_v61  ;;  %v1263_v3 = vadd.f32 %v1262_v10, %v6871_v36  ;;  %v1264_v52 = vpop.f32.mrb[46].mxu1  ;;  %vm1426_vm13 = vcmp.gt.bf16.partialorder %v7122_v6, 0 }
 0x219   : > { %5995 = vpow.bf16 %v1594_v63  ;;  %v1099_v15 = vpop.f32.mrb[57].mxu0  ;;  %2689 = vmatprep.mubr.bf16.mxu0 %v1738_v8  ;;  %3075 = vmatprep.mubr.bf16.mxu1 %v1738_v8  ;;  %v1098_v26 = vadd.f32 %v1097_v9, %v6828_v46  ;;  %v1265_v58 = vadd.f32 %v1264_v52, %v6866_v30  ;;  %v1266_v61 = vpop.f32.mrb[47].mxu1  ;;  %vm1388_vm9 = vcmp.gt.bf16.partialorder %v6967_v32, 0 }
 0x21a   : > { %5997 = vpow.bf16 %v1597_v47  ;;  %v1101_v24 = vpop.f32.mrb[58].mxu0  ;;  %2690 = vmatmul.mubr.bf16.gmra.mrb[108].mxu0 %v1737_v16  ;;  %3076 = vmatmul.mubr.bf16.gmra.mrb[108].mxu1 %v1737_v16  ;;  %v1100_v33 = vadd.f32 %v1099_v15, %v6833_v48  ;;  %v1267_v23 = vadd.f32 %v1266_v61, %v6871_v36  ;;  %v1270_v31 = vpop.f32.mrb[48].mxu1 }
 0x21b   : > { %v1102_v18 = vadd.f32 %v1101_v24, %v6828_v46  ;;  %v1103_v5 = vpop.f32.mrb[59].mxu0  ;;  %v7156_v9 = vpack.c.bf16 %v1265_v58, %v1261_v39  ;;  %v1272_v39 = vpop.f32.mrb[49].mxu1 }
 0x21c   : > { %v5992_v28 = vpop.eup %5991  ;;  %v1104_v34 = vadd.f32 %v1103_v5, %v6833_v48  ;;  %v7159_v16 = vpack.c.bf16 %v1267_v23, %v1263_v3  ;;  %v1273_v3 = vadd.f32 %v1272_v39, %v6871_v36  ;;  %v1274_v52 = vpop.f32.mrb[50].mxu1 }
 0x21d   : > { %v5994_v49 = vpop.eup %5993  ;;  %v7142_v38 = vpack.c.bf16 %v1102_v18, %v1098_v26  ;;  %v1677_v35 = vsub.bf16 %v5992_v28, %v6395_v21  ;;  %v1447_v26 = vmul.bf16 1069105081, %v6895_v17  ;;  %v1275_v58 = vadd.f32 %v1274_v52, %v6866_v30  ;;  %v1276_v61 = vpop.f32.mrb[51].mxu1 }
 0x21e   : > { %v7146_v54 = vpack.c.bf16 %v1104_v34, %v1100_v33  ;;  %v1678_v56 = vsub.bf16 %v5994_v49, %v6395_v21 }
 0x21f   : > { %v1606_v1 = vmul.bf16 1069105081, %v7142_v38  ;;  %v1741_v15 = vsel %vm1421_vm12, %v7094_v60, %v1677_v35  ;;  %v1271_v60 = vadd.f32 %v1270_v31, %v6866_v30  ;;  %v5913_v31 = vld [vmem:[#allocation9 + $0xc0] sm:$0xff]   ;;  %vm1429_vm0 = vcmp.gt.bf16.partialorder %v7142_v38, 0 }
 0x220   : > { %v1609_v63 = vmul.bf16 1069105081, %v7146_v54  ;;  %v1107_v57 = vpop.f32.mrb[60].mxu0  ;;  %v1742_v47 = vsel %vm1422_vm11, %v7098_v7, %v1678_v56  ;;  %5169 = vmatprep.subr.bf16.mxu1 %v5913_v31  ;;  %vm1430_vm15 = vcmp.gt.bf16.partialorder %v7146_v54, 0  ;;  %vm1392_vm11 = vcmp.gt.bf16.partialorder %v6991_v19, 0 }
 0x221   : > { %5999 = vpow.bf16 %v1606_v1  ;;  %v1109_v8 = vpop.f32.mrb[61].mxu0  ;;  %2699 = vmatprep.mubr.bf16.mxu0 %v1742_v47  ;;  %3085 = vmatprep.mubr.bf16.mxu1 %v1742_v47  ;;  %v1108_v7 = vadd.f32 %v1107_v57, %v6828_v46  ;;  %v1277_v1 = vadd.f32 %v1276_v61, %v6871_v36  ;;  %v7181_v57 = vpack.c.bf16 %v1275_v58, %v1271_v60 }
 0x222   : > { %6001 = vpow.bf16 %v1609_v63  ;;  %v1111_v24 = vpop.f32.mrb[62].mxu0  ;;  %2700 = vmatmul.mubr.bf16.gmra.mrb[112].mxu0 %v1741_v15  ;;  %3086 = vmatmul.mubr.bf16.gmra.mrb[112].mxu1 %v1741_v15  ;;  %v1110_v33 = vadd.f32 %v1109_v8, %v6833_v48  ;;  %v1444_v15 = vmul.bf16 1069105081, %v6892_v12  ;;  %vm1391_vm12 = vcmp.gt.bf16.partialorder %v6988_v14, 0 }
 0x223   : > { %v1112_v18 = vadd.f32 %v1111_v24, %v6828_v46  ;;  %v1113_v5 = vpop.f32.mrb[63].mxu0  ;;  %6003 = vpow.bf16 %v1447_v26  ;;  %v7184_v8 = vpack.c.bf16 %v1277_v1, %v1273_v3  ;;  %v1280_v24 = vpop.f32.mrb[52].mxu1  ;;  %v5911_v26 = vld [vmem:[#allocation9 + $0x40] sm:$0xff]  }
 0x224   : > { %v5996_v28 = vpop.eup %5995  ;;  %v1114_v34 = vadd.f32 %v1113_v5, %v6833_v48  ;;  %v1282_v5 = vpop.f32.mrb[53].mxu1  ;;  %5057 = vmatprep.subr.bf16.mxu0 %v5911_v26 }
 0x225   : > { %v5998_v10 = vpop.eup %5997  ;;  %v7167_v49 = vpack.c.bf16 %v1112_v18, %v1108_v7  ;;  %v1681_v35 = vsub.bf16 %v5996_v28, %v6395_v21  ;;  %v1281_v18 = vadd.f32 %v1280_v24, %v6866_v30 }
 0x226   : > { %v7171_v56 = vpack.c.bf16 %v1114_v34, %v1110_v33  ;;  %v1682_v46 = vsub.bf16 %v5998_v10, %v6395_v21  ;;  %v1284_v34 = vpop.f32.mrb[54].mxu1 }
 0x227   : > { %v1618_v48 = vmul.bf16 1069105081, %v7167_v49  ;;  %v1745_v47 = vsel %vm1425_vm14, %v7118_v53, %v1681_v35  ;;  %v1283_v53 = vadd.f32 %v1282_v5, %v6871_v36  ;;  %v1285_v39 = vadd.f32 %v1284_v34, %v6866_v30  ;;  %v1286_v10 = vpop.f32.mrb[55].mxu1 }
 0x228   : > { %v1621_v23 = vmul.bf16 1069105081, %v7171_v56  ;;  %v1746_v63 = vsel %vm1426_vm13, %v7122_v6, %v1682_v46  ;;  %v1459_v6 = vmul.bf16 1069105081, %v6919_v0  ;;  %v1287_v35 = vadd.f32 %v1286_v10, %v6871_v36  ;;  %v1290_v1 = vpop.f32.mrb[56].mxu1 }
 0x229   : > { %6005 = vpow.bf16 %v1618_v48  ;;  %2709 = vmatprep.mubr.bf16.mxu0 %v1746_v63  ;;  %3095 = vmatprep.mubr.bf16.mxu1 %v1746_v63  ;;  %v7197_v52 = vpack.c.bf16 %v1285_v39, %v1281_v18  ;;  %v1456_v48 = vmul.bf16 1069105081, %v6916_v59  ;;  %v1471_v63 = vmul.bf16 1069105081, %v6943_v51 }
 0x22a   : > { %6007 = vpow.bf16 %v1621_v23  ;;  %2710 = vmatmul.mubr.bf16.gmra.mrb[116].mxu0 %v1745_v47  ;;  %3096 = vmatmul.mubr.bf16.gmra.mrb[116].mxu1 %v1745_v47  ;;  %v7200_v58 = vpack.c.bf16 %v1287_v35, %v1283_v53  ;;  %v1292_v47 = vpop.f32.mrb[57].mxu1  ;;  %vm1434_vm1 = vcmp.gt.bf16.partialorder %v7171_v56, 0  ;;  %vm1433_vm3 = vcmp.gt.bf16.partialorder %v7167_v49, 0 }
 0x22b   : > { %6009 = vpow.bf16 %v1444_v15  ;;  %v1293_v26 = vadd.f32 %v1292_v47, %v6871_v36  ;;  %v1468_v35 = vmul.bf16 1069105081, %v6940_v41  ;;  %vm1396_vm13 = vcmp.gt.bf16.partialorder %v7015_v20, 0 }
 0x22c   : > { %v6000_v7 = vpop.eup %5999  ;;  %6011 = vpow.bf16 %v1459_v6  ;;  %vm1395_vm14 = vcmp.gt.bf16.partialorder %v7012_v2, 0 }
 0x22d   : > { %v6002_v28 = vpop.eup %6001  ;;  %v1685_v33 = vsub.bf16 %v6000_v7, %v6395_v21  ;;  %6013 = vpow.bf16 %v1456_v48 }
 0x22e   : > { %v1686_v60 = vsub.bf16 %v6002_v28, %v6395_v21  ;;  %v6004_v61 = vpop.eup %6003  ;;  %6015 = vpow.bf16 %v1471_v63 }
 0x22f   : > { %v1749_v46 = vsel %vm1429_vm0, %v7142_v38, %v1685_v33  ;;  %v1294_v38 = vpop.f32.mrb[58].mxu1  ;;  %v1632_v6 = vsub.bf16 %v6004_v61, %v6395_v21  ;;  %6017 = vpow.bf16 %v1468_v35  ;;  %v5922_v35 = vld [vmem:[#allocation9 + $0x90] sm:$0xff]   ;;  %vm1399_vm0 = vcmp.gt.bf16.partialorder %v7036_v62, 0 }
 0x230   : > { %v1750_v3 = vsel %vm1430_vm15, %v7146_v54, %v1686_v60  ;;  %v1291_v54 = vadd.f32 %v1290_v1, %v6866_v30  ;;  %v1295_v18 = vadd.f32 %v1294_v38, %v6866_v30  ;;  %v1296_v5 = vpop.f32.mrb[59].mxu1  ;;  %vm1400_vm15 = vcmp.gt.bf16.partialorder %v7039_v4, 0 }
 0x231   : > { %2719 = vmatprep.mubr.bf16.mxu0 %v1750_v3  ;;  %3105 = vmatprep.mubr.bf16.mxu1 %v1750_v3  ;;  %v1297_v31 = vadd.f32 %v1296_v5, %v6871_v36  ;;  %v1696_v39 = vsel %vm1376_vm2, %v6895_v17, %v1632_v6  ;;  %v1483_v3 = vmul.bf16 1069105081, %v6967_v32  ;;  %v5917_v6 = vld [vmem:[#allocation9 + $0xc8] sm:$0xff]   ;;  %vm1403_vm2 = vcmp.gt.bf16.partialorder %v7060_v44, 0 }
 0x232   : > { %2720 = vmatmul.mubr.bf16.gmra.mrb[120].mxu0 %v1749_v46  ;;  %3106 = vmatmul.mubr.bf16.gmra.mrb[120].mxu1 %v1749_v46  ;;  %v7215_v33 = vpack.c.bf16 %v1295_v18, %v1291_v54 }
 0x233   : > { %v7218_v34 = vpack.c.bf16 %v1297_v31, %v1293_v26  ;;  %6019 = vpow.bf16 %v1483_v3  ;;  %v1480_v31 = vmul.bf16 1069105081, %v6964_v29  ;;  %v5923_v3 = vld [vmem:[#allocation9 + $0x58] sm:$0xff]  }
 0x234   : > { %v6006_v23 = vpop.eup %6005 }
 0x235   : > { %v6008_v15 = vpop.eup %6007  ;;  %v1689_v24 = vsub.bf16 %v6006_v23, %v6395_v21  ;;  %6021 = vpow.bf16 %v1480_v31 }
 0x236   : > { %v1690_v7 = vsub.bf16 %v6008_v15, %v6395_v21  ;;  %v6010_v60 = vpop.eup %6009  ;;  %v5912_v15 = vld [vmem:[#allocation9] sm:$0xff]  }
 0x237   : > { %v1753_v53 = vsel %vm1433_vm3, %v7167_v49, %v1689_v24  ;;  %v6012_v10 = vpop.eup %6011  ;;  %v1631_v49 = vsub.bf16 %v6010_v60, %v6395_v21  ;;  %v5914_v24 = vld [vmem:[#allocation9 + $0x80] sm:$0xff]   ;;  %v5919_v60 = vld [vmem:[#allocation9 + $0x50] sm:$0xff]   ;;  %vm1408_vm3 = vcmp.gt.bf16.partialorder %v7087_v37, 0 }
 0x238   : > { %v1754_v28 = vsel %vm1434_vm1, %v7171_v56, %v1690_v7  ;;  %v1300_v56 = vpop.f32.mrb[60].mxu1  ;;  %v1636_v17 = vsub.bf16 %v6012_v10, %v6395_v21  ;;  %v5915_v7 = vld [vmem:[#allocation9 + $0x48] sm:$0xff]   ;;  %v6014_v18 = vpop.eup %6013  ;;  %v5920_v10 = vld [vmem:[#allocation9 + $0x10] sm:$0xff]   ;;  %vm1404_vm1 = vcmp.gt.bf16.partialorder %v7063_v50, 0 }
 0x239   : > { %2729 = vmatprep.mubr.bf16.mxu0 %v1754_v28  ;;  %3115 = vmatprep.mubr.bf16.mxu1 %v1754_v28  ;;  %v1301_v46 = vadd.f32 %v1300_v56, %v6866_v30  ;;  %v1302_v61 = vpop.f32.mrb[61].mxu1  ;;  %v1695_v26 = vsel %vm1375_vm4, %v6892_v12, %v1631_v49  ;;  %v6016_v5 = vpop.eup %6015  ;;  %v5916_v28 = vld [vmem:[#allocation9 + $0x8] sm:$0xff]   ;;  %vm1407_vm4 = vcmp.gt.bf16.partialorder %v7084_v40, 0 }
 0x23a   : > { %2730 = vmatmul.mubr.bf16.gmra.mrb[124].mxu0 %v1753_v53  ;;  %3116 = vmatmul.mubr.bf16.gmra.mrb[124].mxu1 %v1753_v53  ;;  %v1303_v48 = vadd.f32 %v1302_v61, %v6871_v36  ;;  %v1304_v1 = vpop.f32.mrb[62].mxu1  ;;  %v5918_v12 = vld [vmem:[#allocation9 + $0x88] sm:$0xff]   ;;  %v1635_v53 = vsub.bf16 %v6014_v18, %v6395_v21  ;;  %v6018_v61 = vpop.eup %6017 }
 0x23b   : > { %2772 = vmatprep.mubr.bf16.mxu0 %v1696_v39  ;;  %3158 = vmatprep.mubr.bf16.mxu1 %v1696_v39  ;;  %v1305_v23 = vadd.f32 %v1304_v1, %v6866_v30  ;;  %v1306_v63 = vpop.f32.mrb[63].mxu1  ;;  %v1700_v30 = vsel %vm1380_vm5, %v6919_v0, %v1636_v17  ;;  %v5921_v39 = vld [vmem:[#allocation9 + $0xd0] sm:$0xff]   ;;  %v1640_v0 = vsub.bf16 %v6016_v5, %v6395_v21  ;;  %v1492_v1 = vmul.bf16 1069105081, %v6988_v14  ;;  %v5933_v18 = vld [vmem:[#allocation9 + $0xe8] sm:$0xff]  }
 0x23c   : > { %v1307_v54 = vadd.f32 %v1306_v63, %v6871_v36  ;;  %v1495_v36 = vmul.bf16 1069105081, %v6991_v19  ;;  %v1699_v56 = vsel %vm1379_vm6, %v6916_v59, %v1635_v53  ;;  %v1507_v17 = vmul.bf16 1069105081, %v7015_v20  ;;  %v5926_v59 = vld [vmem:[#allocation9 + $0x98] sm:$0xff]  }
 0x23d   : > { %v7231_v47 = vpack.c.bf16 %v1305_v23, %v1301_v46  ;;  %v5925_v46 = vld [vmem:[#allocation9 + $0xd8] sm:$0xff]   ;;  %v1704_v49 = vsel %vm1384_vm7, %v6943_v51, %v1640_v0  ;;  %v1639_v63 = vsub.bf16 %v6018_v61, %v6395_v21  ;;  %v5936_v0 = vld [vmem:[#allocation9 + $0x30] sm:$0xff]   ;;  %v1516_v61 = vmul.bf16 1069105081, %v7036_v62 }
 0x23e   : > { %v7234_v38 = vpack.c.bf16 %v1307_v54, %v1303_v48  ;;  %6023 = vpow.bf16 %v1495_v36  ;;  %v6020_v48 = vpop.eup %6019  ;;  %v5924_v23 = vld [vmem:[#allocation9 + $0x18] sm:$0xff]   ;;  %v5927_v54 = vld [vmem:[#allocation9 + $0x60] sm:$0xff]   ;;  %v1504_v36 = vmul.bf16 1069105081, %v7012_v2  ;;  %vm1412_vm5 = vcmp.gt.bf16.partialorder %v7111_v27, 0 }
 0x23f   : > { %v1644_v51 = vsub.bf16 %v6020_v48, %v6395_v21  ;;  %6025 = vpow.bf16 %v1492_v1  ;;  %vm1411_vm6 = vcmp.gt.bf16.partialorder %v7108_v25, 0  ;;  %vm1416_vm7 = vcmp.gt.bf16.partialorder %v7135_v55, 0 }
 0x240   : > { %6027 = vpow.bf16 %v1507_v17 }
 0x241   : > { %v1708_v5 = vsel %vm1388_vm9, %v6967_v32, %v1644_v51  ;;  %6029 = vpow.bf16 %v1504_v36  ;;  %v1567_v36 = vmul.bf16 1069105081, %v7135_v55  ;;  %vm1420_vm9 = vcmp.gt.bf16.partialorder %v7159_v16, 0 }
 0x242   : > { %2773 = vmatmul.mubr.bf16.vlgmr.msra.gmra.mrb[64].mxu0 %v1695_v26  ;;  %3159 = vmatmul.mubr.bf16.vlgmr.msra.gmra.mrb[64].mxu1 %v1695_v26  ;;  %v5930_v26 = vld [vmem:[#allocation9 + $0xa0] sm:$0xff]  }
 0x243   : > { %2782 = vmatprep.mubr.bf16.mxu0 %v1700_v30  ;;  %3168 = vmatprep.mubr.bf16.mxu1 %v1700_v30  ;;  %v6022_v30 = vpop.eup %6021 }
 0x244   : > { %5058 = vmatpush3.bf16.msra.mxu0 %v5912_v15  ;;  %5170 = vmatpush3.bf16.msra.mxu1 %v5914_v24  ;;  %v5929_v15 = vld [vmem:[#allocation9 + $0xe0] sm:$0xff]   ;;  %v1643_v53 = vsub.bf16 %v6022_v30, %v6395_v21 }
 0x245   : > { %5059 = vmatprep.subr.bf16.mxu0 %v5915_v7  ;;  %5171 = vmatprep.subr.bf16.mxu1 %v5917_v6  ;;  %v5928_v24 = vld [vmem:[#allocation9 + $0x20] sm:$0xff]   ;;  %v1703_v7 = vsel %vm1383_vm8, %v6940_v41, %v1639_v63  ;;  %v5931_v6 = vld [vmem:[#allocation9 + $0x68] sm:$0xff]   ;;  %v1543_v63 = vmul.bf16 1069105081, %v7087_v37  ;;  %vm1415_vm8 = vcmp.gt.bf16.partialorder %v7132_v11, 0 }
 0x246   : > { %v5934_v41 = vld [vmem:[#allocation9 + $0xa8] sm:$0xff]  }
 0x248   : > { %5060 = vmatpush3.bf16.msra.mxu0 %v5916_v28  ;;  %5172 = vmatpush3.bf16.msra.mxu1 %v5918_v12  ;;  %v1519_v28 = vmul.bf16 1069105081, %v7039_v4  ;;  %v5932_v12 = vld [vmem:[#allocation9 + $0x28] sm:$0xff]  }
 0x249   : > { %5061 = vmatprep.subr.bf16.mxu0 %v5919_v60  ;;  %5173 = vmatprep.subr.bf16.mxu1 %v5921_v39  ;;  %v6024_v31 = vpop.eup %6023  ;;  %v5935_v60 = vld [vmem:[#allocation9 + $0x70] sm:$0xff]  }
 0x24a   : > { %2783 = vmatmul.mubr.bf16.gmra.mrb[68].mxu0 %v1699_v56  ;;  %3169 = vmatmul.mubr.bf16.gmra.mrb[68].mxu1 %v1699_v56  ;;  %v5937_v39 = vld [vmem:[#allocation9 + $0xf0] sm:$0xff]   ;;  %v1648_v32 = vsub.bf16 %v6024_v31, %v6395_v21  ;;  %6031 = vpow.bf16 %v1519_v28  ;;  %v6026_v56 = vpop.eup %6025  ;;  %v1552_v31 = vmul.bf16 1069105081, %v7108_v25 }
 0x24b   : > { %2792 = vmatprep.mubr.bf16.mxu0 %v1704_v49  ;;  %3178 = vmatprep.mubr.bf16.mxu1 %v1704_v49  ;;  %v1531_v49 = vmul.bf16 1069105081, %v7063_v50  ;;  %v1647_v48 = vsub.bf16 %v6026_v56, %v6395_v21  ;;  %6033 = vpow.bf16 %v1516_v61  ;;  %v1576_v56 = vmul.bf16 1069105081, %v7156_v9 }
 0x24c   : > { %5062 = vmatpush3.bf16.msra.mxu0 %v5920_v10  ;;  %5174 = vmatpush3.bf16.msra.mxu1 %v5922_v35  ;;  %v5938_v10 = vld [vmem:[#allocation9 + $0xb0] sm:$0xff]   ;;  %v1707_v35 = vsel %vm1387_vm10, %v6964_v29, %v1643_v53  ;;  %vm1419_vm10 = vcmp.gt.bf16.partialorder %v7156_v9, 0 }
 0x24d   : > { %5063 = vmatprep.subr.bf16.mxu0 %v5923_v3  ;;  %5175 = vmatprep.subr.bf16.mxu1 %v5925_v46  ;;  %v1712_v3 = vsel %vm1392_vm11, %v6991_v19, %v1648_v32  ;;  %v6028_v46 = vpop.eup %6027  ;;  %6035 = vpow.bf16 %v1531_v49  ;;  %v1711_v19 = vsel %vm1391_vm12, %v6988_v14, %v1647_v48  ;;  %vm1424_vm11 = vcmp.gt.bf16.partialorder %v7184_v8, 0 }
 0x24e   : > { %v1652_v29 = vsub.bf16 %v6028_v46, %v6395_v21  ;;  %v6030_v1 = vpop.eup %6029  ;;  %vm1423_vm12 = vcmp.gt.bf16.partialorder %v7181_v57, 0 }
 0x250   : > { %5064 = vmatpush3.bf16.msra.mxu0 %v5924_v23  ;;  %5176 = vmatpush3.bf16.msra.mxu1 %v5926_v59  ;;  %v1716_v17 = vsel %vm1396_vm13, %v7015_v20, %v1652_v29  ;;  %v1528_v59 = vmul.bf16 1069105081, %v7060_v44  ;;  %v1588_v29 = vmul.bf16 1069105081, %v7181_v57  ;;  %vm1428_vm13 = vcmp.gt.bf16.partialorder %v7200_v58, 0 }
 0x251   : > { %5065 = vmatprep.subr.bf16.mxu0 %v5927_v54  ;;  %5177 = vmatprep.subr.bf16.mxu1 %v5929_v15  ;;  %v1651_v54 = vsub.bf16 %v6030_v1, %v6395_v21 }
 0x252   : > { %2793 = vmatmul.mubr.bf16.gmra.mrb[72].mxu0 %v1703_v7  ;;  %3179 = vmatmul.mubr.bf16.gmra.mrb[72].mxu1 %v1703_v7  ;;  %6037 = vpow.bf16 %v1528_v59  ;;  %v1555_v7 = vmul.bf16 1069105081, %v7111_v27 }
 0x253   : > { %2802 = vmatprep.mubr.bf16.mxu0 %v1708_v5  ;;  %3188 = vmatprep.mubr.bf16.mxu1 %v1708_v5  ;;  %6039 = vpow.bf16 %v1543_v63  ;;  %v1715_v14 = vsel %vm1395_vm14, %v7012_v2, %v1651_v54  ;;  %v1600_v63 = vmul.bf16 1069105081, %v7197_v52  ;;  %v1615_v54 = vmul.bf16 1069105081, %v7218_v34 }
 0x254   : > { %5066 = vmatpush3.bf16.msra.mxu0 %v5928_v24  ;;  %5178 = vmatpush3.bf16.msra.mxu1 %v5930_v26  ;;  %v1540_v26 = vmul.bf16 1069105081, %v7084_v40  ;;  %vm1427_vm14 = vcmp.gt.bf16.partialorder %v7197_v52, 0 }
 0x255   : > { %5067 = vmatprep.subr.bf16.mxu0 %v5931_v6  ;;  %5179 = vmatprep.subr.bf16.mxu1 %v5933_v18  ;;  %v6032_v23 = vpop.eup %6031 }
 0x256   : > { %v1656_v15 = vsub.bf16 %v6032_v23, %v6395_v21  ;;  %v6034_v20 = vpop.eup %6033  ;;  %6041 = vpow.bf16 %v1540_v26  ;;  %v1627_v26 = vmul.bf16 1069105081, %v7234_v38 }
 0x257   : > { %v1655_v6 = vsub.bf16 %v6034_v20, %v6395_v21  ;;  %6043 = vpow.bf16 %v1555_v7 }
 0x258   : > { %5068 = vmatpush3.bf16.msra.mxu0 %v5932_v12  ;;  %5180 = vmatpush3.bf16.msra.mxu1 %v5934_v41  ;;  %v1720_v51 = vsel %vm1400_vm15, %v7039_v4, %v1656_v15  ;;  %v6036_v24 = vpop.eup %6035  ;;  %6045 = vpow.bf16 %v1552_v31  ;;  %vm1432_vm15 = vcmp.gt.bf16.partialorder %v7218_v34, 0 }
 0x259   : > { %5069 = vmatprep.subr.bf16.mxu0 %v5935_v60  ;;  %5181 = vmatprep.subr.bf16.mxu1 %v5937_v39  ;;  %v1660_v18 = vsub.bf16 %v6036_v24, %v6395_v21  ;;  %v1719_v2 = vsel %vm1399_vm0, %v7036_v62, %v1655_v6  ;;  %6047 = vpow.bf16 %v1567_v36  ;;  %v1564_v60 = vmul.bf16 1069105081, %v7132_v11 }
 0x25a   : > { %2803 = vmatmul.mubr.bf16.gmra.mrb[76].mxu0 %v1707_v35  ;;  %3189 = vmatmul.mubr.bf16.gmra.mrb[76].mxu1 %v1707_v35  ;;  %v1579_v39 = vmul.bf16 1069105081, %v7159_v16  ;;  %v1612_v24 = vmul.bf16 1069105081, %v7215_v33  ;;  %vm1431_vm0 = vcmp.gt.bf16.partialorder %v7215_v33, 0 }
 0x25b   : > { %2812 = vmatprep.mubr.bf16.mxu0 %v1712_v3  ;;  %3198 = vmatprep.mubr.bf16.mxu1 %v1712_v3  ;;  %v1724_v30 = vsel %vm1404_vm1, %v7063_v50, %v1660_v18  ;;  %6049 = vpow.bf16 %v1564_v60  ;;  %v1591_v3 = vmul.bf16 1069105081, %v7184_v8  ;;  %vm1436_vm1 = vcmp.gt.bf16.partialorder %v7234_v38, 0 }
 0x25c   : > { %5070 = vmatpush3.bf16.msra.mxu0 %v5936_v0  ;;  %5182 = vmatpush3.bf16.msra.mxu1 %v5938_v10  ;;  %6051 = vpow.bf16 %v1579_v39 }
 0x25d   : > { %v6038_v4 = vpop.eup %6037  ;;  %6053 = vpow.bf16 %v1576_v56 }
 0x25e   : > { %v6040_v5 = vpop.eup %6039  ;;  %v1659_v28 = vsub.bf16 %v6038_v4, %v6395_v21  ;;  %6055 = vpow.bf16 %v1591_v3 }
 0x25f   : > { %v1664_v12 = vsub.bf16 %v6040_v5, %v6395_v21  ;;  %6057 = vpow.bf16 %v1588_v29 }
 0x260   : > { %v1723_v62 = vsel %vm1403_vm2, %v7060_v44, %v1659_v28  ;;  %v5942_v28 = vld [vmem:[#allocation9 + $0xb8] sm:$0xff]   ;;  %vm1435_vm2 = vcmp.gt.bf16.partialorder %v7231_v47, 0 }
 0x261   : > { %v6042_v50 = vpop.eup %6041  ;;  %v1728_v41 = vsel %vm1408_vm3, %v7087_v37, %v1664_v12 }
 0x262   : > { %2813 = vmatmul.mubr.bf16.gmra.mrb[80].mxu0 %v1711_v19  ;;  %3199 = vmatmul.mubr.bf16.gmra.mrb[80].mxu1 %v1711_v19  ;;  %v6044_v53 = vpop.eup %6043  ;;  %v1663_v32 = vsub.bf16 %v6042_v50, %v6395_v21  ;;  %v1603_v19 = vmul.bf16 1069105081, %v7200_v58 }
 0x263   : > { %2822 = vmatprep.mubr.bf16.mxu0 %v1716_v17  ;;  %3208 = vmatprep.mubr.bf16.mxu1 %v1716_v17  ;;  %v1668_v0 = vsub.bf16 %v6044_v53, %v6395_v21  ;;  %v6046_v37 = vpop.eup %6045 }
 0x264   : > { %v1727_v44 = vsel %vm1407_vm4, %v7084_v40, %v1663_v32  ;;  %v6048_v35 = vpop.eup %6047  ;;  %v1667_v46 = vsub.bf16 %v6046_v37, %v6395_v21  ;;  %6059 = vpow.bf16 %v1603_v19 }
 0x265   : > { %v1732_v10 = vsel %vm1412_vm5, %v7111_v27, %v1668_v0  ;;  %v1672_v61 = vsub.bf16 %v6048_v35, %v6395_v21  ;;  %6061 = vpow.bf16 %v1600_v63  ;;  %v1885_v0 = vld [vmem:[%s8029_s4] sm:$0xf] }
 0x266   : > { %v1731_v40 = vsel %vm1411_vm6, %v7108_v25, %v1667_v46  ;;  %v6050_v27 = vpop.eup %6049  ;;  %6063 = vpow.bf16 %v1615_v54 }
 0x267   : > { %v1736_v49 = vsel %vm1416_vm7, %v7135_v55, %v1672_v61  ;;  %v6052_v48 = vpop.eup %6051  ;;  %v1671_v1 = vsub.bf16 %v6050_v27, %v6395_v21  ;;  %6065 = vpow.bf16 %v1612_v24 }
 0x268   : > { %v1676_v17 = vsub.bf16 %v6052_v48, %v6395_v21  ;;  %v6054_v55 = vpop.eup %6053  ;;  %6067 = vpow.bf16 %v1627_v26 }
 0x269   : > { %v1735_v25 = vsel %vm1415_vm8, %v7132_v11, %v1671_v1  ;;  %v6056_v59 = vpop.eup %6055  ;;  %v1675_v15 = vsub.bf16 %v6054_v55, %v6395_v21 }
 0x26a   : > { %2823 = vmatmul.mubr.bf16.gmra.mrb[84].mxu0 %v1715_v14  ;;  %3209 = vmatmul.mubr.bf16.gmra.mrb[84].mxu1 %v1715_v14  ;;  %v1740_v23 = vsel %vm1420_vm9, %v7159_v16, %v1676_v17  ;;  %v1680_v14 = vsub.bf16 %v6056_v59, %v6395_v21  ;;  %v6058_v16 = vpop.eup %6057 }
 0x26b   : > { %2832 = vmatprep.mubr.bf16.mxu0 %v1720_v51  ;;  %3218 = vmatprep.mubr.bf16.mxu1 %v1720_v51  ;;  %v1739_v11 = vsel %vm1419_vm10, %v7156_v9, %v1675_v15  ;;  %v1679_v7 = vsub.bf16 %v6058_v16, %v6395_v21 }
 0x26c   : > { %v1744_v20 = vsel %vm1424_vm11, %v7184_v8, %v1680_v14  ;;  %v5939_v8 = vld [vmem:[#allocation9 + $0x78] sm:$0xff]  }
 0x26d   : > { %v1743_v9 = vsel %vm1423_vm12, %v7181_v57, %v1679_v7  ;;  %5071 = vmatprep.subr.bf16.mxu0 %v5939_v8  ;;  %v5940_v57 = vld [vmem:[#allocation9 + $0x38] sm:$0xff]  }
 0x26e   : > { %5072 = vmatpush3.bf16.msra.mxu0 %v5940_v57 }
 0x26f   : > { %v6060_v51 = vpop.eup %6059 }
 0x270   : > { %v1684_v6 = vsub.bf16 %v6060_v51, %v6395_v21  ;;  %v6062_v18 = vpop.eup %6061 }
 0x271   : > { %v6064_v4 = vpop.eup %6063  ;;  %v1683_v5 = vsub.bf16 %v6062_v18, %v6395_v21 }
 0x272   : > { %2833 = vmatmul.mubr.bf16.gmra.mrb[88].mxu0 %v1719_v2  ;;  %3219 = vmatmul.mubr.bf16.gmra.mrb[88].mxu1 %v1719_v2  ;;  %v1748_v2 = vsel %vm1428_vm13, %v7200_v58, %v1684_v6  ;;  %v1688_v31 = vsub.bf16 %v6064_v4, %v6395_v21  ;;  %v5941_v58 = vld [vmem:[#allocation9 + $0xf8] sm:$0xff]   ;;  %v6066_v12 = vpop.eup %6065 }
 0x273   : > { %2842 = vmatprep.mubr.bf16.mxu0 %v1724_v30  ;;  %3228 = vmatprep.mubr.bf16.mxu1 %v1724_v30  ;;  %v1624_v30 = vmul.bf16 1069105081, %v7231_v47  ;;  %v1747_v36 = vsel %vm1427_vm14, %v7197_v52, %v1683_v5  ;;  %v6068_v50 = vpop.eup %6067 }
 0x274   : > { %5183 = vmatprep.subr.bf16.mxu1 %v5941_v58  ;;  %v1692_v53 = vsub.bf16 %v6068_v50, %v6395_v21 }
 0x275   : > { %6069 = vpow.bf16 %v1624_v30  ;;  %5184 = vmatpush3.bf16.msra.mxu1 %v5942_v28 }
 0x27a   : > { %2843 = vmatmul.mubr.bf16.gmra.mrb[92].mxu0 %v1723_v62  ;;  %3229 = vmatmul.mubr.bf16.gmra.mrb[92].mxu1 %v1723_v62  ;;  %v1752_v62 = vsel %vm1432_vm15, %v7218_v34, %v1688_v31  ;;  %v1756_v34 = vsel %vm1436_vm1, %v7234_v38, %v1692_v53  ;;  %v7358_v38 = vrot.slane %v1885_v0, %v532_v13 }
 0x27b   : > { %2852 = vmatprep.mubr.bf16.mxu0 %v1728_v41  ;;  %3238 = vmatprep.mubr.bf16.mxu1 %v1728_v41  ;;  %v1687_v41 = vsub.bf16 %v6066_v12, %v6395_v21 }
 0x27d   : > { %v1751_v52 = vsel %vm1431_vm0, %v7215_v33, %v1687_v41  ;;  %v7354_v33 = vrot.slane %v1885_v0, %v524_v43 }
 0x280   : > { %v6070_v60 = vpop.eup %6069 }
 0x281   : > { %v1691_v39 = vsub.bf16 %v6070_v60, %v6395_v21 }
 0x282   : > { %2853 = vmatmul.mubr.bf16.gmra.mrb[96].mxu0 %v1727_v44  ;;  %3239 = vmatmul.mubr.bf16.gmra.mrb[96].mxu1 %v1727_v44 }
 0x283   : > { %2862 = vmatprep.mubr.bf16.mxu0 %v1732_v10  ;;  %3248 = vmatprep.mubr.bf16.mxu1 %v1732_v10  ;;  %v1755_v32 = vsel %vm1435_vm2, %v7231_v47, %v1691_v39  ;;  %v7362_v10 = vrot.slane %v1885_v0, %v528_v45  ;;  %v7366_v47 = vrot.slane %v1885_v0, %v536_v22 }
 0x28a   : > { %2863 = vmatmul.mubr.bf16.gmra.mrb[100].mxu0 %v1731_v40  ;;  %3249 = vmatmul.mubr.bf16.gmra.mrb[100].mxu1 %v1731_v40 }
 0x28b   : > { %2872 = vmatprep.mubr.bf16.mxu0 %v1736_v49  ;;  %3258 = vmatprep.mubr.bf16.mxu1 %v1736_v49 }
 0x292   : > { %2873 = vmatmul.mubr.bf16.gmra.mrb[104].mxu0 %v1735_v25  ;;  %3259 = vmatmul.mubr.bf16.gmra.mrb[104].mxu1 %v1735_v25 }
 0x293   : > { %2882 = vmatprep.mubr.bf16.mxu0 %v1740_v23  ;;  %3268 = vmatprep.mubr.bf16.mxu1 %v1740_v23 }
 0x29a   : > { %2883 = vmatmul.mubr.bf16.gmra.mrb[108].mxu0 %v1739_v11  ;;  %3269 = vmatmul.mubr.bf16.gmra.mrb[108].mxu1 %v1739_v11 }
 0x29b   : > { %2892 = vmatprep.mubr.bf16.mxu0 %v1744_v20  ;;  %3278 = vmatprep.mubr.bf16.mxu1 %v1744_v20 }
 0x2a2   : > { %2893 = vmatmul.mubr.bf16.gmra.mrb[112].mxu0 %v1743_v9  ;;  %3279 = vmatmul.mubr.bf16.gmra.mrb[112].mxu1 %v1743_v9 }
 0x2a3   : > { %2902 = vmatprep.mubr.bf16.mxu0 %v1748_v2  ;;  %3288 = vmatprep.mubr.bf16.mxu1 %v1748_v2 }
 0x2aa   : > { %2903 = vmatmul.mubr.bf16.gmra.mrb[116].mxu0 %v1747_v36  ;;  %3289 = vmatmul.mubr.bf16.gmra.mrb[116].mxu1 %v1747_v36 }
 0x2ab   : > { %2912 = vmatprep.mubr.bf16.mxu0 %v1752_v62  ;;  %3298 = vmatprep.mubr.bf16.mxu1 %v1752_v62 }
 0x2b2   : > { %2913 = vmatmul.mubr.bf16.gmra.mrb[120].mxu0 %v1751_v52  ;;  %3299 = vmatmul.mubr.bf16.gmra.mrb[120].mxu1 %v1751_v52 }
 0x2b3   : > { %2922 = vmatprep.mubr.bf16.mxu0 %v1756_v34  ;;  %3308 = vmatprep.mubr.bf16.mxu1 %v1756_v34 }
 0x2ba   : > { %2923 = vmatmul.mubr.bf16.gmra.mrb[124].mxu0 %v1755_v32  ;;  %3309 = vmatmul.mubr.bf16.gmra.mrb[124].mxu1 %v1755_v32 }
 0x315   : > { %v2774_v44 = vpop.f32.mrb[64].mxu0  ;;  %v3160_v37 = vpop.f32.mrb[64].mxu1 }
 0x316   : > { %v2776_v35 = vpop.f32.mrb[65].mxu0  ;;  %v3162_v56 = vpop.f32.mrb[65].mxu1  ;;  %v5281_v43 = vadd.f32 %v2774_v44, %v7354_v33  ;;  %v5345_v61 = vadd.f32 %v3160_v37, %v7358_v38 }
 0x317   : > { %v2778_v3 = vpop.f32.mrb[66].mxu0  ;;  %v3164_v46 = vpop.f32.mrb[66].mxu1  ;;  %v5282_v45 = vadd.f32 %v2776_v35, %v7362_v10  ;;  %v5346_v42 = vadd.f32 %v3162_v56, %v7366_v47 }
 0x318   : > { %v5283_v13 = vadd.f32 %v2778_v3, %v7354_v33  ;;  %v5347_v40 = vadd.f32 %v3164_v46, %v7358_v38  ;;  %v2780_v27 = vpop.f32.mrb[67].mxu0  ;;  %v3166_v49 = vpop.f32.mrb[67].mxu1 }
 0x319   : > { %v5284_v22 = vadd.f32 %v2780_v27, %v7362_v10  ;;  %v5348_v48 = vadd.f32 %v3166_v49, %v7366_v47 }
 0x31a   : > { %v7376_v29 = vpack.c.bf16 %v5283_v13, %v5281_v43  ;;  %v7378_v19 = vpack.c.bf16 %v5347_v40, %v5345_v61 }
 0x31b   : > { %v7380_v1 = vpack.c.bf16 %v5284_v22, %v5282_v45  ;;  %v7382_v17 = vpack.c.bf16 %v5348_v48, %v5346_v42 }
 0x31c   : > { %v3448_v25 = vmul.bf16 1069105081, %v7376_v29  ;;  %v3454_v55 = vmul.bf16 1069105081, %v7378_v19  ;;  %vm3383_vm3 = vcmp.gt.bf16.partialorder %v7376_v29, 0  ;;  %vm3385_vm4 = vcmp.gt.bf16.partialorder %v7378_v19, 0 }
 0x31d   : > { %v3451_v23 = vmul.bf16 1069105081, %v7380_v1  ;;  %v3457_v59 = vmul.bf16 1069105081, %v7382_v17  ;;  %v2784_v63 = vpop.f32.mrb[68].mxu0  ;;  %v3170_v54 = vpop.f32.mrb[68].mxu1 }
 0x31e   : > { %6071 = vpow.bf16 %v3448_v25  ;;  %v2786_v15 = vpop.f32.mrb[69].mxu0  ;;  %v3172_v14 = vpop.f32.mrb[69].mxu1  ;;  %v5285_v11 = vadd.f32 %v2784_v63, %v7354_v33  ;;  %v5349_v16 = vadd.f32 %v3170_v54, %v7358_v38  ;;  %vm3384_vm5 = vcmp.gt.bf16.partialorder %v7380_v1, 0 }
 0x31f   : > { %6073 = vpow.bf16 %v3454_v55  ;;  %v2788_v20 = vpop.f32.mrb[70].mxu0  ;;  %v3174_v51 = vpop.f32.mrb[70].mxu1  ;;  %v5286_v24 = vadd.f32 %v2786_v15, %v7362_v10  ;;  %v5350_v8 = vadd.f32 %v3172_v14, %v7366_v47  ;;  %vm3386_vm6 = vcmp.gt.bf16.partialorder %v7382_v17, 0 }
 0x320   : > { %6075 = vpow.bf16 %v3451_v23  ;;  %v5287_v26 = vadd.f32 %v2788_v20, %v7354_v33  ;;  %v5351_v7 = vadd.f32 %v3174_v51, %v7358_v38  ;;  %v2790_v6 = vpop.f32.mrb[71].mxu0  ;;  %v3176_v9 = vpop.f32.mrb[71].mxu1 }
 0x321   : > { %6077 = vpow.bf16 %v3457_v59  ;;  %v5288_v18 = vadd.f32 %v2790_v6, %v7362_v10  ;;  %v5352_v2 = vadd.f32 %v3176_v9, %v7366_v47 }
 0x322   : > { %v7396_v4 = vpack.c.bf16 %v5287_v26, %v5285_v11  ;;  %v7398_v30 = vpack.c.bf16 %v5351_v7, %v5349_v16 }
 0x323   : > { %v7400_v5 = vpack.c.bf16 %v5288_v18, %v5286_v24  ;;  %v7402_v31 = vpack.c.bf16 %v5352_v2, %v5350_v8 }
 0x324   : > { %v3460_v57 = vmul.bf16 1069105081, %v7396_v4  ;;  %v3466_v36 = vmul.bf16 1069105081, %v7398_v30  ;;  %vm3387_vm7 = vcmp.gt.bf16.partialorder %v7396_v4, 0  ;;  %vm3389_vm8 = vcmp.gt.bf16.partialorder %v7398_v30, 0 }
 0x325   : > { %v3463_v58 = vmul.bf16 1069105081, %v7400_v5  ;;  %v3469_v28 = vmul.bf16 1069105081, %v7402_v31  ;;  %v2794_v12 = vpop.f32.mrb[72].mxu0  ;;  %v3180_v62 = vpop.f32.mrb[72].mxu1 }
 0x326   : > { %6079 = vpow.bf16 %v3460_v57  ;;  %v2796_v50 = vpop.f32.mrb[73].mxu0  ;;  %v3182_v41 = vpop.f32.mrb[73].mxu1  ;;  %v5289_v53 = vadd.f32 %v2794_v12, %v7354_v33  ;;  %v5353_v52 = vadd.f32 %v3180_v62, %v7358_v38  ;;  %vm3388_vm9 = vcmp.gt.bf16.partialorder %v7400_v5, 0 }
 0x327   : > { %6081 = vpow.bf16 %v3466_v36  ;;  %v2798_v60 = vpop.f32.mrb[74].mxu0  ;;  %v3184_v34 = vpop.f32.mrb[74].mxu1  ;;  %v5290_v39 = vadd.f32 %v2796_v50, %v7362_v10  ;;  %v5354_v56 = vadd.f32 %v3182_v41, %v7366_v47  ;;  %vm3390_vm10 = vcmp.gt.bf16.partialorder %v7402_v31, 0 }
 0x328   : > { %6083 = vpow.bf16 %v3463_v58  ;;  %v5291_v32 = vadd.f32 %v2798_v60, %v7354_v33  ;;  %v5355_v0 = vadd.f32 %v3184_v34, %v7358_v38  ;;  %v2800_v44 = vpop.f32.mrb[75].mxu0  ;;  %v3186_v37 = vpop.f32.mrb[75].mxu1 }
 0x329   : > { %v6072_v35 = vpop.eup %6071  ;;  %6085 = vpow.bf16 %v3469_v28  ;;  %v5292_v3 = vadd.f32 %v2800_v44, %v7362_v10  ;;  %v5356_v46 = vadd.f32 %v3186_v37, %v7366_v47 }
 0x32a   : > { %v6074_v43 = vpop.eup %6073  ;;  %v7418_v61 = vpack.c.bf16 %v5291_v32, %v5289_v53  ;;  %v7420_v13 = vpack.c.bf16 %v5355_v0, %v5353_v52  ;;  %v3639_v40 = vsub.bf16 %v6072_v35, %v6395_v21 }
 0x32b   : > { %v6076_v27 = vpop.eup %6075  ;;  %v7423_v49 = vpack.c.bf16 %v5292_v3, %v5290_v39  ;;  %v7425_v45 = vpack.c.bf16 %v5356_v46, %v5354_v56  ;;  %v3641_v42 = vsub.bf16 %v6074_v43, %v6395_v21 }
 0x32c   : > { %v6078_v22 = vpop.eup %6077  ;;  %v3472_v48 = vmul.bf16 1069105081, %v7418_v61  ;;  %v3478_v25 = vmul.bf16 1069105081, %v7420_v13  ;;  %v3640_v55 = vsub.bf16 %v6076_v27, %v6395_v21  ;;  %v3703_v20 = vsel %vm3383_vm3, %v7376_v29, %v3639_v40 }
 0x32d   : > { %v3475_v23 = vmul.bf16 1069105081, %v7423_v49  ;;  %v3481_v59 = vmul.bf16 1069105081, %v7425_v45  ;;  %v2804_v63 = vpop.f32.mrb[76].mxu0  ;;  %v3190_v54 = vpop.f32.mrb[76].mxu1  ;;  %v3642_v15 = vsub.bf16 %v6078_v22, %v6395_v21  ;;  %v3705_v51 = vsel %vm3385_vm4, %v7378_v19, %v3641_v42 }
 0x32e   : > { %6087 = vpow.bf16 %v3472_v48  ;;  %v2806_v14 = vpop.f32.mrb[77].mxu0  ;;  %v3192_v11 = vpop.f32.mrb[77].mxu1  ;;  %v3704_v16 = vsel %vm3384_vm5, %v7380_v1, %v3640_v55  ;;  %v5293_v24 = vadd.f32 %v2804_v63, %v7354_v33  ;;  %v5357_v26 = vadd.f32 %v3190_v54, %v7358_v38 }
 0x32f   : > { %6089 = vpow.bf16 %v3478_v25  ;;  %4062 = vmatprep.mubr.bf16.mxu0 %v3704_v16  ;;  %v3706_v7 = vsel %vm3386_vm6, %v7382_v17, %v3642_v15  ;;  %v2808_v6 = vpop.f32.mrb[78].mxu0  ;;  %v3194_v1 = vpop.f32.mrb[78].mxu1  ;;  %v5294_v9 = vadd.f32 %v2806_v14, %v7362_v10  ;;  %v5358_v57 = vadd.f32 %v3192_v11, %v7366_v47 }
 0x330   : > { %6091 = vpow.bf16 %v3475_v23  ;;  %4223 = vmatprep.mubr.bf16.mxu1 %v3706_v7  ;;  %v5295_v29 = vadd.f32 %v2808_v6, %v7354_v33  ;;  %v5359_v19 = vadd.f32 %v3194_v1, %v7358_v38  ;;  %4063 = vmatmul.mubr.bf16.vlgmr.msra.gmra.mrb[128].mxu0 %v3703_v20  ;;  %v2810_v8 = vpop.f32.mrb[79].mxu0  ;;  %v3196_v18 = vpop.f32.mrb[79].mxu1  ;;  %vm3392_vm11 = vcmp.gt.bf16.partialorder %v7423_v49, 0 }
 0x331   : > { %v6080_v2 = vpop.eup %6079  ;;  %6093 = vpow.bf16 %v3481_v59  ;;  %4224 = vmatmul.mubr.bf16.vlgmr.msra.gmra.mrb[128].mxu1 %v3705_v51  ;;  %v5296_v17 = vadd.f32 %v2810_v8, %v7362_v10  ;;  %v5360_v36 = vadd.f32 %v3196_v18, %v7366_v47  ;;  %vm3394_vm12 = vcmp.gt.bf16.partialorder %v7425_v45, 0 }
 0x332   : > { %v6082_v58 = vpop.eup %6081  ;;  %v7457_v28 = vpack.c.bf16 %v5295_v29, %v5293_v24  ;;  %v7459_v12 = vpack.c.bf16 %v5359_v19, %v5357_v26  ;;  %v3643_v62 = vsub.bf16 %v6080_v2, %v6395_v21  ;;  %vm3391_vm13 = vcmp.gt.bf16.partialorder %v7418_v61, 0 }
 0x333   : > { %v6084_v50 = vpop.eup %6083  ;;  %v7463_v41 = vpack.c.bf16 %v5296_v17, %v5294_v9  ;;  %v7465_v53 = vpack.c.bf16 %v5360_v36, %v5358_v57  ;;  %v3645_v52 = vsub.bf16 %v6082_v58, %v6395_v21  ;;  %vm3393_vm14 = vcmp.gt.bf16.partialorder %v7420_v13, 0 }
 0x334   : > { %v6086_v60 = vpop.eup %6085  ;;  %v3484_v34 = vmul.bf16 1069105081, %v7457_v28  ;;  %v3490_v39 = vmul.bf16 1069105081, %v7459_v12  ;;  %v3644_v32 = vsub.bf16 %v6084_v50, %v6395_v21  ;;  %v3707_v40 = vsel %vm3387_vm7, %v7396_v4, %v3643_v62 }
 0x335   : > { %v3487_v0 = vmul.bf16 1069105081, %v7463_v41  ;;  %v3493_v44 = vmul.bf16 1069105081, %v7465_v53  ;;  %v2814_v37 = vpop.f32.mrb[80].mxu0  ;;  %v3200_v35 = vpop.f32.mrb[80].mxu1  ;;  %v3646_v56 = vsub.bf16 %v6086_v60, %v6395_v21  ;;  %v3709_v27 = vsel %vm3389_vm8, %v7398_v30, %v3645_v52 }
 0x336   : > { %6095 = vpow.bf16 %v3484_v34  ;;  %v2816_v3 = vpop.f32.mrb[81].mxu0  ;;  %v3202_v46 = vpop.f32.mrb[81].mxu1  ;;  %v3708_v43 = vsel %vm3388_vm9, %v7400_v5, %v3644_v32  ;;  %v5297_v42 = vadd.f32 %v2814_v37, %v7354_v33  ;;  %v5361_v22 = vadd.f32 %v3200_v35, %v7358_v38 }
 0x337   : > { %6097 = vpow.bf16 %v3490_v39  ;;  %4070 = vmatprep.mubr.bf16.mxu0 %v3708_v43  ;;  %v3710_v48 = vsel %vm3390_vm10, %v7402_v31, %v3646_v56  ;;  %v2818_v25 = vpop.f32.mrb[82].mxu0  ;;  %v3204_v5 = vpop.f32.mrb[82].mxu1  ;;  %v5298_v55 = vadd.f32 %v2816_v3, %v7362_v10  ;;  %v5362_v54 = vadd.f32 %v3202_v46, %v7366_v47 }
 0x338   : > { %6099 = vpow.bf16 %v3487_v0  ;;  %4231 = vmatprep.mubr.bf16.mxu1 %v3710_v48  ;;  %v5299_v4 = vadd.f32 %v2818_v25, %v7354_v33  ;;  %v5363_v30 = vadd.f32 %v3204_v5, %v7358_v38  ;;  %4071 = vmatmul.mubr.bf16.gmra.mrb[132].mxu0 %v3707_v40  ;;  %v2820_v23 = vpop.f32.mrb[83].mxu0  ;;  %v3206_v59 = vpop.f32.mrb[83].mxu1  ;;  %vm3396_vm15 = vcmp.gt.bf16.partialorder %v7463_v41, 0 }
 0x339   : > { %v6088_v63 = vpop.eup %6087  ;;  %6101 = vpow.bf16 %v3493_v44  ;;  %4232 = vmatmul.mubr.bf16.gmra.mrb[132].mxu1 %v3709_v27  ;;  %v5300_v31 = vadd.f32 %v2820_v23, %v7362_v10  ;;  %v5364_v15 = vadd.f32 %v3206_v59, %v7366_v47  ;;  %vm3398_vm0 = vcmp.gt.bf16.partialorder %v7465_v53, 0 }
 0x33a   : > { %v6090_v14 = vpop.eup %6089  ;;  %v7497_v11 = vpack.c.bf16 %v5299_v4, %v5297_v42  ;;  %v7499_v16 = vpack.c.bf16 %v5363_v30, %v5361_v22  ;;  %v3647_v20 = vsub.bf16 %v6088_v63, %v6395_v21  ;;  %vm3395_vm1 = vcmp.gt.bf16.partialorder %v7457_v28, 0 }
 0x33b   : > { %v6092_v51 = vpop.eup %6091  ;;  %v7503_v24 = vpack.c.bf16 %v5300_v31, %v5298_v55  ;;  %v7505_v26 = vpack.c.bf16 %v5364_v15, %v5362_v54  ;;  %v3649_v7 = vsub.bf16 %v6090_v14, %v6395_v21  ;;  %vm3397_vm2 = vcmp.gt.bf16.partialorder %v7459_v12, 0 }
 0x33c   : > { %v6094_v6 = vpop.eup %6093  ;;  %v3496_v1 = vmul.bf16 1069105081, %v7497_v11  ;;  %v3502_v9 = vmul.bf16 1069105081, %v7499_v16  ;;  %v3648_v29 = vsub.bf16 %v6092_v51, %v6395_v21  ;;  %v3711_v62 = vsel %vm3391_vm13, %v7418_v61, %v3647_v20 }
 0x33d   : > { %v3499_v19 = vmul.bf16 1069105081, %v7503_v24  ;;  %v3505_v8 = vmul.bf16 1069105081, %v7505_v26  ;;  %v2824_v18 = vpop.f32.mrb[84].mxu0  ;;  %v3210_v2 = vpop.f32.mrb[84].mxu1  ;;  %v3650_v57 = vsub.bf16 %v6094_v6, %v6395_v21  ;;  %v3713_v50 = vsel %vm3393_vm14, %v7420_v13, %v3649_v7 }
 0x33e   : > { %6103 = vpow.bf16 %v3496_v1  ;;  %v2826_v17 = vpop.f32.mrb[85].mxu0  ;;  %v3212_v36 = vpop.f32.mrb[85].mxu1  ;;  %v3712_v58 = vsel %vm3392_vm11, %v7423_v49, %v3648_v29  ;;  %v5301_v52 = vadd.f32 %v2824_v18, %v7354_v33  ;;  %v5365_v60 = vadd.f32 %v3210_v2, %v7358_v38 }
 0x33f   : > { %6105 = vpow.bf16 %v3502_v9  ;;  %4078 = vmatprep.mubr.bf16.mxu0 %v3712_v58  ;;  %v3714_v34 = vsel %vm3394_vm12, %v7425_v45, %v3650_v57  ;;  %v2828_v39 = vpop.f32.mrb[86].mxu0  ;;  %v3214_v32 = vpop.f32.mrb[86].mxu1  ;;  %v5302_v49 = vadd.f32 %v2826_v17, %v7362_v10  ;;  %v5366_v35 = vadd.f32 %v3212_v36, %v7366_v47 }
 0x340   : > { %6107 = vpow.bf16 %v3499_v19  ;;  %4239 = vmatprep.mubr.bf16.mxu1 %v3714_v34  ;;  %v5303_v61 = vadd.f32 %v2828_v39, %v7354_v33  ;;  %v5367_v13 = vadd.f32 %v3214_v32, %v7358_v38  ;;  %4079 = vmatmul.mubr.bf16.gmra.mrb[136].mxu0 %v3711_v62  ;;  %v2830_v0 = vpop.f32.mrb[87].mxu0  ;;  %v3216_v44 = vpop.f32.mrb[87].mxu1  ;;  %vm3400_vm3 = vcmp.gt.bf16.partialorder %v7503_v24, 0 }
 0x341   : > { %v6096_v37 = vpop.eup %6095  ;;  %6109 = vpow.bf16 %v3505_v8  ;;  %4240 = vmatmul.mubr.bf16.gmra.mrb[136].mxu1 %v3713_v50  ;;  %v5304_v45 = vadd.f32 %v2830_v0, %v7362_v10  ;;  %v5368_v56 = vadd.f32 %v3216_v44, %v7366_v47  ;;  %vm3402_vm4 = vcmp.gt.bf16.partialorder %v7505_v26, 0 }
 0x342   : > { %v6098_v3 = vpop.eup %6097  ;;  %v7535_v46 = vpack.c.bf16 %v5303_v61, %v5301_v52  ;;  %v7537_v43 = vpack.c.bf16 %v5367_v13, %v5365_v60  ;;  %v3651_v40 = vsub.bf16 %v6096_v37, %v6395_v21  ;;  %vm3399_vm5 = vcmp.gt.bf16.partialorder %v7497_v11, 0 }
 0x343   : > { %v6100_v27 = vpop.eup %6099  ;;  %v7541_v42 = vpack.c.bf16 %v5304_v45, %v5302_v49  ;;  %v7543_v22 = vpack.c.bf16 %v5368_v56, %v5366_v35  ;;  %v3653_v48 = vsub.bf16 %v6098_v3, %v6395_v21  ;;  %vm3401_vm6 = vcmp.gt.bf16.partialorder %v7499_v16, 0 }
 0x344   : > { %v6102_v25 = vpop.eup %6101  ;;  %v3508_v5 = vmul.bf16 1069105081, %v7535_v46  ;;  %v3514_v55 = vmul.bf16 1069105081, %v7537_v43  ;;  %v3652_v4 = vsub.bf16 %v6100_v27, %v6395_v21  ;;  %v3715_v20 = vsel %vm3395_vm1, %v7457_v28, %v3651_v40 }
 0x345   : > { %v3511_v30 = vmul.bf16 1069105081, %v7541_v42  ;;  %v3517_v23 = vmul.bf16 1069105081, %v7543_v22  ;;  %v2834_v59 = vpop.f32.mrb[88].mxu0  ;;  %v3220_v63 = vpop.f32.mrb[88].mxu1  ;;  %v3654_v54 = vsub.bf16 %v6102_v25, %v6395_v21  ;;  %v3717_v51 = vsel %vm3397_vm2, %v7459_v12, %v3653_v48 }
 0x346   : > { %6111 = vpow.bf16 %v3508_v5  ;;  %v2836_v31 = vpop.f32.mrb[89].mxu0  ;;  %v3222_v15 = vpop.f32.mrb[89].mxu1  ;;  %v3716_v14 = vsel %vm3396_vm15, %v7463_v41, %v3652_v4  ;;  %v5305_v7 = vadd.f32 %v2834_v59, %v7354_v33  ;;  %v5369_v6 = vadd.f32 %v3220_v63, %v7358_v38 }
 0x347   : > { %6113 = vpow.bf16 %v3514_v55  ;;  %4086 = vmatprep.mubr.bf16.mxu0 %v3716_v14  ;;  %v3718_v1 = vsel %vm3398_vm0, %v7465_v53, %v3654_v54  ;;  %v2838_v9 = vpop.f32.mrb[90].mxu0  ;;  %v3224_v29 = vpop.f32.mrb[90].mxu1  ;;  %v5306_v41 = vadd.f32 %v2836_v31, %v7362_v10  ;;  %v5370_v2 = vadd.f32 %v3222_v15, %v7366_v47 }
 0x348   : > { %6115 = vpow.bf16 %v3511_v30  ;;  %4247 = vmatprep.mubr.bf16.mxu1 %v3718_v1  ;;  %v5307_v28 = vadd.f32 %v2838_v9, %v7354_v33  ;;  %v5371_v12 = vadd.f32 %v3224_v29, %v7358_v38  ;;  %4087 = vmatmul.mubr.bf16.gmra.mrb[140].mxu0 %v3715_v20  ;;  %v2840_v19 = vpop.f32.mrb[91].mxu0  ;;  %v3226_v8 = vpop.f32.mrb[91].mxu1  ;;  %vm3404_vm7 = vcmp.gt.bf16.partialorder %v7541_v42, 0 }
 0x349   : > { %v6104_v18 = vpop.eup %6103  ;;  %6117 = vpow.bf16 %v3517_v23  ;;  %4248 = vmatmul.mubr.bf16.gmra.mrb[140].mxu1 %v3717_v51  ;;  %v5308_v53 = vadd.f32 %v2840_v19, %v7362_v10  ;;  %v5372_v57 = vadd.f32 %v3226_v8, %v7366_v47  ;;  %vm3406_vm8 = vcmp.gt.bf16.partialorder %v7543_v22, 0 }
 0x34a   : > { %v6106_v17 = vpop.eup %6105  ;;  %v7573_v36 = vpack.c.bf16 %v5307_v28, %v5305_v7  ;;  %v7575_v58 = vpack.c.bf16 %v5371_v12, %v5369_v6  ;;  %v3655_v62 = vsub.bf16 %v6104_v18, %v6395_v21  ;;  %vm3403_vm9 = vcmp.gt.bf16.partialorder %v7535_v46, 0 }
 0x34b   : > { %v6108_v50 = vpop.eup %6107  ;;  %v7579_v52 = vpack.c.bf16 %v5308_v53, %v5306_v41  ;;  %v7581_v60 = vpack.c.bf16 %v5372_v57, %v5370_v2  ;;  %v3657_v34 = vsub.bf16 %v6106_v17, %v6395_v21  ;;  %vm3405_vm10 = vcmp.gt.bf16.partialorder %v7537_v43, 0 }
 0x34c   : > { %v6110_v39 = vpop.eup %6109  ;;  %v3520_v32 = vmul.bf16 1069105081, %v7573_v36  ;;  %v3526_v49 = vmul.bf16 1069105081, %v7575_v58  ;;  %v3656_v61 = vsub.bf16 %v6108_v50, %v6395_v21  ;;  %v3719_v40 = vsel %vm3399_vm5, %v7497_v11, %v3655_v62 }
 0x34d   : > { %v3523_v13 = vmul.bf16 1069105081, %v7579_v52  ;;  %v3529_v0 = vmul.bf16 1069105081, %v7581_v60  ;;  %v2844_v44 = vpop.f32.mrb[92].mxu0  ;;  %v3230_v37 = vpop.f32.mrb[92].mxu1  ;;  %v3658_v35 = vsub.bf16 %v6110_v39, %v6395_v21  ;;  %v3721_v27 = vsel %vm3401_vm6, %v7499_v16, %v3657_v34 }
 0x34e   : > { %6119 = vpow.bf16 %v3520_v32  ;;  %v2846_v45 = vpop.f32.mrb[93].mxu0  ;;  %v3232_v56 = vpop.f32.mrb[93].mxu1  ;;  %v3720_v3 = vsel %vm3400_vm3, %v7503_v24, %v3656_v61  ;;  %v5309_v48 = vadd.f32 %v2844_v44, %v7354_v33  ;;  %v5373_v25 = vadd.f32 %v3230_v37, %v7358_v38 }
 0x34f   : > { %6121 = vpow.bf16 %v3526_v49  ;;  %4094 = vmatprep.mubr.bf16.mxu0 %v3720_v3  ;;  %v3722_v5 = vsel %vm3402_vm4, %v7505_v26, %v3658_v35  ;;  %v2848_v55 = vpop.f32.mrb[94].mxu0  ;;  %v3234_v4 = vpop.f32.mrb[94].mxu1  ;;  %v5310_v24 = vadd.f32 %v2846_v45, %v7362_v10  ;;  %v5374_v63 = vadd.f32 %v3232_v56, %v7366_v47 }
 0x350   : > { %6123 = vpow.bf16 %v3523_v13  ;;  %4255 = vmatprep.mubr.bf16.mxu1 %v3722_v5  ;;  %v5311_v11 = vadd.f32 %v2848_v55, %v7354_v33  ;;  %v5375_v16 = vadd.f32 %v3234_v4, %v7358_v38  ;;  %4095 = vmatmul.mubr.bf16.gmra.mrb[144].mxu0 %v3719_v40  ;;  %v2850_v30 = vpop.f32.mrb[95].mxu0  ;;  %v3236_v23 = vpop.f32.mrb[95].mxu1  ;;  %vm3408_vm11 = vcmp.gt.bf16.partialorder %v7579_v52, 0 }
 0x351   : > { %v6112_v59 = vpop.eup %6111  ;;  %6125 = vpow.bf16 %v3529_v0  ;;  %4256 = vmatmul.mubr.bf16.gmra.mrb[144].mxu1 %v3721_v27  ;;  %v5312_v26 = vadd.f32 %v2850_v30, %v7362_v10  ;;  %v5376_v54 = vadd.f32 %v3236_v23, %v7366_v47  ;;  %vm3410_vm12 = vcmp.gt.bf16.partialorder %v7581_v60, 0 }
 0x352   : > { %v6114_v31 = vpop.eup %6113  ;;  %v7611_v15 = vpack.c.bf16 %v5311_v11, %v5309_v48  ;;  %v7613_v14 = vpack.c.bf16 %v5375_v16, %v5373_v25  ;;  %v3659_v20 = vsub.bf16 %v6112_v59, %v6395_v21  ;;  %vm3407_vm13 = vcmp.gt.bf16.partialorder %v7573_v36, 0 }
 0x353   : > { %v6116_v51 = vpop.eup %6115  ;;  %v7617_v7 = vpack.c.bf16 %v5312_v26, %v5310_v24  ;;  %v7619_v6 = vpack.c.bf16 %v5376_v54, %v5374_v63  ;;  %v3661_v1 = vsub.bf16 %v6114_v31, %v6395_v21  ;;  %vm3409_vm14 = vcmp.gt.bf16.partialorder %v7575_v58, 0 }
 0x354   : > { %v6118_v9 = vpop.eup %6117  ;;  %v3532_v29 = vmul.bf16 1069105081, %v7611_v15  ;;  %v3538_v41 = vmul.bf16 1069105081, %v7613_v14  ;;  %v3660_v28 = vsub.bf16 %v6116_v51, %v6395_v21  ;;  %v3723_v62 = vsel %vm3403_vm9, %v7535_v46, %v3659_v20 }
 0x355   : > { %v3535_v12 = vmul.bf16 1069105081, %v7617_v7  ;;  %v3541_v19 = vmul.bf16 1069105081, %v7619_v6  ;;  %v2854_v8 = vpop.f32.mrb[96].mxu0  ;;  %v3240_v18 = vpop.f32.mrb[96].mxu1  ;;  %v3662_v2 = vsub.bf16 %v6118_v9, %v6395_v21  ;;  %v3725_v50 = vsel %vm3405_vm10, %v7537_v43, %v3661_v1 }
 0x356   : > { %6127 = vpow.bf16 %v3532_v29  ;;  %v2856_v53 = vpop.f32.mrb[97].mxu0  ;;  %v3242_v57 = vpop.f32.mrb[97].mxu1  ;;  %v3724_v17 = vsel %vm3404_vm7, %v7541_v42, %v3660_v28  ;;  %v5313_v34 = vadd.f32 %v2854_v8, %v7354_v33  ;;  %v5377_v39 = vadd.f32 %v3240_v18, %v7358_v38 }
 0x357   : > { %6129 = vpow.bf16 %v3538_v41  ;;  %4102 = vmatprep.mubr.bf16.mxu0 %v3724_v17  ;;  %v3726_v32 = vsel %vm3406_vm8, %v7543_v22, %v3662_v2  ;;  %v2858_v49 = vpop.f32.mrb[98].mxu0  ;;  %v3244_v61 = vpop.f32.mrb[98].mxu1  ;;  %v5314_v42 = vadd.f32 %v2856_v53, %v7362_v10  ;;  %v5378_v37 = vadd.f32 %v3242_v57, %v7366_v47 }
 0x358   : > { %6131 = vpow.bf16 %v3535_v12  ;;  %4263 = vmatprep.mubr.bf16.mxu1 %v3726_v32  ;;  %v5315_v46 = vadd.f32 %v2858_v49, %v7354_v33  ;;  %v5379_v43 = vadd.f32 %v3244_v61, %v7358_v38  ;;  %4103 = vmatmul.mubr.bf16.gmra.mrb[148].mxu0 %v3723_v62  ;;  %v2860_v13 = vpop.f32.mrb[99].mxu0  ;;  %v3246_v0 = vpop.f32.mrb[99].mxu1  ;;  %vm3412_vm15 = vcmp.gt.bf16.partialorder %v7617_v7, 0 }
 0x359   : > { %v6120_v44 = vpop.eup %6119  ;;  %6133 = vpow.bf16 %v3541_v19  ;;  %4264 = vmatmul.mubr.bf16.gmra.mrb[148].mxu1 %v3725_v50  ;;  %v5316_v22 = vadd.f32 %v2860_v13, %v7362_v10  ;;  %v5380_v35 = vadd.f32 %v3246_v0, %v7366_v47  ;;  %vm3414_vm0 = vcmp.gt.bf16.partialorder %v7619_v6, 0 }
 0x35a   : > { %v6122_v45 = vpop.eup %6121  ;;  %v7649_v56 = vpack.c.bf16 %v5315_v46, %v5313_v34  ;;  %v7651_v3 = vpack.c.bf16 %v5379_v43, %v5377_v39  ;;  %v3663_v40 = vsub.bf16 %v6120_v44, %v6395_v21  ;;  %vm3411_vm1 = vcmp.gt.bf16.partialorder %v7611_v15, 0 }
 0x35b   : > { %v6124_v27 = vpop.eup %6123  ;;  %v7655_v48 = vpack.c.bf16 %v5316_v22, %v5314_v42  ;;  %v7657_v25 = vpack.c.bf16 %v5380_v35, %v5378_v37  ;;  %v3665_v5 = vsub.bf16 %v6122_v45, %v6395_v21  ;;  %vm3413_vm2 = vcmp.gt.bf16.partialorder %v7613_v14, 0 }
 0x35c   : > { %v6126_v55 = vpop.eup %6125  ;;  %v3544_v4 = vmul.bf16 1069105081, %v7649_v56  ;;  %v3550_v24 = vmul.bf16 1069105081, %v7651_v3  ;;  %v3664_v11 = vsub.bf16 %v6124_v27, %v6395_v21  ;;  %v3727_v20 = vsel %vm3407_vm13, %v7573_v36, %v3663_v40 }
 0x35d   : > { %v3547_v16 = vmul.bf16 1069105081, %v7655_v48  ;;  %v3553_v30 = vmul.bf16 1069105081, %v7657_v25  ;;  %v2864_v23 = vpop.f32.mrb[100].mxu0  ;;  %v3250_v59 = vpop.f32.mrb[100].mxu1  ;;  %v3666_v63 = vsub.bf16 %v6126_v55, %v6395_v21  ;;  %v3729_v51 = vsel %vm3409_vm14, %v7575_v58, %v3665_v5 }
 0x35e   : > { %6135 = vpow.bf16 %v3544_v4  ;;  %v2866_v26 = vpop.f32.mrb[101].mxu0  ;;  %v3252_v54 = vpop.f32.mrb[101].mxu1  ;;  %v3728_v31 = vsel %vm3408_vm11, %v7579_v52, %v3664_v11  ;;  %v5317_v1 = vadd.f32 %v2864_v23, %v7354_v33  ;;  %v5381_v9 = vadd.f32 %v3250_v59, %v7358_v38 }
 0x35f   : > { %6137 = vpow.bf16 %v3550_v24  ;;  %4110 = vmatprep.mubr.bf16.mxu0 %v3728_v31  ;;  %v3730_v29 = vsel %vm3410_vm12, %v7581_v60, %v3666_v63  ;;  %v2868_v41 = vpop.f32.mrb[102].mxu0  ;;  %v3254_v28 = vpop.f32.mrb[102].mxu1  ;;  %v5318_v52 = vadd.f32 %v2866_v26, %v7362_v10  ;;  %v5382_v18 = vadd.f32 %v3252_v54, %v7366_v47 }
 0x360   : > { %6139 = vpow.bf16 %v3547_v16  ;;  %4271 = vmatprep.mubr.bf16.mxu1 %v3730_v29  ;;  %v5319_v36 = vadd.f32 %v2868_v41, %v7354_v33  ;;  %v5383_v58 = vadd.f32 %v3254_v28, %v7358_v38  ;;  %4111 = vmatmul.mubr.bf16.gmra.mrb[152].mxu0 %v3727_v20  ;;  %v2870_v12 = vpop.f32.mrb[103].mxu0  ;;  %v3256_v19 = vpop.f32.mrb[103].mxu1  ;;  %vm3416_vm3 = vcmp.gt.bf16.partialorder %v7655_v48, 0 }
 0x361   : > { %v6128_v8 = vpop.eup %6127  ;;  %6141 = vpow.bf16 %v3553_v30  ;;  %4272 = vmatmul.mubr.bf16.gmra.mrb[152].mxu1 %v3729_v51  ;;  %v5320_v60 = vadd.f32 %v2870_v12, %v7362_v10  ;;  %v5384_v2 = vadd.f32 %v3256_v19, %v7366_v47  ;;  %vm3418_vm4 = vcmp.gt.bf16.partialorder %v7657_v25, 0 }
 0x362   : > { %v6130_v53 = vpop.eup %6129  ;;  %v7687_v57 = vpack.c.bf16 %v5319_v36, %v5317_v1  ;;  %v7689_v17 = vpack.c.bf16 %v5383_v58, %v5381_v9  ;;  %v3667_v62 = vsub.bf16 %v6128_v8, %v6395_v21  ;;  %vm3415_vm5 = vcmp.gt.bf16.partialorder %v7649_v56, 0 }
 0x363   : > { %v6132_v50 = vpop.eup %6131  ;;  %v7693_v34 = vpack.c.bf16 %v5320_v60, %v5318_v52  ;;  %v7695_v39 = vpack.c.bf16 %v5384_v2, %v5382_v18  ;;  %v3669_v32 = vsub.bf16 %v6130_v53, %v6395_v21  ;;  %vm3417_vm6 = vcmp.gt.bf16.partialorder %v7651_v3, 0 }
 0x364   : > { %v6134_v49 = vpop.eup %6133  ;;  %v3556_v61 = vmul.bf16 1069105081, %v7687_v57  ;;  %v3562_v42 = vmul.bf16 1069105081, %v7689_v17  ;;  %v3668_v46 = vsub.bf16 %v6132_v50, %v6395_v21  ;;  %v3731_v40 = vsel %vm3411_vm1, %v7611_v15, %v3667_v62 }
 0x365   : > { %v3559_v43 = vmul.bf16 1069105081, %v7693_v34  ;;  %v3565_v13 = vmul.bf16 1069105081, %v7695_v39  ;;  %v2874_v0 = vpop.f32.mrb[104].mxu0  ;;  %v3260_v44 = vpop.f32.mrb[104].mxu1  ;;  %v3670_v37 = vsub.bf16 %v6134_v49, %v6395_v21  ;;  %v3733_v27 = vsel %vm3413_vm2, %v7613_v14, %v3669_v32 }
 0x366   : > { %6143 = vpow.bf16 %v3556_v61  ;;  %v2876_v22 = vpop.f32.mrb[105].mxu0  ;;  %v3262_v35 = vpop.f32.mrb[105].mxu1  ;;  %v3732_v45 = vsel %vm3412_vm15, %v7617_v7, %v3668_v46  ;;  %v5321_v5 = vadd.f32 %v2874_v0, %v7354_v33  ;;  %v5385_v55 = vadd.f32 %v3260_v44, %v7358_v38 }
 0x367   : > { %6145 = vpow.bf16 %v3562_v42  ;;  %4118 = vmatprep.mubr.bf16.mxu0 %v3732_v45  ;;  %v3734_v4 = vsel %vm3414_vm0, %v7619_v6, %v3670_v37  ;;  %v2878_v24 = vpop.f32.mrb[106].mxu0  ;;  %v3264_v11 = vpop.f32.mrb[106].mxu1  ;;  %v5322_v7 = vadd.f32 %v2876_v22, %v7362_v10  ;;  %v5386_v59 = vadd.f32 %v3262_v35, %v7366_v47 }
 0x368   : > { %6147 = vpow.bf16 %v3559_v43  ;;  %4279 = vmatprep.mubr.bf16.mxu1 %v3734_v4  ;;  %v5323_v15 = vadd.f32 %v2878_v24, %v7354_v33  ;;  %v5387_v14 = vadd.f32 %v3264_v11, %v7358_v38  ;;  %4119 = vmatmul.mubr.bf16.gmra.mrb[156].mxu0 %v3731_v40  ;;  %v2880_v16 = vpop.f32.mrb[107].mxu0  ;;  %v3266_v30 = vpop.f32.mrb[107].mxu1  ;;  %vm3420_vm7 = vcmp.gt.bf16.partialorder %v7693_v34, 0 }
 0x369   : > { %v6136_v23 = vpop.eup %6135  ;;  %6149 = vpow.bf16 %v3565_v13  ;;  %4280 = vmatmul.mubr.bf16.gmra.mrb[156].mxu1 %v3733_v27  ;;  %v5324_v6 = vadd.f32 %v2880_v16, %v7362_v10  ;;  %v5388_v63 = vadd.f32 %v3266_v30, %v7366_v47  ;;  %vm3422_vm8 = vcmp.gt.bf16.partialorder %v7695_v39, 0 }
 0x36a   : > { %v6138_v26 = vpop.eup %6137  ;;  %v7725_v54 = vpack.c.bf16 %v5323_v15, %v5321_v5  ;;  %v7727_v31 = vpack.c.bf16 %v5387_v14, %v5385_v55  ;;  %v3671_v20 = vsub.bf16 %v6136_v23, %v6395_v21  ;;  %vm3419_vm9 = vcmp.gt.bf16.partialorder %v7687_v57, 0 }
 0x36b   : > { %v6140_v51 = vpop.eup %6139  ;;  %v7731_v1 = vpack.c.bf16 %v5324_v6, %v5322_v7  ;;  %v7733_v9 = vpack.c.bf16 %v5388_v63, %v5386_v59  ;;  %v3673_v29 = vsub.bf16 %v6138_v26, %v6395_v21  ;;  %vm3421_vm10 = vcmp.gt.bf16.partialorder %v7689_v17, 0 }
 0x36c   : > { %v6142_v41 = vpop.eup %6141  ;;  %v3568_v28 = vmul.bf16 1069105081, %v7725_v54  ;;  %v3574_v52 = vmul.bf16 1069105081, %v7727_v31  ;;  %v3672_v36 = vsub.bf16 %v6140_v51, %v6395_v21  ;;  %v3735_v62 = vsel %vm3415_vm5, %v7649_v56, %v3671_v20 }
 0x36d   : > { %v3571_v58 = vmul.bf16 1069105081, %v7731_v1  ;;  %v3577_v12 = vmul.bf16 1069105081, %v7733_v9  ;;  %v2884_v19 = vpop.f32.mrb[108].mxu0  ;;  %v3270_v8 = vpop.f32.mrb[108].mxu1  ;;  %v3674_v18 = vsub.bf16 %v6142_v41, %v6395_v21  ;;  %v3737_v50 = vsel %vm3417_vm6, %v7651_v3, %v3673_v29 }
 0x36e   : > { %6151 = vpow.bf16 %v3568_v28  ;;  %v2886_v60 = vpop.f32.mrb[109].mxu0  ;;  %v3272_v2 = vpop.f32.mrb[109].mxu1  ;;  %v3736_v53 = vsel %vm3416_vm3, %v7655_v48, %v3672_v36  ;;  %v5325_v32 = vadd.f32 %v2884_v19, %v7354_v33  ;;  %v5389_v49 = vadd.f32 %v3270_v8, %v7358_v38 }
 0x36f   : > { %6153 = vpow.bf16 %v3574_v52  ;;  %4126 = vmatprep.mubr.bf16.mxu0 %v3736_v53  ;;  %v3738_v61 = vsel %vm3418_vm4, %v7657_v25, %v3674_v18  ;;  %v2888_v42 = vpop.f32.mrb[110].mxu0  ;;  %v3274_v46 = vpop.f32.mrb[110].mxu1  ;;  %v5326_v48 = vadd.f32 %v2886_v60, %v7362_v10  ;;  %v5390_v44 = vadd.f32 %v3272_v2, %v7366_v47 }
 0x370   : > { %6155 = vpow.bf16 %v3571_v58  ;;  %4287 = vmatprep.mubr.bf16.mxu1 %v3738_v61  ;;  %v5327_v56 = vadd.f32 %v2888_v42, %v7354_v33  ;;  %v5391_v3 = vadd.f32 %v3274_v46, %v7358_v38  ;;  %4127 = vmatmul.mubr.bf16.gmra.mrb[160].mxu0 %v3735_v62  ;;  %v2890_v43 = vpop.f32.mrb[111].mxu0  ;;  %v3276_v13 = vpop.f32.mrb[111].mxu1  ;;  %vm3424_vm11 = vcmp.gt.bf16.partialorder %v7731_v1, 0 }
 0x371   : > { %v6144_v0 = vpop.eup %6143  ;;  %6157 = vpow.bf16 %v3577_v12  ;;  %4288 = vmatmul.mubr.bf16.gmra.mrb[160].mxu1 %v3737_v50  ;;  %v5328_v25 = vadd.f32 %v2890_v43, %v7362_v10  ;;  %v5392_v37 = vadd.f32 %v3276_v13, %v7366_v47  ;;  %vm3426_vm12 = vcmp.gt.bf16.partialorder %v7733_v9, 0 }
 0x372   : > { %v6146_v22 = vpop.eup %6145  ;;  %v7763_v35 = vpack.c.bf16 %v5327_v56, %v5325_v32  ;;  %v7765_v45 = vpack.c.bf16 %v5391_v3, %v5389_v49  ;;  %v3675_v40 = vsub.bf16 %v6144_v0, %v6395_v21  ;;  %vm3423_vm13 = vcmp.gt.bf16.partialorder %v7725_v54, 0 }
 0x373   : > { %v6148_v27 = vpop.eup %6147  ;;  %v7769_v5 = vpack.c.bf16 %v5328_v25, %v5326_v48  ;;  %v7771_v55 = vpack.c.bf16 %v5392_v37, %v5390_v44  ;;  %v3677_v4 = vsub.bf16 %v6146_v22, %v6395_v21  ;;  %vm3425_vm14 = vcmp.gt.bf16.partialorder %v7727_v31, 0 }
 0x374   : > { %v6150_v24 = vpop.eup %6149  ;;  %v3580_v11 = vmul.bf16 1069105081, %v7763_v35  ;;  %v3586_v7 = vmul.bf16 1069105081, %v7765_v45  ;;  %v3676_v15 = vsub.bf16 %v6148_v27, %v6395_v21  ;;  %v3739_v20 = vsel %vm3419_vm9, %v7687_v57, %v3675_v40 }
 0x375   : > { %v3583_v14 = vmul.bf16 1069105081, %v7769_v5  ;;  %v3589_v16 = vmul.bf16 1069105081, %v7771_v55  ;;  %v2894_v30 = vpop.f32.mrb[112].mxu0  ;;  %v3280_v23 = vpop.f32.mrb[112].mxu1  ;;  %v3678_v59 = vsub.bf16 %v6150_v24, %v6395_v21  ;;  %v3741_v51 = vsel %vm3421_vm10, %v7689_v17, %v3677_v4 }
 0x376   : > { %6159 = vpow.bf16 %v3580_v11  ;;  %v2896_v6 = vpop.f32.mrb[113].mxu0  ;;  %v3282_v63 = vpop.f32.mrb[113].mxu1  ;;  %v3740_v26 = vsel %vm3420_vm7, %v7693_v34, %v3676_v15  ;;  %v5329_v29 = vadd.f32 %v2894_v30, %v7354_v33  ;;  %v5393_v41 = vadd.f32 %v3280_v23, %v7358_v38 }
 0x377   : > { %6161 = vpow.bf16 %v3586_v7  ;;  %4134 = vmatprep.mubr.bf16.mxu0 %v3740_v26  ;;  %v3742_v28 = vsel %vm3422_vm8, %v7695_v39, %v3678_v59  ;;  %v2898_v52 = vpop.f32.mrb[114].mxu0  ;;  %v3284_v36 = vpop.f32.mrb[114].mxu1  ;;  %v5330_v34 = vadd.f32 %v2896_v6, %v7362_v10  ;;  %v5394_v8 = vadd.f32 %v3282_v63, %v7366_v47 }
 0x378   : > { %6163 = vpow.bf16 %v3583_v14  ;;  %4295 = vmatprep.mubr.bf16.mxu1 %v3742_v28  ;;  %v5331_v57 = vadd.f32 %v2898_v52, %v7354_v33  ;;  %v5395_v17 = vadd.f32 %v3284_v36, %v7358_v38  ;;  %4135 = vmatmul.mubr.bf16.gmra.mrb[164].mxu0 %v3739_v20  ;;  %v2900_v58 = vpop.f32.mrb[115].mxu0  ;;  %v3286_v12 = vpop.f32.mrb[115].mxu1  ;;  %vm3428_vm15 = vcmp.gt.bf16.partialorder %v7769_v5, 0 }
 0x379   : > { %v6152_v19 = vpop.eup %6151  ;;  %6165 = vpow.bf16 %v3589_v16  ;;  %4296 = vmatmul.mubr.bf16.gmra.mrb[164].mxu1 %v3741_v51  ;;  %v5332_v39 = vadd.f32 %v2900_v58, %v7362_v10  ;;  %v5396_v18 = vadd.f32 %v3286_v12, %v7366_v47  ;;  %vm3430_vm0 = vcmp.gt.bf16.partialorder %v7771_v55, 0 }
 0x37a   : > { %v6154_v60 = vpop.eup %6153  ;;  %v7801_v2 = vpack.c.bf16 %v5331_v57, %v5329_v29  ;;  %v7803_v53 = vpack.c.bf16 %v5395_v17, %v5393_v41  ;;  %v3679_v62 = vsub.bf16 %v6152_v19, %v6395_v21  ;;  %vm3427_vm1 = vcmp.gt.bf16.partialorder %v7763_v35, 0 }
 0x37b   : > { %v6156_v50 = vpop.eup %6155  ;;  %v7807_v32 = vpack.c.bf16 %v5332_v39, %v5330_v34  ;;  %v7809_v49 = vpack.c.bf16 %v5396_v18, %v5394_v8  ;;  %v3681_v61 = vsub.bf16 %v6154_v60, %v6395_v21  ;;  %vm3429_vm2 = vcmp.gt.bf16.partialorder %v7765_v45, 0 }
 0x37c   : > { %v6158_v42 = vpop.eup %6157  ;;  %v3592_v46 = vmul.bf16 1069105081, %v7801_v2  ;;  %v3598_v48 = vmul.bf16 1069105081, %v7803_v53  ;;  %v3680_v56 = vsub.bf16 %v6156_v50, %v6395_v21  ;;  %v3743_v40 = vsel %vm3423_vm13, %v7725_v54, %v3679_v62 }
 0x37d   : > { %v3595_v3 = vmul.bf16 1069105081, %v7807_v32  ;;  %v3601_v43 = vmul.bf16 1069105081, %v7809_v49  ;;  %v2904_v13 = vpop.f32.mrb[116].mxu0  ;;  %v3290_v0 = vpop.f32.mrb[116].mxu1  ;;  %v3682_v44 = vsub.bf16 %v6158_v42, %v6395_v21  ;;  %v3745_v27 = vsel %vm3425_vm14, %v7727_v31, %v3681_v61 }
 0x37e   : > { %6167 = vpow.bf16 %v3592_v46  ;;  %v2906_v25 = vpop.f32.mrb[117].mxu0  ;;  %v3292_v37 = vpop.f32.mrb[117].mxu1  ;;  %v3744_v22 = vsel %vm3424_vm11, %v7731_v1, %v3680_v56  ;;  %v5333_v4 = vadd.f32 %v2904_v13, %v7354_v33  ;;  %v5397_v24 = vadd.f32 %v3290_v0, %v7358_v38 }
 0x37f   : > { %6169 = vpow.bf16 %v3598_v48  ;;  %4142 = vmatprep.mubr.bf16.mxu0 %v3744_v22  ;;  %v3746_v11 = vsel %vm3426_vm12, %v7733_v9, %v3682_v44  ;;  %v2908_v7 = vpop.f32.mrb[118].mxu0  ;;  %v3294_v15 = vpop.f32.mrb[118].mxu1  ;;  %v5334_v1 = vadd.f32 %v2906_v25, %v7362_v10  ;;  %v5398_v23 = vadd.f32 %v3292_v37, %v7366_v47 }
 0x380   : > { %6171 = vpow.bf16 %v3595_v3  ;;  %4303 = vmatprep.mubr.bf16.mxu1 %v3746_v11  ;;  %v5335_v54 = vadd.f32 %v2908_v7, %v7354_v33  ;;  %v5399_v31 = vadd.f32 %v3294_v15, %v7358_v38  ;;  %4143 = vmatmul.mubr.bf16.gmra.mrb[168].mxu0 %v3743_v40  ;;  %v2910_v14 = vpop.f32.mrb[119].mxu0  ;;  %v3296_v16 = vpop.f32.mrb[119].mxu1  ;;  %vm3432_vm3 = vcmp.gt.bf16.partialorder %v7807_v32, 0 }
 0x381   : > { %v6160_v30 = vpop.eup %6159  ;;  %6173 = vpow.bf16 %v3601_v43  ;;  %4304 = vmatmul.mubr.bf16.gmra.mrb[168].mxu1 %v3745_v27  ;;  %v5336_v9 = vadd.f32 %v2910_v14, %v7362_v10  ;;  %v5400_v59 = vadd.f32 %v3296_v16, %v7366_v47  ;;  %vm3434_vm4 = vcmp.gt.bf16.partialorder %v7809_v49, 0 }
 0x382   : > { %v6162_v6 = vpop.eup %6161  ;;  %v7839_v63 = vpack.c.bf16 %v5335_v54, %v5333_v4  ;;  %v7841_v26 = vpack.c.bf16 %v5399_v31, %v5397_v24  ;;  %v3683_v20 = vsub.bf16 %v6160_v30, %v6395_v21  ;;  %vm3431_vm5 = vcmp.gt.bf16.partialorder %v7801_v2, 0 }
 0x383   : > { %v6164_v51 = vpop.eup %6163  ;;  %v7845_v29 = vpack.c.bf16 %v5336_v9, %v5334_v1  ;;  %v7847_v41 = vpack.c.bf16 %v5400_v59, %v5398_v23  ;;  %v3685_v28 = vsub.bf16 %v6162_v6, %v6395_v21  ;;  %vm3433_vm6 = vcmp.gt.bf16.partialorder %v7803_v53, 0 }
 0x384   : > { %v6166_v52 = vpop.eup %6165  ;;  %v3604_v36 = vmul.bf16 1069105081, %v7839_v63  ;;  %v3610_v34 = vmul.bf16 1069105081, %v7841_v26  ;;  %v3684_v57 = vsub.bf16 %v6164_v51, %v6395_v21  ;;  %v3747_v62 = vsel %vm3427_vm1, %v7763_v35, %v3683_v20 }
 0x385   : > { %v3607_v17 = vmul.bf16 1069105081, %v7845_v29  ;;  %v3613_v58 = vmul.bf16 1069105081, %v7847_v41  ;;  %v2914_v12 = vpop.f32.mrb[120].mxu0  ;;  %v3300_v19 = vpop.f32.mrb[120].mxu1  ;;  %v3686_v8 = vsub.bf16 %v6166_v52, %v6395_v21  ;;  %v3749_v50 = vsel %vm3429_vm2, %v7765_v45, %v3685_v28 }
 0x386   : > { %6175 = vpow.bf16 %v3604_v36  ;;  %v2916_v39 = vpop.f32.mrb[121].mxu0  ;;  %v3302_v18 = vpop.f32.mrb[121].mxu1  ;;  %v3748_v60 = vsel %vm3428_vm15, %v7769_v5, %v3684_v57  ;;  %v5337_v61 = vadd.f32 %v2914_v12, %v7354_v33  ;;  %v5401_v42 = vadd.f32 %v3300_v19, %v7358_v38 }
 0x387   : > { %6177 = vpow.bf16 %v3610_v34  ;;  %4150 = vmatprep.mubr.bf16.mxu0 %v3748_v60  ;;  %v3750_v46 = vsel %vm3430_vm0, %v7771_v55, %v3686_v8  ;;  %v2918_v48 = vpop.f32.mrb[122].mxu0  ;;  %v3304_v56 = vpop.f32.mrb[122].mxu1  ;;  %v5338_v5 = vadd.f32 %v2916_v39, %v7362_v10  ;;  %v5402_v0 = vadd.f32 %v3302_v18, %v7366_v47 }
 0x388   : > { %6179 = vpow.bf16 %v3607_v17  ;;  %4311 = vmatprep.mubr.bf16.mxu1 %v3750_v46  ;;  %v5339_v35 = vadd.f32 %v2918_v48, %v7354_v33  ;;  %v5403_v45 = vadd.f32 %v3304_v56, %v7358_v38  ;;  %4151 = vmatmul.mubr.bf16.gmra.mrb[172].mxu0 %v3747_v62  ;;  %v2920_v3 = vpop.f32.mrb[123].mxu0  ;;  %v3306_v43 = vpop.f32.mrb[123].mxu1  ;;  %vm3436_vm7 = vcmp.gt.bf16.partialorder %v7845_v29, 0 }
 0x389   : > { %v6168_v13 = vpop.eup %6167  ;;  %6181 = vpow.bf16 %v3613_v58  ;;  %4312 = vmatmul.mubr.bf16.gmra.mrb[172].mxu1 %v3749_v50  ;;  %v5340_v55 = vadd.f32 %v2920_v3, %v7362_v10  ;;  %v5404_v44 = vadd.f32 %v3306_v43, %v7366_v47  ;;  %vm3438_vm8 = vcmp.gt.bf16.partialorder %v7847_v41, 0 }
 0x38a   : > { %v6170_v25 = vpop.eup %6169  ;;  %v7877_v37 = vpack.c.bf16 %v5339_v35, %v5337_v61  ;;  %v7879_v22 = vpack.c.bf16 %v5403_v45, %v5401_v42  ;;  %v3687_v40 = vsub.bf16 %v6168_v13, %v6395_v21  ;;  %vm3435_vm9 = vcmp.gt.bf16.partialorder %v7839_v63, 0 }
 0x38b   : > { %v6172_v27 = vpop.eup %6171  ;;  %v7883_v4 = vpack.c.bf16 %v5340_v55, %v5338_v5  ;;  %v7885_v24 = vpack.c.bf16 %v5404_v44, %v5402_v0  ;;  %v3689_v11 = vsub.bf16 %v6170_v25, %v6395_v21  ;;  %vm3437_vm10 = vcmp.gt.bf16.partialorder %v7841_v26, 0 }
 0x38c   : > { %v6174_v7 = vpop.eup %6173  ;;  %v3616_v15 = vmul.bf16 1069105081, %v7877_v37  ;;  %v3622_v1 = vmul.bf16 1069105081, %v7879_v22  ;;  %v3688_v54 = vsub.bf16 %v6172_v27, %v6395_v21  ;;  %v3751_v20 = vsel %vm3431_vm5, %v7801_v2, %v3687_v40 }
 0x38d   : > { %v3619_v31 = vmul.bf16 1069105081, %v7883_v4  ;;  %v3625_v14 = vmul.bf16 1069105081, %v7885_v24  ;;  %v2924_v16 = vpop.f32.mrb[124].mxu0  ;;  %v3310_v30 = vpop.f32.mrb[124].mxu1  ;;  %v3690_v23 = vsub.bf16 %v6174_v7, %v6395_v21  ;;  %v3753_v51 = vsel %vm3433_vm6, %v7803_v53, %v3689_v11 }
 0x38e   : > { %6183 = vpow.bf16 %v3616_v15  ;;  %v2926_v9 = vpop.f32.mrb[125].mxu0  ;;  %v3312_v59 = vpop.f32.mrb[125].mxu1  ;;  %v3752_v6 = vsel %vm3432_vm3, %v7807_v32, %v3688_v54  ;;  %v5341_v28 = vadd.f32 %v2924_v16, %v7354_v33  ;;  %v5405_v52 = vadd.f32 %v3310_v30, %v7358_v38 }
 0x38f   : > { %6185 = vpow.bf16 %v3622_v1  ;;  %4158 = vmatprep.mubr.bf16.mxu0 %v3752_v6  ;;  %v3754_v36 = vsel %vm3434_vm4, %v7809_v49, %v3690_v23  ;;  %v2928_v34 = vpop.f32.mrb[126].mxu0  ;;  %v3314_v57 = vpop.f32.mrb[126].mxu1  ;;  %v5342_v32 = vadd.f32 %v2926_v9, %v7362_v10  ;;  %v5406_v19 = vadd.f32 %v3312_v59, %v7366_v47  ;;  %v7957_v9 = vld [vmem:[%s8031_s6] ss:$0 sm:$0xff] }
 0x390   : > { %6187 = vpow.bf16 %v3619_v31  ;;  %4319 = vmatprep.mubr.bf16.mxu1 %v3754_v36  ;;  %v5343_v2 = vadd.f32 %v2928_v34, %v7354_v33  ;;  %v5407_v53 = vadd.f32 %v3314_v57, %v7358_v38  ;;  %4159 = vmatmul.mubr.bf16.gmra.mrb[176].mxu0 %v3751_v20  ;;  %v2930_v17 = vpop.f32.mrb[127].mxu0  ;;  %v3316_v58 = vpop.f32.mrb[127].mxu1  ;;  %vm3440_vm11 = vcmp.gt.bf16.partialorder %v7883_v4, 0 }
 0x391   : > { %v6176_v12 = vpop.eup %6175  ;;  %6189 = vpow.bf16 %v3625_v14  ;;  %4320 = vmatmul.mubr.bf16.gmra.mrb[176].mxu1 %v3753_v51  ;;  %v5344_v49 = vadd.f32 %v2930_v17, %v7362_v10  ;;  %v5408_v8 = vadd.f32 %v3316_v58, %v7366_v47  ;;  %vm3442_vm12 = vcmp.gt.bf16.partialorder %v7885_v24, 0 }
 0x392   : > { %v6178_v39 = vpop.eup %6177  ;;  %v7914_v18 = vpack.c.bf16 %v5343_v2, %v5341_v28  ;;  %v7916_v60 = vpack.c.bf16 %v5407_v53, %v5405_v52  ;;  %v3691_v50 = vsub.bf16 %v6176_v12, %v6395_v21  ;;  %vm3439_vm13 = vcmp.gt.bf16.partialorder %v7877_v37, 0 }
 0x393   : > { %v6180_v33 = vpop.eup %6179  ;;  %v3380_v62 = vpack.c.bf16 %v5344_v49, %v5342_v32  ;;  %v3382_v38 = vpack.c.bf16 %v5408_v8, %v5406_v19  ;;  %v3693_v10 = vsub.bf16 %v6178_v39, %v6395_v21  ;;  %vm3441_vm14 = vcmp.gt.bf16.partialorder %v7879_v22, 0 }
 0x394   : > { %v6182_v61 = vpop.eup %6181  ;;  %v3628_v42 = vmul.bf16 1069105081, %v7914_v18  ;;  %v3634_v46 = vmul.bf16 1069105081, %v7916_v60  ;;  %v3692_v48 = vsub.bf16 %v6180_v33, %v6395_v21  ;;  %v3755_v3 = vsel %vm3435_vm9, %v7839_v63, %v3691_v50 }
 0x395   : > { %v3631_v47 = vmul.bf16 1069105081, %v3380_v62  ;;  %v3637_v56 = vmul.bf16 1069105081, %v3382_v38  ;;  %v3694_v5 = vsub.bf16 %v6182_v61, %v6395_v21  ;;  %v3757_v43 = vsel %vm3437_vm10, %v7841_v26, %v3693_v10 }
 0x396   : > { %6191 = vpow.bf16 %v3628_v42  ;;  %v3756_v35 = vsel %vm3436_vm7, %v7845_v29, %v3692_v48  ;;  %vm3444_vm15 = vcmp.gt.bf16.partialorder %v3380_v62, 0  ;;  %vm3446_vm0 = vcmp.gt.bf16.partialorder %v3382_v38, 0 }
 0x397   : > { %6193 = vpow.bf16 %v3634_v46  ;;  %4166 = vmatprep.mubr.bf16.mxu0 %v3756_v35  ;;  %v3758_v45 = vsel %vm3438_vm8, %v7847_v41, %v3694_v5  ;;  %vm3443_vm1 = vcmp.gt.bf16.partialorder %v7914_v18, 0  ;;  %vm3445_vm2 = vcmp.gt.bf16.partialorder %v7916_v60, 0 }
 0x398   : > { %6195 = vpow.bf16 %v3631_v47  ;;  %4327 = vmatprep.mubr.bf16.mxu1 %v3758_v45  ;;  %4167 = vmatmul.mubr.bf16.gmra.mrb[180].mxu0 %v3755_v3 }
 0x399   : > { %v6184_v13 = vpop.eup %6183  ;;  %6197 = vpow.bf16 %v3637_v56  ;;  %4328 = vmatmul.mubr.bf16.gmra.mrb[180].mxu1 %v3757_v43 }
 0x39a   : > { %v6186_v29 = vpop.eup %6185  ;;  %v3695_v55 = vsub.bf16 %v6184_v13, %v6395_v21 }
 0x39b   : > { %v6188_v0 = vpop.eup %6187  ;;  %v3697_v41 = vsub.bf16 %v6186_v29, %v6395_v21 }
 0x39c   : > { %v6190_v44 = vpop.eup %6189  ;;  %v3696_v25 = vsub.bf16 %v6188_v0, %v6395_v21  ;;  %v3759_v27 = vsel %vm3439_vm13, %v7877_v37, %v3695_v55 }
 0x39d   : > { %v3698_v63 = vsub.bf16 %v6190_v44, %v6395_v21  ;;  %v3761_v11 = vsel %vm3441_vm14, %v7879_v22, %v3697_v41 }
 0x39e   : > { %v3760_v40 = vsel %vm3440_vm11, %v7883_v4, %v3696_v25 }
 0x39f   : > { %4174 = vmatprep.mubr.bf16.mxu0 %v3760_v40  ;;  %v3762_v26 = vsel %vm3442_vm12, %v7885_v24, %v3698_v63 }
 0x3a0   : > { %4335 = vmatprep.mubr.bf16.mxu1 %v3762_v26  ;;  %4175 = vmatmul.mubr.bf16.gmra.mrb[184].mxu0 %v3759_v27 }
 0x3a1   : > { %v6192_v7 = vpop.eup %6191  ;;  %4336 = vmatmul.mubr.bf16.gmra.mrb[184].mxu1 %v3761_v11 }
 0x3a2   : > { %v6194_v15 = vpop.eup %6193  ;;  %v3699_v4 = vsub.bf16 %v6192_v7, %v6395_v21 }
 0x3a3   : > { %v6196_v1 = vpop.eup %6195  ;;  %v3701_v24 = vsub.bf16 %v6194_v15, %v6395_v21 }
 0x3a4   : > { %v6198_v54 = vpop.eup %6197  ;;  %v3700_v31 = vsub.bf16 %v6196_v1, %v6395_v21  ;;  %v3763_v16 = vsel %vm3443_vm1, %v7914_v18, %v3699_v4 }
 0x3a5   : > { %v3702_v37 = vsub.bf16 %v6198_v54, %v6395_v21  ;;  %v3765_v30 = vsel %vm3445_vm2, %v7916_v60, %v3701_v24 }
 0x3a6   : > { %v3764_v14 = vsel %vm3444_vm15, %v3380_v62, %v3700_v31 }
 0x3a7   : > { %4182 = vmatprep.mubr.bf16.mxu0 %v3764_v14  ;;  %v3766_v22 = vsel %vm3446_vm0, %v3382_v38, %v3702_v37 }
 0x3a8   : > { %4343 = vmatprep.mubr.bf16.mxu1 %v3766_v22  ;;  %4183 = vmatmul.mubr.bf16.gmra.mrb[188].mxu0 %v3763_v16 }
 0x3a9   : > { %4344 = vmatmul.mubr.bf16.gmra.mrb[188].mxu1 %v3765_v30 }
 0x403   : > { %v5073_v23 = vpop.f32.mrb[128].mxu0 }
 0x404   : > { %v5185_v21 = vpop.f32.mrb[128].mxu1  ;;  %v5074_v59 = vpop.f32.mrb[129].mxu0 }
 0x405   : > { %v5075_v6 = vadd.f32 %v5074_v59, %v5073_v23  ;;  %v5186_v20 = vpop.f32.mrb[129].mxu1  ;;  %v5076_v51 = vpop.f32.mrb[130].mxu0 }
 0x406   : > { %v5187_v28 = vadd.f32 %v5186_v20, %v5185_v21  ;;  %v5188_v52 = vpop.f32.mrb[130].mxu1  ;;  %v5077_v36 = vpop.f32.mrb[131].mxu0 }
 0x407   : > { %v4065_v34 = vadd.f32 %v5075_v6, %v7957_v9  ;;  %v5078_v57 = vadd.f32 %v5077_v36, %v5076_v51  ;;  %v5189_v32 = vpop.f32.mrb[131].mxu1 }
 0x408   : > { %v5190_v2 = vadd.f32 %v5189_v32, %v5188_v52 }
 0x409   : > { %v4226_v53 = vadd.f32 %v5187_v28, %v4065_v34  ;;  %v4068_v17 = vadd.f32 %v5078_v57, %v7957_v9 }
 0x40b   : > { %v4229_v58 = vadd.f32 %v5190_v2, %v4068_v17  ;;  %v5079_v12 = vpop.f32.mrb[132].mxu0 }
 0x40c   : > { %v5191_v19 = vpop.f32.mrb[132].mxu1  ;;  %v5080_v49 = vpop.f32.mrb[133].mxu0 }
 0x40d   : > { %v4965_v8 = vpack.c.bf16 %v4229_v58, %v4226_v53  ;;  %v5081_v39 = vadd.f32 %v5080_v49, %v5079_v12  ;;  %v5192_v18 = vpop.f32.mrb[133].mxu1  ;;  %v5082_v60 = vpop.f32.mrb[134].mxu0 }
 0x40e   : > { %v5193_v33 = vadd.f32 %v5192_v18, %v5191_v19  ;;  %v5194_v62 = vpop.f32.mrb[134].mxu1  ;;  %v5083_v38 = vpop.f32.mrb[135].mxu0 }
 0x40f   : > { %4966 = vst [vmem:[%s7964_s13] sm:$0xff] %v4965_v8   ;;  %v4073_v50 = vadd.f32 %v5081_v39, %v7957_v9  ;;  %v5084_v61 = vadd.f32 %v5083_v38, %v5082_v60  ;;  %v5195_v42 = vpop.f32.mrb[135].mxu1 }
 0x410   : > { %v5196_v46 = vadd.f32 %v5195_v42, %v5194_v62 }
 0x411   : > { %v4234_v48 = vadd.f32 %v5193_v33, %v4073_v50  ;;  %v4076_v10 = vadd.f32 %v5084_v61, %v7957_v9 }
 0x413   : > { %v4237_v47 = vadd.f32 %v5196_v46, %v4076_v10  ;;  %v5085_v56 = vpop.f32.mrb[136].mxu0 }
 0x414   : > { %v5197_v5 = vpop.f32.mrb[136].mxu1  ;;  %v5086_v35 = vpop.f32.mrb[137].mxu0 }
 0x415   : > { %v4970_v45 = vpack.c.bf16 %v4237_v47, %v4234_v48  ;;  %v5087_v3 = vadd.f32 %v5086_v35, %v5085_v56  ;;  %v5198_v43 = vpop.f32.mrb[137].mxu1  ;;  %v5088_v13 = vpop.f32.mrb[138].mxu0 }
 0x416   : > { %v5199_v29 = vadd.f32 %v5198_v43, %v5197_v5  ;;  %v5200_v0 = vpop.f32.mrb[138].mxu1  ;;  %v5089_v55 = vpop.f32.mrb[139].mxu0 }
 0x417   : > { %5042 = vst [vmem:[%s7964_s13 + $0x8] sm:$0xff] %v4970_v45   ;;  %v4081_v44 = vadd.f32 %v5087_v3, %v7957_v9  ;;  %v5090_v25 = vadd.f32 %v5089_v55, %v5088_v13  ;;  %v5201_v41 = vpop.f32.mrb[139].mxu1 }
 0x418   : > { %v5202_v63 = vadd.f32 %v5201_v41, %v5200_v0 }
 0x419   : > { %v4242_v40 = vadd.f32 %v5199_v29, %v4081_v44  ;;  %v4084_v26 = vadd.f32 %v5090_v25, %v7957_v9 }
 0x41b   : > { %v4245_v27 = vadd.f32 %v5202_v63, %v4084_v26  ;;  %v5091_v11 = vpop.f32.mrb[140].mxu0 }
 0x41c   : > { %v5203_v7 = vpop.f32.mrb[140].mxu1  ;;  %v5092_v15 = vpop.f32.mrb[141].mxu0 }
 0x41d   : > { %v4975_v1 = vpack.c.bf16 %v4245_v27, %v4242_v40  ;;  %v5093_v4 = vadd.f32 %v5092_v15, %v5091_v11  ;;  %v5204_v54 = vpop.f32.mrb[141].mxu1  ;;  %v5094_v31 = vpop.f32.mrb[142].mxu0 }
 0x41e   : > { %v5205_v24 = vadd.f32 %v5204_v54, %v5203_v7  ;;  %v5206_v37 = vpop.f32.mrb[142].mxu1  ;;  %v5095_v14 = vpop.f32.mrb[143].mxu0 }
 0x41f   : > { %5043 = vst [vmem:[%s7964_s13 + $0x10] sm:$0xff] %v4975_v1   ;;  %v4089_v22 = vadd.f32 %v5093_v4, %v7957_v9  ;;  %v5096_v16 = vadd.f32 %v5095_v14, %v5094_v31  ;;  %v5207_v30 = vpop.f32.mrb[143].mxu1 }
 0x420   : > { %v5208_v23 = vadd.f32 %v5207_v30, %v5206_v37 }
 0x421   : > { %v4250_v21 = vadd.f32 %v5205_v24, %v4089_v22  ;;  %v4092_v59 = vadd.f32 %v5096_v16, %v7957_v9 }
 0x423   : > { %v4253_v6 = vadd.f32 %v5208_v23, %v4092_v59  ;;  %v5097_v20 = vpop.f32.mrb[144].mxu0 }
 0x424   : > { %v5209_v51 = vpop.f32.mrb[144].mxu1  ;;  %v5098_v28 = vpop.f32.mrb[145].mxu0 }
 0x425   : > { %v4980_v52 = vpack.c.bf16 %v4253_v6, %v4250_v21  ;;  %v5099_v36 = vadd.f32 %v5098_v28, %v5097_v20  ;;  %v5210_v34 = vpop.f32.mrb[145].mxu1  ;;  %v5100_v57 = vpop.f32.mrb[146].mxu0 }
 0x426   : > { %v5211_v32 = vadd.f32 %v5210_v34, %v5209_v51  ;;  %v5212_v2 = vpop.f32.mrb[146].mxu1  ;;  %v5101_v53 = vpop.f32.mrb[147].mxu0 }
 0x427   : > { %5044 = vst [vmem:[%s7964_s13 + $0x18] sm:$0xff] %v4980_v52   ;;  %v4097_v17 = vadd.f32 %v5099_v36, %v7957_v9  ;;  %v5102_v58 = vadd.f32 %v5101_v53, %v5100_v57  ;;  %v5213_v12 = vpop.f32.mrb[147].mxu1 }
 0x428   : > { %v5214_v19 = vadd.f32 %v5213_v12, %v5212_v2 }
 0x429   : > { %v4258_v49 = vadd.f32 %v5211_v32, %v4097_v17  ;;  %v4100_v8 = vadd.f32 %v5102_v58, %v7957_v9 }
 0x42b   : > { %v4261_v39 = vadd.f32 %v5214_v19, %v4100_v8  ;;  %v5103_v18 = vpop.f32.mrb[148].mxu0 }
 0x42c   : > { %v5215_v60 = vpop.f32.mrb[148].mxu1  ;;  %v5104_v33 = vpop.f32.mrb[149].mxu0 }
 0x42d   : > { %v4985_v62 = vpack.c.bf16 %v4261_v39, %v4258_v49  ;;  %v5105_v38 = vadd.f32 %v5104_v33, %v5103_v18  ;;  %v5216_v50 = vpop.f32.mrb[149].mxu1  ;;  %v5106_v61 = vpop.f32.mrb[150].mxu0 }
 0x42e   : > { %v5217_v42 = vadd.f32 %v5216_v50, %v5215_v60  ;;  %v5218_v46 = vpop.f32.mrb[150].mxu1  ;;  %v5107_v48 = vpop.f32.mrb[151].mxu0 }
 0x42f   : > { %5045 = vst [vmem:[%s7964_s13 + $0x20] sm:$0xff] %v4985_v62   ;;  %v4105_v10 = vadd.f32 %v5105_v38, %v7957_v9  ;;  %v5108_v47 = vadd.f32 %v5107_v48, %v5106_v61  ;;  %v5219_v56 = vpop.f32.mrb[151].mxu1 }
 0x430   : > { %v5220_v5 = vadd.f32 %v5219_v56, %v5218_v46 }
 0x431   : > { %v4266_v35 = vadd.f32 %v5217_v42, %v4105_v10  ;;  %v4108_v45 = vadd.f32 %v5108_v47, %v7957_v9 }
 0x433   : > { %v4269_v3 = vadd.f32 %v5220_v5, %v4108_v45  ;;  %v5109_v43 = vpop.f32.mrb[152].mxu0 }
 0x434   : > { %v5221_v13 = vpop.f32.mrb[152].mxu1  ;;  %v5110_v29 = vpop.f32.mrb[153].mxu0 }
 0x435   : > { %v4990_v0 = vpack.c.bf16 %v4269_v3, %v4266_v35  ;;  %v5111_v55 = vadd.f32 %v5110_v29, %v5109_v43  ;;  %v5222_v44 = vpop.f32.mrb[153].mxu1  ;;  %v5112_v25 = vpop.f32.mrb[154].mxu0 }
 0x436   : > { %v5223_v41 = vadd.f32 %v5222_v44, %v5221_v13  ;;  %v5224_v63 = vpop.f32.mrb[154].mxu1  ;;  %v5113_v40 = vpop.f32.mrb[155].mxu0 }
 0x437   : > { %5046 = vst [vmem:[%s7964_s13 + $0x28] sm:$0xff] %v4990_v0   ;;  %v4113_v26 = vadd.f32 %v5111_v55, %v7957_v9  ;;  %v5114_v27 = vadd.f32 %v5113_v40, %v5112_v25  ;;  %v5225_v11 = vpop.f32.mrb[155].mxu1 }
 0x438   : > { %v5226_v7 = vadd.f32 %v5225_v11, %v5224_v63 }
 0x439   : > { %v4274_v15 = vadd.f32 %v5223_v41, %v4113_v26  ;;  %v4116_v1 = vadd.f32 %v5114_v27, %v7957_v9 }
 0x43b   : > { %v4277_v4 = vadd.f32 %v5226_v7, %v4116_v1  ;;  %v5115_v54 = vpop.f32.mrb[156].mxu0 }
 0x43c   : > { %v5227_v31 = vpop.f32.mrb[156].mxu1  ;;  %v5116_v24 = vpop.f32.mrb[157].mxu0 }
 0x43d   : > { %v4995_v37 = vpack.c.bf16 %v4277_v4, %v4274_v15  ;;  %v5117_v14 = vadd.f32 %v5116_v24, %v5115_v54  ;;  %v5228_v22 = vpop.f32.mrb[157].mxu1  ;;  %v5118_v16 = vpop.f32.mrb[158].mxu0 }
 0x43e   : > { %v5229_v30 = vadd.f32 %v5228_v22, %v5227_v31  ;;  %v5230_v23 = vpop.f32.mrb[158].mxu1  ;;  %v5119_v21 = vpop.f32.mrb[159].mxu0 }
 0x43f   : > { %5047 = vst [vmem:[%s7964_s13 + $0x30] sm:$0xff] %v4995_v37   ;;  %v4121_v59 = vadd.f32 %v5117_v14, %v7957_v9  ;;  %v5120_v6 = vadd.f32 %v5119_v21, %v5118_v16  ;;  %v5231_v20 = vpop.f32.mrb[159].mxu1 }
 0x440   : > { %v5232_v51 = vadd.f32 %v5231_v20, %v5230_v23 }
 0x441   : > { %v4282_v28 = vadd.f32 %v5229_v30, %v4121_v59  ;;  %v4124_v52 = vadd.f32 %v5120_v6, %v7957_v9 }
 0x443   : > { %v4285_v36 = vadd.f32 %v5232_v51, %v4124_v52  ;;  %v5121_v34 = vpop.f32.mrb[160].mxu0 }
 0x444   : > { %v5233_v57 = vpop.f32.mrb[160].mxu1  ;;  %v5122_v32 = vpop.f32.mrb[161].mxu0 }
 0x445   : > { %v5000_v2 = vpack.c.bf16 %v4285_v36, %v4282_v28  ;;  %v5123_v53 = vadd.f32 %v5122_v32, %v5121_v34  ;;  %v5234_v17 = vpop.f32.mrb[161].mxu1  ;;  %v5124_v58 = vpop.f32.mrb[162].mxu0 }
 0x446   : > { %v5235_v12 = vadd.f32 %v5234_v17, %v5233_v57  ;;  %v5236_v19 = vpop.f32.mrb[162].mxu1  ;;  %v5125_v49 = vpop.f32.mrb[163].mxu0 }
 0x447   : > { %5048 = vst [vmem:[%s7964_s13 + $0x38] sm:$0xff] %v5000_v2   ;;  %v4129_v8 = vadd.f32 %v5123_v53, %v7957_v9  ;;  %v5126_v39 = vadd.f32 %v5125_v49, %v5124_v58  ;;  %v5237_v18 = vpop.f32.mrb[163].mxu1 }
 0x448   : > { %v5238_v60 = vadd.f32 %v5237_v18, %v5236_v19 }
 0x449   : > { %v4290_v33 = vadd.f32 %v5235_v12, %v4129_v8  ;;  %v4132_v62 = vadd.f32 %v5126_v39, %v7957_v9 }
 0x44b   : > { %v4293_v38 = vadd.f32 %v5238_v60, %v4132_v62  ;;  %v5127_v50 = vpop.f32.mrb[164].mxu0 }
 0x44c   : > { %v5239_v61 = vpop.f32.mrb[164].mxu1  ;;  %v5128_v42 = vpop.f32.mrb[165].mxu0 }
 0x44d   : > { %v5005_v46 = vpack.c.bf16 %v4293_v38, %v4290_v33  ;;  %v5129_v48 = vadd.f32 %v5128_v42, %v5127_v50  ;;  %v5240_v10 = vpop.f32.mrb[165].mxu1  ;;  %v5130_v47 = vpop.f32.mrb[166].mxu0 }
 0x44e   : > { %v5241_v56 = vadd.f32 %v5240_v10, %v5239_v61  ;;  %v5242_v5 = vpop.f32.mrb[166].mxu1  ;;  %v5131_v35 = vpop.f32.mrb[167].mxu0 }
 0x44f   : > { %5049 = vst [vmem:[%s7964_s13 + $0x40] sm:$0xff] %v5005_v46   ;;  %v4137_v45 = vadd.f32 %v5129_v48, %v7957_v9  ;;  %v5132_v3 = vadd.f32 %v5131_v35, %v5130_v47  ;;  %v5243_v43 = vpop.f32.mrb[167].mxu1 }
 0x450   : > { %v5244_v13 = vadd.f32 %v5243_v43, %v5242_v5 }
 0x451   : > { %v4298_v29 = vadd.f32 %v5241_v56, %v4137_v45  ;;  %v4140_v0 = vadd.f32 %v5132_v3, %v7957_v9 }
 0x453   : > { %v4301_v55 = vadd.f32 %v5244_v13, %v4140_v0  ;;  %v5133_v44 = vpop.f32.mrb[168].mxu0 }
 0x454   : > { %v5245_v25 = vpop.f32.mrb[168].mxu1  ;;  %v5134_v41 = vpop.f32.mrb[169].mxu0 }
 0x455   : > { %v5010_v63 = vpack.c.bf16 %v4301_v55, %v4298_v29  ;;  %v5135_v40 = vadd.f32 %v5134_v41, %v5133_v44  ;;  %v5246_v26 = vpop.f32.mrb[169].mxu1  ;;  %v5136_v27 = vpop.f32.mrb[170].mxu0 }
 0x456   : > { %v5247_v11 = vadd.f32 %v5246_v26, %v5245_v25  ;;  %v5248_v7 = vpop.f32.mrb[170].mxu1  ;;  %v5137_v15 = vpop.f32.mrb[171].mxu0 }
 0x457   : > { %5050 = vst [vmem:[%s7964_s13 + $0x48] sm:$0xff] %v5010_v63   ;;  %v4145_v1 = vadd.f32 %v5135_v40, %v7957_v9  ;;  %v5138_v4 = vadd.f32 %v5137_v15, %v5136_v27  ;;  %v5249_v54 = vpop.f32.mrb[171].mxu1 }
 0x458   : > { %v5250_v31 = vadd.f32 %v5249_v54, %v5248_v7 }
 0x459   : > { %v4306_v24 = vadd.f32 %v5247_v11, %v4145_v1  ;;  %v4148_v37 = vadd.f32 %v5138_v4, %v7957_v9 }
 0x45b   : > { %v4309_v14 = vadd.f32 %v5250_v31, %v4148_v37  ;;  %v5139_v22 = vpop.f32.mrb[172].mxu0 }
 0x45c   : > { %v5251_v16 = vpop.f32.mrb[172].mxu1  ;;  %v5140_v30 = vpop.f32.mrb[173].mxu0 }
 0x45d   : > { %v5015_v23 = vpack.c.bf16 %v4309_v14, %v4306_v24  ;;  %v5141_v21 = vadd.f32 %v5140_v30, %v5139_v22  ;;  %v5252_v59 = vpop.f32.mrb[173].mxu1  ;;  %v5142_v6 = vpop.f32.mrb[174].mxu0 }
 0x45e   : > { %v5253_v20 = vadd.f32 %v5252_v59, %v5251_v16  ;;  %v5254_v51 = vpop.f32.mrb[174].mxu1  ;;  %v5143_v28 = vpop.f32.mrb[175].mxu0 }
 0x45f   : > { %5051 = vst [vmem:[%s7964_s13 + $0x50] sm:$0xff] %v5015_v23   ;;  %v4153_v52 = vadd.f32 %v5141_v21, %v7957_v9  ;;  %v5144_v36 = vadd.f32 %v5143_v28, %v5142_v6  ;;  %v5255_v34 = vpop.f32.mrb[175].mxu1 }
 0x460   : > { %v5256_v57 = vadd.f32 %v5255_v34, %v5254_v51 }
 0x461   : > { %v4314_v32 = vadd.f32 %v5253_v20, %v4153_v52  ;;  %v4156_v2 = vadd.f32 %v5144_v36, %v7957_v9 }
 0x463   : > { %v4317_v53 = vadd.f32 %v5256_v57, %v4156_v2  ;;  %v5145_v17 = vpop.f32.mrb[176].mxu0 }
 0x464   : > { %v5257_v58 = vpop.f32.mrb[176].mxu1  ;;  %v5146_v12 = vpop.f32.mrb[177].mxu0 }
 0x465   : > { %v5020_v19 = vpack.c.bf16 %v4317_v53, %v4314_v32  ;;  %v5147_v49 = vadd.f32 %v5146_v12, %v5145_v17  ;;  %v5258_v8 = vpop.f32.mrb[177].mxu1  ;;  %v5148_v39 = vpop.f32.mrb[178].mxu0 }
 0x466   : > { %v5259_v18 = vadd.f32 %v5258_v8, %v5257_v58  ;;  %v5260_v60 = vpop.f32.mrb[178].mxu1  ;;  %v5149_v33 = vpop.f32.mrb[179].mxu0 }
 0x467   : > { %5052 = vst [vmem:[%s7964_s13 + $0x58] sm:$0xff] %v5020_v19   ;;  %v4161_v62 = vadd.f32 %v5147_v49, %v7957_v9  ;;  %v5150_v38 = vadd.f32 %v5149_v33, %v5148_v39  ;;  %v5261_v50 = vpop.f32.mrb[179].mxu1 }
 0x468   : > { %v5262_v61 = vadd.f32 %v5261_v50, %v5260_v60 }
 0x469   : > { %v4322_v42 = vadd.f32 %v5259_v18, %v4161_v62  ;;  %v4164_v46 = vadd.f32 %v5150_v38, %v7957_v9 }
 0x46b   : > { %v4325_v48 = vadd.f32 %v5262_v61, %v4164_v46  ;;  %v5151_v10 = vpop.f32.mrb[180].mxu0 }
 0x46c   : > { %v5263_v47 = vpop.f32.mrb[180].mxu1  ;;  %v5152_v56 = vpop.f32.mrb[181].mxu0 }
 0x46d   : > { %v5025_v5 = vpack.c.bf16 %v4325_v48, %v4322_v42  ;;  %v5153_v35 = vadd.f32 %v5152_v56, %v5151_v10  ;;  %v5264_v45 = vpop.f32.mrb[181].mxu1  ;;  %v5154_v3 = vpop.f32.mrb[182].mxu0 }
 0x46e   : > { %v5265_v43 = vadd.f32 %v5264_v45, %v5263_v47  ;;  %v5266_v13 = vpop.f32.mrb[182].mxu1  ;;  %v5155_v29 = vpop.f32.mrb[183].mxu0 }
 0x46f   : > { %5053 = vst [vmem:[%s7964_s13 + $0x60] sm:$0xff] %v5025_v5   ;;  %v4169_v0 = vadd.f32 %v5153_v35, %v7957_v9  ;;  %v5156_v55 = vadd.f32 %v5155_v29, %v5154_v3  ;;  %v5267_v44 = vpop.f32.mrb[183].mxu1 }
 0x470   : > { %v5268_v25 = vadd.f32 %v5267_v44, %v5266_v13 }
 0x471   : > { %v4330_v41 = vadd.f32 %v5265_v43, %v4169_v0  ;;  %v4172_v63 = vadd.f32 %v5156_v55, %v7957_v9 }
 0x473   : > { %v4333_v40 = vadd.f32 %v5268_v25, %v4172_v63  ;;  %v5157_v26 = vpop.f32.mrb[184].mxu0 }
 0x474   : > { %v5269_v27 = vpop.f32.mrb[184].mxu1  ;;  %v5158_v11 = vpop.f32.mrb[185].mxu0 }
 0x475   : > { %v5030_v7 = vpack.c.bf16 %v4333_v40, %v4330_v41  ;;  %v5159_v15 = vadd.f32 %v5158_v11, %v5157_v26  ;;  %v5270_v1 = vpop.f32.mrb[185].mxu1  ;;  %v5160_v4 = vpop.f32.mrb[186].mxu0 }
 0x476   : > { %v5271_v54 = vadd.f32 %v5270_v1, %v5269_v27  ;;  %v5272_v31 = vpop.f32.mrb[186].mxu1  ;;  %v5161_v24 = vpop.f32.mrb[187].mxu0 }
 0x477   : > { %5054 = vst [vmem:[%s7964_s13 + $0x68] sm:$0xff] %v5030_v7   ;;  %v4177_v37 = vadd.f32 %v5159_v15, %v7957_v9  ;;  %v5162_v14 = vadd.f32 %v5161_v24, %v5160_v4  ;;  %v5273_v22 = vpop.f32.mrb[187].mxu1 }
 0x478   : > { %v5274_v16 = vadd.f32 %v5273_v22, %v5272_v31 }
 0x479   : > { %v4338_v30 = vadd.f32 %v5271_v54, %v4177_v37  ;;  %v4180_v23 = vadd.f32 %v5162_v14, %v7957_v9 }
 0x47b   : > { %v4341_v21 = vadd.f32 %v5274_v16, %v4180_v23  ;;  %v5163_v59 = vpop.f32.mrb[188].mxu0 }
 0x47c   : > { %v5275_v6 = vpop.f32.mrb[188].mxu1  ;;  %v5164_v20 = vpop.f32.mrb[189].mxu0 }
 0x47d   : > { %v5035_v51 = vpack.c.bf16 %v4341_v21, %v4338_v30  ;;  %v5165_v28 = vadd.f32 %v5164_v20, %v5163_v59  ;;  %v5276_v52 = vpop.f32.mrb[189].mxu1  ;;  %v5166_v36 = vpop.f32.mrb[190].mxu0 }
 0x47e   : > { %v5277_v34 = vadd.f32 %v5276_v52, %v5275_v6  ;;  %v5278_v57 = vpop.f32.mrb[190].mxu1  ;;  %v5167_v32 = vpop.f32.mrb[191].mxu0 }
 0x47f   : > { %5055 = vst [vmem:[%s7964_s13 + $0x70] sm:$0xff] %v5035_v51   ;;  %v4185_v2 = vadd.f32 %v5165_v28, %v7957_v9  ;;  %v5168_v53 = vadd.f32 %v5167_v32, %v5166_v36  ;;  %v5279_v17 = vpop.f32.mrb[191].mxu1 }
 0x480   : > { %v5280_v58 = vadd.f32 %v5279_v17, %v5278_v57 }
 0x481   : > { %v4346_v12 = vadd.f32 %v5277_v34, %v4185_v2  ;;  %v4188_v19 = vadd.f32 %v5168_v53, %v7957_v9 }
 0x483   : > { %v4349_v49 = vadd.f32 %v5280_v58, %v4188_v19 }
 0x485   : > { %v5040_v8 = vpack.c.bf16 %v4349_v49, %v4346_v12 }
 0x487   : > { %5056 = vst [vmem:[%s7964_s13 + $0x78] sm:$0xff] %v5040_v8  }
 0x488 PF: > { %p19_p11 = scmp.ge.s32.totalorder %s6584_s18, 4   ;;  %s8046_s24 = smov %s6375_s25 }
 0x489   : > { %s8047_s25 = smov %s6379_s26  ;;  %s8048_s26 = smov %s6593_s22 }
 0x48a   : > { %s8049_s27 = smov %s6584_s18  ;;  %21 = sbr.rel (!%p19_p11) target bundleno = 5 (0x5), region = 104 }
 0x491   :  { %4534 = vsyncpa [#allocation3], 1 }
 0x492   :  { %4536 = vsyncpa [#allocation3 + $0x1], 1 }
 0x493   :  { %4537 = vsyncpa [#allocation5], 1 }
 0x494   :  { %4538 = vsyncpa [#allocation8], 1 }

</bundles_post_ra>
